<compile_context>
chip_gen: v6e
topology: v6e:2x2x1
jax: 0.10.0
libtpu: 0.0.40
codegen_flags: <defaults>
</compile_context>

<pallas_src>
import math
import functools

import jax
import jax.numpy as jnp
from jax.experimental import pallas as pl
from jax.experimental.pallas import tpu as pltpu

# ----------------------------- configuration ---------------------------------
FEAT_IN = 16
D_MODEL = 32
FF_EXPANSION = 4
D_FF = D_MODEL * FF_EXPANSION          # 128
N_LAYERS = 2
N_HEADS = 4
D_HEAD = D_MODEL // N_HEADS            # 8
CONV_KERNEL = 5
FEAT_OUT = 16
XSCALE = math.sqrt(D_MODEL)            # xscaling=True
LN_EPS = 1e-5
BN_EPS = 1e-5
MXU_DTYPE = jnp.bfloat16               # matmul operands; accumulation stays float32
NV_ROWS = 21 + CONV_KERNEL             # rows in the packed per-layer (NV, D) vector array


# ------------------------------ in-kernel helpers ------------------------------
def _ln(y, g, b):
    mu = jnp.mean(y, axis=-1, keepdims=True)
    var = jnp.mean(jnp.square(y - mu), axis=-1, keepdims=True)
    return (y - mu) * jax.lax.rsqrt(var + LN_EPS) * g + b


# ------------------------------ fused encoder kernel ---------------------------
def _encoder_kernel(len_ref, audio_ref, pe_ref, prew_ref, prev_ref,
                    wa_ref, wb_ref, bw_ref, vec_ref, outw_ref, outb_ref, o_ref):
    """One batch row per grid step: full encoder forward with VMEM-resident activations."""
    b = pl.program_id(0)
    L = len_ref[b]
    D = D_MODEL

    # entry transpose folded in-kernel: (FEAT_IN, T) -> (T, FEAT_IN)
    x_in = jnp.transpose(audio_ref[0], (1, 0))
    T = x_in.shape[0]

    # pre_encode (Linear) + x*sqrt(d_model) + abs-pos PE + pre_ln, fused
    h = jnp.dot(x_in.astype(MXU_DTYPE), prew_ref[...],
                preferred_element_type=jnp.float32) + prev_ref[0]
    h = h * XSCALE + pe_ref[...]
    x = _ln(h, prev_ref[1], prev_ref[2])

    # masks built from the scalar-prefetched length (no HBM masks)
    t_row = jax.lax.broadcasted_iota(jnp.int32, (T, T), 0)
    t_col = jax.lax.broadcasted_iota(jnp.int32, (T, T), 1)
    valid = (t_row < L) & (t_col < L)                       # (T, T) attention mask
    t_idx = jax.lax.broadcasted_iota(jnp.int32, (T, D), 0)
    pad_ok = t_idx < L                                      # (T, D) pad mask for conv

    inv_sqrt_dh = 1.0 / math.sqrt(D_HEAD)
    pad = (CONV_KERNEL - 1) // 2

    for l in range(N_LAYERS):                               # static unroll; weights VMEM-resident
        wa = wa_ref[l]                                      # (D, 15D)  bf16 packed matrices
        wb = wb_ref[l]                                      # (4D, 2D)  bf16 packed matrices
        bw = bw_ref[l]                                      # (4, 4D)   wide biases
        vec = vec_ref[l]                                    # (NV, D)   per-channel vectors

        # ---------------- MHSA block ----------------
        residual = x
        xs = x * vec[0] + vec[1]                            # ScaleBias (adaptive_scale)
        qkv = jnp.dot(xs.astype(MXU_DTYPE), wa[:, 0:3 * D],
                      preferred_element_type=jnp.float32) + bw[0:1, 0:3 * D]
        q = qkv[:, 0:D]
        k = qkv[:, D:2 * D]
        v = qkv[:, 2 * D:3 * D]
        qh = jnp.stack([q[:, hh * D_HEAD:(hh + 1) * D_HEAD] for hh in range(N_HEADS)],
                       axis=0).astype(MXU_DTYPE)            # (H, T, dh)
        kh = jnp.stack([k[:, hh * D_HEAD:(hh + 1) * D_HEAD] for hh in range(N_HEADS)],
                       axis=0).astype(MXU_DTYPE)
        vh = jnp.stack([v[:, hh * D_HEAD:(hh + 1) * D_HEAD] for hh in range(N_HEADS)],
                       axis=0).astype(MXU_DTYPE)
        s = jnp.einsum("htd,hsd->hts", qh, kh,
                       preferred_element_type=jnp.float32) * inv_sqrt_dh
        s = jnp.where(valid[None], s, -10000.0)             # NeMo masked_fill(-10000)
        p = jax.nn.softmax(s, axis=-1)
        p = jnp.where(valid[None], p, 0.0)                  # NeMo zeroes masked attention
        ctx = jnp.einsum("hts,hsd->htd", p.astype(MXU_DTYPE), vh,
                         preferred_element_type=jnp.float32)
        ctx = jnp.concatenate([ctx[hh] for hh in range(N_HEADS)], axis=-1)   # (T, D)
        out = jnp.dot(ctx.astype(MXU_DTYPE), wa[:, 3 * D:4 * D],
                      preferred_element_type=jnp.float32) + vec[2]
        x = _ln(residual + out, vec[3], vec[4])

        # ---------------- FF1 block ----------------
        residual = x
        xs = x * vec[5] + vec[6]
        h1 = jnp.dot(xs.astype(MXU_DTYPE), wa[:, 4 * D:8 * D],
                     preferred_element_type=jnp.float32) + bw[1:2, :]
        h1 = h1 * jax.nn.sigmoid(h1)                        # Swish (f32 on VPU/EUP)
        out = jnp.dot(h1.astype(MXU_DTYPE), wb[:, 0:D],
                      preferred_element_type=jnp.float32) + vec[7]
        x = _ln(residual + out, vec[8], vec[9])

        # ---------------- Conv block ----------------
        residual = x
        xs = x * vec[10] + vec[11]
        hc = jnp.dot(xs.astype(MXU_DTYPE), wa[:, 8 * D:10 * D],
                     preferred_element_type=jnp.float32) + bw[2:3, 0:2 * D]
        z = hc[:, 0:D] * jax.nn.sigmoid(hc[:, D:2 * D])     # GLU over channels
        z = jnp.where(pad_ok, z, 0.0)                       # zero padded frames

        # depthwise conv, 'same' zero padding; BN(eval) already folded into taps + bias
        acc = z * vec[12 + pad]                             # center tap
        for j in range(CONV_KERNEL):
            d = j - pad
            if d == 0:
                continue
            shifted = pltpu.roll(z, shift=(-d) % T, axis=0) # shifted[t] = z[t + d] (circular)
            inside = (t_idx + d >= 0) & (t_idx + d < T)
            shifted = jnp.where(inside, shifted, 0.0)       # kill wrapped rows (zero pad)
            acc = acc + shifted * vec[12 + j]
        y = acc + vec[12 + CONV_KERNEL]                     # folded conv+BN bias
        y = y * jax.nn.sigmoid(y)                           # Swish
        out = jnp.dot(y.astype(MXU_DTYPE), wa[:, 10 * D:11 * D],
                      preferred_element_type=jnp.float32) + vec[18]
        x = _ln(residual + out, vec[19], vec[20])

        # ---------------- FF2 block ----------------
        residual = x
        xs = x * vec[21] + vec[22]
        h2 = jnp.dot(xs.astype(MXU_DTYPE), wa[:, 11 * D:15 * D],
                     preferred_element_type=jnp.float32) + bw[3:4, :]
        h2 = h2 * jax.nn.sigmoid(h2)
        out = jnp.dot(h2.astype(MXU_DTYPE), wb[:, D:2 * D],
                      preferred_element_type=jnp.float32) + vec[23]
        x = _ln(residual + out, vec[24], vec[25])

    # out_proj + exit transpose (T, feat_out) -> (feat_out, T), folded in-kernel
    out = jnp.dot(x.astype(MXU_DTYPE), outw_ref[...],
                  preferred_element_type=jnp.float32) + outb_ref[...]
    o_ref[0] = jnp.transpose(out, (1, 0))


# ------------------------------ host-side packing ------------------------------
def sinusoidal_pe(length, d_model):
    pos = jnp.arange(length, dtype=jnp.float32)[:, None]
    div = jnp.exp(
        jnp.arange(0, d_model, 2, dtype=jnp.float32) * (-math.log(10000.0) / d_model)
    )
    pe = jnp.zeros((length, d_model), jnp.float32)
    pe = pe.at[:, 0::2].set(jnp.sin(pos * div))
    pe = pe.at[:, 1::2].set(jnp.cos(pos * div))
    return pe


def pack_params(params):
    """Fold BN into the depthwise conv and pack all parameters into a few dense arrays."""
    pre_w, pre_b = params["pre_encode"]
    pg, pb = params["pre_ln"]
    pre_vec = jnp.stack([pre_b, pg, pb], axis=0)                      # (3, D)

    wa_list, wb_list, bw_list, vec_list = [], [], [], []
    for lyr in params["layers"]:
        wqkv, bqkv = lyr["wqkv"]
        wo, bo = lyr["wo"]
        f1w1, f1b1 = lyr["ff1_w1"]
        f1w2, f1b2 = lyr["ff1_w2"]
        p1w, p1b = lyr["pw1"]
        p2w, p2b = lyr["pw2"]
        f2w1, f2b1 = lyr["ff2_w1"]
        f2w2, f2b2 = lyr["ff2_w2"]
        bng, bnb, bnm, bnv = lyr["bn"]
        dww, dwb = lyr["dw_w"], lyr["dw_b"]

        # packed matmul weights
        wa_list.append(jnp.concatenate([wqkv, wo, f1w1, p1w, p2w, f2w1], axis=1))  # (D, 15D)
        wb_list.append(jnp.concatenate([f1w2, f2w2], axis=1))                      # (4D, 2D)

        # wide biases (lane-width D_FF, zero padded)
        def wide(v):
            return jnp.pad(v, (0, D_FF - v.shape[0]))
        bw_list.append(jnp.stack([wide(bqkv), wide(f1b1), wide(p1b), wide(f2b1)], axis=0))

        # fold BatchNorm1d (eval, running stats) into depthwise conv taps + bias
        s = bng * jax.lax.rsqrt(bnv + BN_EPS)
        dww_f = dww * s[None, :]
        dwb_f = (dwb - bnm) * s + bnb

        asc, asb = lyr["attn_scale"]
        nag, nab = lyr["norm_att"]
        f1sc, f1sb = lyr["ff1_scale"]
        n1g, n1b = lyr["norm_ff1"]
        csc, csb = lyr["conv_scale"]
        ncg, ncb = lyr["norm_conv"]
        f2sc, f2sb = lyr["ff2_scale"]
        n2g, n2b = lyr["norm_ff2"]
        rows = ([asc, asb, bo, nag, nab,
                 f1sc, f1sb, f1b2, n1g, n1b,
                 csc, csb]
                + [dww_f[j] for j in range(CONV_KERNEL)]
                + [dwb_f, p2b, ncg, ncb,
                   f2sc, f2sb, f2b2, n2g, n2b])
        assert len(rows) == NV_ROWS
        vec_list.append(jnp.stack(rows, axis=0))                       # (NV, D)

    ow, ob = params["out_proj"]
    return {
        "pre_w": pre_w.astype(MXU_DTYPE),
        "pre_vec": pre_vec,
        "wa": jnp.stack(wa_list, axis=0).astype(MXU_DTYPE),            # (L, D, 15D)
        "wb": jnp.stack(wb_list, axis=0).astype(MXU_DTYPE),            # (L, 4D, 2D)
        "bias_wide": jnp.stack(bw_list, axis=0),                       # (L, 4, 4D)
        "vec": jnp.stack(vec_list, axis=0),                            # (L, NV, D)
        "out_w": ow.astype(MXU_DTYPE),                                 # (D, FEAT_OUT)
        "out_b": ob.reshape(1, -1),                                    # (1, FEAT_OUT)
    }


# ------------------------------ encoder wrapper --------------------------------
def squeezeformer_encoder(audio_signal, length, packed):
    # audio_signal: (B, FEAT_IN, T)  ->  returns ((B, FEAT_OUT, T), length)
    B, F, T = audio_signal.shape
    length = length.astype(jnp.int32)
    pe = sinusoidal_pe(T, D_MODEL)

    rep2 = lambda b, lens: (0, 0)
    rep3 = lambda b, lens: (0, 0, 0)
    grid_spec = pltpu.PrefetchScalarGridSpec(
        num_scalar_prefetch=1,
        grid=(B,),
        in_specs=[
            pl.BlockSpec((1, F, T), lambda b, lens: (b, 0, 0)),            # audio (per batch row)
            pl.BlockSpec((T, D_MODEL), rep2),                              # shared PE
            pl.BlockSpec((F, D_MODEL), rep2),                              # pre_encode W
            pl.BlockSpec((3, D_MODEL), rep2),                              # pre bias / pre_ln g,b
            pl.BlockSpec((N_LAYERS, D_MODEL, 15 * D_MODEL), rep3),         # packed (D,*) weights
            pl.BlockSpec((N_LAYERS, D_FF, 2 * D_MODEL), rep3),             # packed (4D,D) weights
            pl.BlockSpec((N_LAYERS, 4, D_FF), rep3),                       # wide biases
            pl.BlockSpec((N_LAYERS, NV_ROWS, D_MODEL), rep3),              # per-channel vectors
            pl.BlockSpec((D_MODEL, FEAT_OUT), rep2),                       # out_proj W
            pl.BlockSpec((1, FEAT_OUT), rep2),                             # out_proj b
        ],
        out_specs=pl.BlockSpec((1, FEAT_OUT, T), lambda b, lens: (b, 0, 0)),
    )
    out = pl.pallas_call(
        _encoder_kernel,
        out_shape=jax.ShapeDtypeStruct((B, FEAT_OUT, T), jnp.float32),
        grid_spec=grid_spec,
        compiler_params=pltpu.CompilerParams(dimension_semantics=("parallel",)),
    )(length, audio_signal.astype(jnp.float32), pe,
      packed["pre_w"], packed["pre_vec"], packed["wa"], packed["wb"],
      packed["bias_wide"], packed["vec"], packed["out_w"], packed["out_b"])
    return out, length


# ------------------------------ deterministic init -----------------------------
def init_params(key):
    keys = iter(jax.random.split(key, 512))

    def dense(din, dout):
        return (
            jax.random.normal(next(keys), (din, dout), jnp.float32) * 0.05,
            jax.random.normal(next(keys), (dout,), jnp.float32) * 0.05,
        )

    def ln():
        return (jnp.ones((D_MODEL,), jnp.float32), jnp.zeros((D_MODEL,), jnp.float32))

    def sb():   # ScaleBiasLayer init (scale=1, bias=0)
        return (jnp.ones((D_MODEL,), jnp.float32), jnp.zeros((D_MODEL,), jnp.float32))

    params = {
        "pre_encode": dense(FEAT_IN, D_MODEL),
        "pre_ln": ln(),
        "out_proj": dense(D_MODEL, FEAT_OUT),
        "layers": [],
    }
    for _ in range(N_LAYERS):
        wq, bq = dense(D_MODEL, D_MODEL)
        wk, bk = dense(D_MODEL, D_MODEL)
        wv, bv = dense(D_MODEL, D_MODEL)
        lyr = {
            "attn_scale": sb(),
            "wqkv": (jnp.concatenate([wq, wk, wv], axis=1),
                     jnp.concatenate([bq, bk, bv], axis=0)),
            "wo": dense(D_MODEL, D_MODEL),
            "norm_att": ln(),
            "ff1_scale": sb(),
            "ff1_w1": dense(D_MODEL, D_FF),
            "ff1_w2": dense(D_FF, D_MODEL),
            "norm_ff1": ln(),
            "conv_scale": sb(),
            "pw1": dense(D_MODEL, 2 * D_MODEL),
            "dw_w": jax.random.normal(next(keys), (CONV_KERNEL, D_MODEL), jnp.float32) * 0.05,
            "dw_b": jax.random.normal(next(keys), (D_MODEL,), jnp.float32) * 0.05,
            # BatchNorm1d eval: (gamma, beta, running_mean, running_var) at PyTorch defaults
            "bn": (jnp.ones((D_MODEL,), jnp.float32), jnp.zeros((D_MODEL,), jnp.float32),
                   jnp.zeros((D_MODEL,), jnp.float32), jnp.ones((D_MODEL,), jnp.float32)),
            "pw2": dense(D_MODEL, D_MODEL),
            "norm_conv": ln(),
            "ff2_scale": sb(),
            "ff2_w1": dense(D_MODEL, D_FF),
            "ff2_w2": dense(D_FF, D_MODEL),
            "norm_ff2": ln(),
        }
        params["layers"].append(lyr)
    return params


# ----------------------------------- main ---------------------------------------
if __name__ == "__main__":
    key = jax.random.PRNGKey(0)
    pkey, xkey = jax.random.split(key)
    packed = pack_params(init_params(pkey))

    B, T = 2, 8
    audio = jax.random.normal(xkey, (B, FEAT_IN, T), jnp.float32)
    length = jnp.array([8, 6], dtype=jnp.int32)      # second sequence has 2 padded frames

    fwd = jax.jit(functools.partial(squeezeformer_encoder, packed=packed))
    out, out_len = fwd(audio, length)
    jax.block_until_ready(out)

    assert out.shape == (B, FEAT_OUT, T), out.shape
    assert out_len.shape == (B,), out_len.shape
    assert bool(jnp.all(jnp.isfinite(out)))
    print("KERNEL_OK")
</pallas_src>

<mosaic_0001>
module attributes {stable_mosaic.version = 11 : i64} {
  func.func @_encoder_kernel(%arg0: i32, %arg1: memref<2xi32, #tpu.memory_space<smem>>, %arg2: memref<1x16x8xf32, #tpu.memory_space<vmem>>, %arg3: memref<8x32xf32, #tpu.memory_space<vmem>>, %arg4: memref<16x32xbf16, #tpu.memory_space<vmem>>, %arg5: memref<3x32xf32, #tpu.memory_space<vmem>>, %arg6: memref<2x32x480xbf16, #tpu.memory_space<vmem>>, %arg7: memref<2x128x64xbf16, #tpu.memory_space<vmem>>, %arg8: memref<2x4x128xf32, #tpu.memory_space<vmem>>, %arg9: memref<2x26x32xf32, #tpu.memory_space<vmem>>, %arg10: memref<32x16xbf16, #tpu.memory_space<vmem>>, %arg11: memref<1x16xf32, #tpu.memory_space<vmem>>, %arg12: memref<1x16x8xf32, #tpu.memory_space<vmem>>) attributes {dimension_semantics = [#tpu.dimension_semantics<parallel>], iteration_bounds = array<i64: 2>, scalar_prefetch = 1 : i64, scratch_operands = 0 : i64, tpu.core_type = #tpu.core_type<tc>, window_params = [{transform_indices = @transform_0, window_bounds = array<i64: 1, 16, 8>}, {pipeline_mode = #tpu.pipeline_mode<synchronous>, transform_indices = @transform_1, window_bounds = array<i64: 8, 32>}, {pipeline_mode = #tpu.pipeline_mode<synchronous>, transform_indices = @transform_2, window_bounds = array<i64: 16, 32>}, {pipeline_mode = #tpu.pipeline_mode<synchronous>, transform_indices = @transform_3, window_bounds = array<i64: 3, 32>}, {pipeline_mode = #tpu.pipeline_mode<synchronous>, transform_indices = @transform_4, window_bounds = array<i64: 2, 32, 480>}, {pipeline_mode = #tpu.pipeline_mode<synchronous>, transform_indices = @transform_5, window_bounds = array<i64: 2, 128, 64>}, {pipeline_mode = #tpu.pipeline_mode<synchronous>, transform_indices = @transform_6, window_bounds = array<i64: 2, 4, 128>}, {pipeline_mode = #tpu.pipeline_mode<synchronous>, transform_indices = @transform_7, window_bounds = array<i64: 2, 26, 32>}, {pipeline_mode = #tpu.pipeline_mode<synchronous>, transform_indices = @transform_8, window_bounds = array<i64: 32, 16>}, {pipeline_mode = #tpu.pipeline_mode<synchronous>, transform_indices = @transform_9, window_bounds = array<i64: 1, 16>}, {transform_indices = @transform_10, window_bounds = array<i64: 1, 16, 8>}]} {
    %0 = arith.index_cast %arg0 : i32 to index
    %1 = memref.load %arg1[%0] : memref<2xi32, #tpu.memory_space<smem>>
    %c0 = arith.constant 0 : index
    %c0_0 = arith.constant 0 : index
    %c0_1 = arith.constant 0 : index
    %2 = vector.load %arg2[%c0, %c0_0, %c0_1] : memref<1x16x8xf32, #tpu.memory_space<vmem>>, vector<1x16x8xf32>
    %3 = vector.shape_cast %2 : vector<1x16x8xf32> to vector<16x8xf32>
    %4 = tpu.transpose %3, [1, 0] : vector<16x8xf32> -> vector<8x16xf32>
    %5 = arith.truncf %4 : vector<8x16xf32> to vector<8x16xbf16>
    %c0_2 = arith.constant 0 : index
    %c0_3 = arith.constant 0 : index
    %6 = vector.load %arg4[%c0_2, %c0_3] : memref<16x32xbf16, #tpu.memory_space<vmem>>, vector<16x32xbf16>
    %cst = arith.constant dense<0.000000e+00> : vector<8x32xf32>
    %7 = tpu.matmul %5, %6, %cst {dimension_numbers = #tpu.dot_dimension_numbers<[1], [0], [0], [1], [0, 0, 1, 1], [], []>} : vector<8x16xbf16>, vector<16x32xbf16>, vector<8x32xf32> -> vector<8x32xf32>
    %c0_4 = arith.constant 0 : index
    %c0_5 = arith.constant 0 : index
    %8 = vector.load %arg5[%c0_4, %c0_5] : memref<3x32xf32, #tpu.memory_space<vmem>>, vector<1x32xf32>
    %9 = vector.shape_cast %8 : vector<1x32xf32> to vector<32xf32>
    %10 = vector.shape_cast %9 : vector<32xf32> to vector<1x32xf32>
    %11 = vector.broadcast %10 : vector<1x32xf32> to vector<8x32xf32>
    %12 = arith.addf %7, %11 : vector<8x32xf32>
    %cst_6 = arith.constant 5.65685415 : f32
    %13 = vector.broadcast %cst_6 : f32 to vector<8x32xf32>
    %14 = arith.mulf %12, %13 : vector<8x32xf32>
    %c0_7 = arith.constant 0 : index
    %c0_8 = arith.constant 0 : index
    %15 = vector.load %arg3[%c0_7, %c0_8] : memref<8x32xf32, #tpu.memory_space<vmem>>, vector<8x32xf32>
    %16 = arith.addf %14, %15 : vector<8x32xf32>
    %c1 = arith.constant 1 : index
    %c0_9 = arith.constant 0 : index
    %17 = vector.load %arg5[%c1, %c0_9] : memref<3x32xf32, #tpu.memory_space<vmem>>, vector<1x32xf32>
    %18 = vector.shape_cast %17 : vector<1x32xf32> to vector<32xf32>
    %c2 = arith.constant 2 : index
    %c0_10 = arith.constant 0 : index
    %19 = vector.load %arg5[%c2, %c0_10] : memref<3x32xf32, #tpu.memory_space<vmem>>, vector<1x32xf32>
    %20 = vector.shape_cast %19 : vector<1x32xf32> to vector<32xf32>
    %cst_11 = arith.constant dense<0.000000e+00> : vector<8xf32>
    %21 = vector.multi_reduction <add>, %16, %cst_11 [1] : vector<8x32xf32> to vector<8xf32>
    %22 = vector.shape_cast %21 : vector<8xf32> to vector<8x1xf32>
    %cst_12 = arith.constant 3.200000e+01 : f32
    %23 = vector.broadcast %cst_12 : f32 to vector<8x1xf32>
    %24 = arith.divf %22, %23 : vector<8x1xf32>
    %25 = vector.broadcast %24 : vector<8x1xf32> to vector<8x32xf32>
    %26 = arith.subf %16, %25 : vector<8x32xf32>
    %27 = arith.mulf %26, %26 : vector<8x32xf32>
    %cst_13 = arith.constant dense<0.000000e+00> : vector<8xf32>
    %28 = vector.multi_reduction <add>, %27, %cst_13 [1] : vector<8x32xf32> to vector<8xf32>
    %29 = vector.shape_cast %28 : vector<8xf32> to vector<8x1xf32>
    %cst_14 = arith.constant 3.200000e+01 : f32
    %30 = vector.broadcast %cst_14 : f32 to vector<8x1xf32>
    %31 = arith.divf %29, %30 : vector<8x1xf32>
    %32 = vector.broadcast %24 : vector<8x1xf32> to vector<8x32xf32>
    %33 = arith.subf %16, %32 : vector<8x32xf32>
    %cst_15 = arith.constant 9.99999974E-6 : f32
    %34 = vector.broadcast %cst_15 : f32 to vector<8x1xf32>
    %35 = arith.addf %31, %34 : vector<8x1xf32>
    %36 = math.rsqrt %35 : vector<8x1xf32>
    %37 = vector.broadcast %36 : vector<8x1xf32> to vector<8x32xf32>
    %38 = arith.mulf %33, %37 : vector<8x32xf32>
    %39 = vector.shape_cast %18 : vector<32xf32> to vector<1x32xf32>
    %40 = vector.broadcast %39 : vector<1x32xf32> to vector<8x32xf32>
    %41 = arith.mulf %38, %40 : vector<8x32xf32>
    %42 = vector.shape_cast %20 : vector<32xf32> to vector<1x32xf32>
    %43 = vector.broadcast %42 : vector<1x32xf32> to vector<8x32xf32>
    %44 = arith.addf %41, %43 : vector<8x32xf32>
    %45 = tpu.iota {dimensions = array<i32: 0>} : vector<8x8xi32>
    %46 = tpu.iota {dimensions = array<i32: 1>} : vector<8x8xi32>
    %47 = vector.broadcast %1 : i32 to vector<8x8xi32>
    %48 = arith.cmpi slt, %45, %47 : vector<8x8xi32>
    %49 = vector.broadcast %1 : i32 to vector<8x8xi32>
    %50 = arith.cmpi slt, %46, %49 : vector<8x8xi32>
    %51 = arith.andi %48, %50 : vector<8x8xi1>
    %52 = tpu.iota {dimensions = array<i32: 0>} : vector<8x32xi32>
    %53 = vector.broadcast %1 : i32 to vector<8x32xi32>
    %54 = arith.cmpi slt, %52, %53 : vector<8x32xi32>
    %c0_16 = arith.constant 0 : index
    %c0_17 = arith.constant 0 : index
    %c0_18 = arith.constant 0 : index
    %55 = vector.load %arg6[%c0_16, %c0_17, %c0_18] : memref<2x32x480xbf16, #tpu.memory_space<vmem>>, vector<1x32x480xbf16>
    %56 = vector.shape_cast %55 : vector<1x32x480xbf16> to vector<32x480xbf16>
    %c0_19 = arith.constant 0 : index
    %c0_20 = arith.constant 0 : index
    %c0_21 = arith.constant 0 : index
    %57 = vector.load %arg7[%c0_19, %c0_20, %c0_21] : memref<2x128x64xbf16, #tpu.memory_space<vmem>>, vector<1x128x64xbf16>
    %58 = vector.shape_cast %57 : vector<1x128x64xbf16> to vector<128x64xbf16>
    %c0_22 = arith.constant 0 : index
    %c0_23 = arith.constant 0 : index
    %c0_24 = arith.constant 0 : index
    %59 = vector.load %arg8[%c0_22, %c0_23, %c0_24] : memref<2x4x128xf32, #tpu.memory_space<vmem>>, vector<1x4x128xf32>
    %60 = vector.shape_cast %59 : vector<1x4x128xf32> to vector<4x128xf32>
    %c0_25 = arith.constant 0 : index
    %c0_26 = arith.constant 0 : index
    %c0_27 = arith.constant 0 : index
    %61 = vector.load %arg9[%c0_25, %c0_26, %c0_27] : memref<2x26x32xf32, #tpu.memory_space<vmem>>, vector<1x26x32xf32>
    %62 = vector.shape_cast %61 : vector<1x26x32xf32> to vector<26x32xf32>
    %63 = vector.extract_strided_slice %62 {offsets = [0, 0], sizes = [1, 32], strides = [1, 1]} : vector<26x32xf32> to vector<1x32xf32>
    %64 = vector.shape_cast %63 : vector<1x32xf32> to vector<32xf32>
    %65 = vector.shape_cast %64 : vector<32xf32> to vector<1x32xf32>
    %66 = vector.broadcast %65 : vector<1x32xf32> to vector<8x32xf32>
    %67 = arith.mulf %44, %66 : vector<8x32xf32>
    %68 = vector.extract_strided_slice %62 {offsets = [1, 0], sizes = [1, 32], strides = [1, 1]} : vector<26x32xf32> to vector<1x32xf32>
    %69 = vector.shape_cast %68 : vector<1x32xf32> to vector<32xf32>
    %70 = vector.shape_cast %69 : vector<32xf32> to vector<1x32xf32>
    %71 = vector.broadcast %70 : vector<1x32xf32> to vector<8x32xf32>
    %72 = arith.addf %67, %71 : vector<8x32xf32>
    %73 = arith.truncf %72 : vector<8x32xf32> to vector<8x32xbf16>
    %74 = vector.extract_strided_slice %56 {offsets = [0, 0], sizes = [32, 96], strides = [1, 1]} : vector<32x480xbf16> to vector<32x96xbf16>
    %cst_28 = arith.constant dense<0.000000e+00> : vector<8x96xf32>
    %75 = tpu.matmul %73, %74, %cst_28 {dimension_numbers = #tpu.dot_dimension_numbers<[1], [0], [0], [1], [0, 0, 1, 1], [], []>} : vector<8x32xbf16>, vector<32x96xbf16>, vector<8x96xf32> -> vector<8x96xf32>
    %76 = vector.extract_strided_slice %60 {offsets = [0, 0], sizes = [1, 96], strides = [1, 1]} : vector<4x128xf32> to vector<1x96xf32>
    %77 = vector.broadcast %76 : vector<1x96xf32> to vector<8x96xf32>
    %78 = arith.addf %75, %77 : vector<8x96xf32>
    %79 = vector.extract_strided_slice %78 {offsets = [0, 0], sizes = [8, 32], strides = [1, 1]} : vector<8x96xf32> to vector<8x32xf32>
    %80 = vector.extract_strided_slice %78 {offsets = [0, 32], sizes = [8, 32], strides = [1, 1]} : vector<8x96xf32> to vector<8x32xf32>
    %81 = vector.extract_strided_slice %78 {offsets = [0, 64], sizes = [8, 32], strides = [1, 1]} : vector<8x96xf32> to vector<8x32xf32>
    %82 = vector.extract_strided_slice %79 {offsets = [0, 0], sizes = [8, 8], strides = [1, 1]} : vector<8x32xf32> to vector<8x8xf32>
    %83 = vector.extract_strided_slice %79 {offsets = [0, 8], sizes = [8, 8], strides = [1, 1]} : vector<8x32xf32> to vector<8x8xf32>
    %84 = vector.extract_strided_slice %79 {offsets = [0, 16], sizes = [8, 8], strides = [1, 1]} : vector<8x32xf32> to vector<8x8xf32>
    %85 = vector.extract_strided_slice %79 {offsets = [0, 24], sizes = [8, 8], strides = [1, 1]} : vector<8x32xf32> to vector<8x8xf32>
    %86 = vector.shape_cast %82 : vector<8x8xf32> to vector<1x8x8xf32>
    %87 = vector.shape_cast %83 : vector<8x8xf32> to vector<1x8x8xf32>
    %88 = vector.shape_cast %84 : vector<8x8xf32> to vector<1x8x8xf32>
    %89 = vector.shape_cast %85 : vector<8x8xf32> to vector<1x8x8xf32>
    %90 = tpu.concatenate %86, %87, %88, %89 in 0 : vector<1x8x8xf32>, vector<1x8x8xf32>, vector<1x8x8xf32>, vector<1x8x8xf32> -> vector<4x8x8xf32>
    %91 = arith.truncf %90 : vector<4x8x8xf32> to vector<4x8x8xbf16>
    %92 = vector.extract_strided_slice %80 {offsets = [0, 0], sizes = [8, 8], strides = [1, 1]} : vector<8x32xf32> to vector<8x8xf32>
    %93 = vector.extract_strided_slice %80 {offsets = [0, 8], sizes = [8, 8], strides = [1, 1]} : vector<8x32xf32> to vector<8x8xf32>
    %94 = vector.extract_strided_slice %80 {offsets = [0, 16], sizes = [8, 8], strides = [1, 1]} : vector<8x32xf32> to vector<8x8xf32>
    %95 = vector.extract_strided_slice %80 {offsets = [0, 24], sizes = [8, 8], strides = [1, 1]} : vector<8x32xf32> to vector<8x8xf32>
    %96 = vector.shape_cast %92 : vector<8x8xf32> to vector<1x8x8xf32>
    %97 = vector.shape_cast %93 : vector<8x8xf32> to vector<1x8x8xf32>
    %98 = vector.shape_cast %94 : vector<8x8xf32> to vector<1x8x8xf32>
    %99 = vector.shape_cast %95 : vector<8x8xf32> to vector<1x8x8xf32>
    %100 = tpu.concatenate %96, %97, %98, %99 in 0 : vector<1x8x8xf32>, vector<1x8x8xf32>, vector<1x8x8xf32>, vector<1x8x8xf32> -> vector<4x8x8xf32>
    %101 = arith.truncf %100 : vector<4x8x8xf32> to vector<4x8x8xbf16>
    %102 = vector.extract_strided_slice %81 {offsets = [0, 0], sizes = [8, 8], strides = [1, 1]} : vector<8x32xf32> to vector<8x8xf32>
    %103 = vector.extract_strided_slice %81 {offsets = [0, 8], sizes = [8, 8], strides = [1, 1]} : vector<8x32xf32> to vector<8x8xf32>
    %104 = vector.extract_strided_slice %81 {offsets = [0, 16], sizes = [8, 8], strides = [1, 1]} : vector<8x32xf32> to vector<8x8xf32>
    %105 = vector.extract_strided_slice %81 {offsets = [0, 24], sizes = [8, 8], strides = [1, 1]} : vector<8x32xf32> to vector<8x8xf32>
    %106 = vector.shape_cast %102 : vector<8x8xf32> to vector<1x8x8xf32>
    %107 = vector.shape_cast %103 : vector<8x8xf32> to vector<1x8x8xf32>
    %108 = vector.shape_cast %104 : vector<8x8xf32> to vector<1x8x8xf32>
    %109 = vector.shape_cast %105 : vector<8x8xf32> to vector<1x8x8xf32>
    %110 = tpu.concatenate %106, %107, %108, %109 in 0 : vector<1x8x8xf32>, vector<1x8x8xf32>, vector<1x8x8xf32>, vector<1x8x8xf32> -> vector<4x8x8xf32>
    %111 = arith.truncf %110 : vector<4x8x8xf32> to vector<4x8x8xbf16>
    "tpu.trace_start"() <{level = 10 : i32, message = "htd,hsd->hts"}> : () -> ()
    %cst_29 = arith.constant dense<0.000000e+00> : vector<4x8x8xf32>
    %112 = tpu.matmul %91, %101, %cst_29 {dimension_numbers = #tpu.dot_dimension_numbers<[2], [2], [1], [1], [0, 0, 0, 1, 1, 1], [0], [0]>} : vector<4x8x8xbf16>, vector<4x8x8xbf16>, vector<4x8x8xf32> -> vector<4x8x8xf32>
    "tpu.trace_stop"() : () -> ()
    %cst_30 = arith.constant 0.353553385 : f32
    %113 = vector.broadcast %cst_30 : f32 to vector<4x8x8xf32>
    %114 = arith.mulf %112, %113 : vector<4x8x8xf32>
    %115 = vector.shape_cast %51 : vector<8x8xi1> to vector<1x8x8xi1>
    %cst_31 = arith.constant -1.000000e+04 : f32
    %116 = vector.shape_cast %115 : vector<1x8x8xi1> to vector<1x8x8xi1>
    %117 = vector.broadcast %116 : vector<1x8x8xi1> to vector<4x8x8xi1>
    %118 = vector.broadcast %cst_31 : f32 to vector<4x8x8xf32>
    %119 = arith.select %117, %114, %118 : vector<4x8x8xi1>, vector<4x8x8xf32>
    %cst_32 = arith.constant dense<0xFF800000> : vector<4x8xf32>
    %120 = vector.multi_reduction <maximumf>, %119, %cst_32 [2] : vector<4x8x8xf32> to vector<4x8xf32>
    %cst_33 = arith.constant 0xFF800000 : f32
    %121 = vector.broadcast %cst_33 : f32 to vector<4x8xf32>
    %122 = arith.maximumf %121, %120 : vector<4x8xf32>
    %123 = vector.shape_cast %122 : vector<4x8xf32> to vector<4x8x1xf32>
    %124 = vector.broadcast %123 : vector<4x8x1xf32> to vector<4x8x8xf32>
    %125 = arith.subf %119, %124 : vector<4x8x8xf32>
    %126 = math.exp %125 : vector<4x8x8xf32>
    %cst_34 = arith.constant dense<0.000000e+00> : vector<4x8xf32>
    %127 = vector.multi_reduction <add>, %126, %cst_34 [2] : vector<4x8x8xf32> to vector<4x8xf32>
    %128 = vector.shape_cast %127 : vector<4x8xf32> to vector<4x8x1xf32>
    %129 = vector.broadcast %128 : vector<4x8x1xf32> to vector<4x8x8xf32>
    %130 = arith.divf %126, %129 : vector<4x8x8xf32>
    %131 = vector.shape_cast %51 : vector<8x8xi1> to vector<1x8x8xi1>
    %cst_35 = arith.constant 0.000000e+00 : f32
    %132 = vector.shape_cast %131 : vector<1x8x8xi1> to vector<1x8x8xi1>
    %133 = vector.broadcast %132 : vector<1x8x8xi1> to vector<4x8x8xi1>
    %134 = vector.broadcast %cst_35 : f32 to vector<4x8x8xf32>
    %135 = arith.select %133, %130, %134 : vector<4x8x8xi1>, vector<4x8x8xf32>
    %136 = arith.truncf %135 : vector<4x8x8xf32> to vector<4x8x8xbf16>
    "tpu.trace_start"() <{level = 10 : i32, message = "hts,hsd->htd"}> : () -> ()
    %cst_36 = arith.constant dense<0.000000e+00> : vector<4x8x8xf32>
    %137 = tpu.matmul %136, %111, %cst_36 {dimension_numbers = #tpu.dot_dimension_numbers<[2], [1], [1], [2], [0, 0, 0, 1, 1, 2], [0], [0]>} : vector<4x8x8xbf16>, vector<4x8x8xbf16>, vector<4x8x8xf32> -> vector<4x8x8xf32>
    "tpu.trace_stop"() : () -> ()
    %138 = vector.extract_strided_slice %137 {offsets = [0, 0, 0], sizes = [1, 8, 8], strides = [1, 1, 1]} : vector<4x8x8xf32> to vector<1x8x8xf32>
    %139 = vector.shape_cast %138 : vector<1x8x8xf32> to vector<8x8xf32>
    %140 = vector.extract_strided_slice %137 {offsets = [1, 0, 0], sizes = [1, 8, 8], strides = [1, 1, 1]} : vector<4x8x8xf32> to vector<1x8x8xf32>
    %141 = vector.shape_cast %140 : vector<1x8x8xf32> to vector<8x8xf32>
    %142 = vector.extract_strided_slice %137 {offsets = [2, 0, 0], sizes = [1, 8, 8], strides = [1, 1, 1]} : vector<4x8x8xf32> to vector<1x8x8xf32>
    %143 = vector.shape_cast %142 : vector<1x8x8xf32> to vector<8x8xf32>
    %144 = vector.extract_strided_slice %137 {offsets = [3, 0, 0], sizes = [1, 8, 8], strides = [1, 1, 1]} : vector<4x8x8xf32> to vector<1x8x8xf32>
    %145 = vector.shape_cast %144 : vector<1x8x8xf32> to vector<8x8xf32>
    %146 = tpu.concatenate %139, %141, %143, %145 in 1 : vector<8x8xf32>, vector<8x8xf32>, vector<8x8xf32>, vector<8x8xf32> -> vector<8x32xf32>
    %147 = arith.truncf %146 : vector<8x32xf32> to vector<8x32xbf16>
    %148 = vector.extract_strided_slice %56 {offsets = [0, 96], sizes = [32, 32], strides = [1, 1]} : vector<32x480xbf16> to vector<32x32xbf16>
    %cst_37 = arith.constant dense<0.000000e+00> : vector<8x32xf32>
    %149 = tpu.matmul %147, %148, %cst_37 {dimension_numbers = #tpu.dot_dimension_numbers<[1], [0], [0], [1], [0, 0, 1, 1], [], []>} : vector<8x32xbf16>, vector<32x32xbf16>, vector<8x32xf32> -> vector<8x32xf32>
    %150 = vector.extract_strided_slice %62 {offsets = [2, 0], sizes = [1, 32], strides = [1, 1]} : vector<26x32xf32> to vector<1x32xf32>
    %151 = vector.shape_cast %150 : vector<1x32xf32> to vector<32xf32>
    %152 = vector.shape_cast %151 : vector<32xf32> to vector<1x32xf32>
    %153 = vector.broadcast %152 : vector<1x32xf32> to vector<8x32xf32>
    %154 = arith.addf %149, %153 : vector<8x32xf32>
    %155 = arith.addf %44, %154 : vector<8x32xf32>
    %156 = vector.extract_strided_slice %62 {offsets = [3, 0], sizes = [1, 32], strides = [1, 1]} : vector<26x32xf32> to vector<1x32xf32>
    %157 = vector.shape_cast %156 : vector<1x32xf32> to vector<32xf32>
    %158 = vector.extract_strided_slice %62 {offsets = [4, 0], sizes = [1, 32], strides = [1, 1]} : vector<26x32xf32> to vector<1x32xf32>
    %159 = vector.shape_cast %158 : vector<1x32xf32> to vector<32xf32>
    %cst_38 = arith.constant dense<0.000000e+00> : vector<8xf32>
    %160 = vector.multi_reduction <add>, %155, %cst_38 [1] : vector<8x32xf32> to vector<8xf32>
    %161 = vector.shape_cast %160 : vector<8xf32> to vector<8x1xf32>
    %cst_39 = arith.constant 3.200000e+01 : f32
    %162 = vector.broadcast %cst_39 : f32 to vector<8x1xf32>
    %163 = arith.divf %161, %162 : vector<8x1xf32>
    %164 = vector.broadcast %163 : vector<8x1xf32> to vector<8x32xf32>
    %165 = arith.subf %155, %164 : vector<8x32xf32>
    %166 = arith.mulf %165, %165 : vector<8x32xf32>
    %cst_40 = arith.constant dense<0.000000e+00> : vector<8xf32>
    %167 = vector.multi_reduction <add>, %166, %cst_40 [1] : vector<8x32xf32> to vector<8xf32>
    %168 = vector.shape_cast %167 : vector<8xf32> to vector<8x1xf32>
    %cst_41 = arith.constant 3.200000e+01 : f32
    %169 = vector.broadcast %cst_41 : f32 to vector<8x1xf32>
    %170 = arith.divf %168, %169 : vector<8x1xf32>
    %171 = vector.broadcast %163 : vector<8x1xf32> to vector<8x32xf32>
    %172 = arith.subf %155, %171 : vector<8x32xf32>
    %cst_42 = arith.constant 9.99999974E-6 : f32
    %173 = vector.broadcast %cst_42 : f32 to vector<8x1xf32>
    %174 = arith.addf %170, %173 : vector<8x1xf32>
    %175 = math.rsqrt %174 : vector<8x1xf32>
    %176 = vector.broadcast %175 : vector<8x1xf32> to vector<8x32xf32>
    %177 = arith.mulf %172, %176 : vector<8x32xf32>
    %178 = vector.shape_cast %157 : vector<32xf32> to vector<1x32xf32>
    %179 = vector.broadcast %178 : vector<1x32xf32> to vector<8x32xf32>
    %180 = arith.mulf %177, %179 : vector<8x32xf32>
    %181 = vector.shape_cast %159 : vector<32xf32> to vector<1x32xf32>
    %182 = vector.broadcast %181 : vector<1x32xf32> to vector<8x32xf32>
    %183 = arith.addf %180, %182 : vector<8x32xf32>
    %184 = vector.extract_strided_slice %62 {offsets = [5, 0], sizes = [1, 32], strides = [1, 1]} : vector<26x32xf32> to vector<1x32xf32>
    %185 = vector.shape_cast %184 : vector<1x32xf32> to vector<32xf32>
    %186 = vector.shape_cast %185 : vector<32xf32> to vector<1x32xf32>
    %187 = vector.broadcast %186 : vector<1x32xf32> to vector<8x32xf32>
    %188 = arith.mulf %183, %187 : vector<8x32xf32>
    %189 = vector.extract_strided_slice %62 {offsets = [6, 0], sizes = [1, 32], strides = [1, 1]} : vector<26x32xf32> to vector<1x32xf32>
    %190 = vector.shape_cast %189 : vector<1x32xf32> to vector<32xf32>
    %191 = vector.shape_cast %190 : vector<32xf32> to vector<1x32xf32>
    %192 = vector.broadcast %191 : vector<1x32xf32> to vector<8x32xf32>
    %193 = arith.addf %188, %192 : vector<8x32xf32>
    %194 = arith.truncf %193 : vector<8x32xf32> to vector<8x32xbf16>
    %195 = vector.extract_strided_slice %56 {offsets = [0, 128], sizes = [32, 128], strides = [1, 1]} : vector<32x480xbf16> to vector<32x128xbf16>
    %cst_43 = arith.constant dense<0.000000e+00> : vector<8x128xf32>
    %196 = tpu.matmul %194, %195, %cst_43 {dimension_numbers = #tpu.dot_dimension_numbers<[1], [0], [0], [1], [0, 0, 1, 1], [], []>} : vector<8x32xbf16>, vector<32x128xbf16>, vector<8x128xf32> -> vector<8x128xf32>
    %197 = vector.extract_strided_slice %60 {offsets = [1, 0], sizes = [1, 128], strides = [1, 1]} : vector<4x128xf32> to vector<1x128xf32>
    %198 = vector.broadcast %197 : vector<1x128xf32> to vector<8x128xf32>
    %199 = arith.addf %196, %198 : vector<8x128xf32>
    %200 = arith.negf %199 : vector<8x128xf32>
    %201 = math.exp %200 : vector<8x128xf32>
    %cst_44 = arith.constant 1.000000e+00 : f32
    %202 = vector.broadcast %cst_44 : f32 to vector<8x128xf32>
    %203 = arith.addf %202, %201 : vector<8x128xf32>
    %204 = arith.divf %202, %203 : vector<8x128xf32>
    %205 = arith.mulf %199, %204 : vector<8x128xf32>
    %206 = arith.truncf %205 : vector<8x128xf32> to vector<8x128xbf16>
    %207 = vector.extract_strided_slice %58 {offsets = [0, 0], sizes = [128, 32], strides = [1, 1]} : vector<128x64xbf16> to vector<128x32xbf16>
    %cst_45 = arith.constant dense<0.000000e+00> : vector<8x32xf32>
    %208 = tpu.matmul %206, %207, %cst_45 {dimension_numbers = #tpu.dot_dimension_numbers<[1], [0], [0], [1], [0, 0, 1, 1], [], []>} : vector<8x128xbf16>, vector<128x32xbf16>, vector<8x32xf32> -> vector<8x32xf32>
    %209 = vector.extract_strided_slice %62 {offsets = [7, 0], sizes = [1, 32], strides = [1, 1]} : vector<26x32xf32> to vector<1x32xf32>
    %210 = vector.shape_cast %209 : vector<1x32xf32> to vector<32xf32>
    %211 = vector.shape_cast %210 : vector<32xf32> to vector<1x32xf32>
    %212 = vector.broadcast %211 : vector<1x32xf32> to vector<8x32xf32>
    %213 = arith.addf %208, %212 : vector<8x32xf32>
    %214 = arith.addf %183, %213 : vector<8x32xf32>
    %215 = vector.extract_strided_slice %62 {offsets = [8, 0], sizes = [1, 32], strides = [1, 1]} : vector<26x32xf32> to vector<1x32xf32>
    %216 = vector.shape_cast %215 : vector<1x32xf32> to vector<32xf32>
    %217 = vector.extract_strided_slice %62 {offsets = [9, 0], sizes = [1, 32], strides = [1, 1]} : vector<26x32xf32> to vector<1x32xf32>
    %218 = vector.shape_cast %217 : vector<1x32xf32> to vector<32xf32>
    %cst_46 = arith.constant dense<0.000000e+00> : vector<8xf32>
    %219 = vector.multi_reduction <add>, %214, %cst_46 [1] : vector<8x32xf32> to vector<8xf32>
    %220 = vector.shape_cast %219 : vector<8xf32> to vector<8x1xf32>
    %cst_47 = arith.constant 3.200000e+01 : f32
    %221 = vector.broadcast %cst_47 : f32 to vector<8x1xf32>
    %222 = arith.divf %220, %221 : vector<8x1xf32>
    %223 = vector.broadcast %222 : vector<8x1xf32> to vector<8x32xf32>
    %224 = arith.subf %214, %223 : vector<8x32xf32>
    %225 = arith.mulf %224, %224 : vector<8x32xf32>
    %cst_48 = arith.constant dense<0.000000e+00> : vector<8xf32>
    %226 = vector.multi_reduction <add>, %225, %cst_48 [1] : vector<8x32xf32> to vector<8xf32>
    %227 = vector.shape_cast %226 : vector<8xf32> to vector<8x1xf32>
    %cst_49 = arith.constant 3.200000e+01 : f32
    %228 = vector.broadcast %cst_49 : f32 to vector<8x1xf32>
    %229 = arith.divf %227, %228 : vector<8x1xf32>
    %230 = vector.broadcast %222 : vector<8x1xf32> to vector<8x32xf32>
    %231 = arith.subf %214, %230 : vector<8x32xf32>
    %cst_50 = arith.constant 9.99999974E-6 : f32
    %232 = vector.broadcast %cst_50 : f32 to vector<8x1xf32>
    %233 = arith.addf %229, %232 : vector<8x1xf32>
    %234 = math.rsqrt %233 : vector<8x1xf32>
    %235 = vector.broadcast %234 : vector<8x1xf32> to vector<8x32xf32>
    %236 = arith.mulf %231, %235 : vector<8x32xf32>
    %237 = vector.shape_cast %216 : vector<32xf32> to vector<1x32xf32>
    %238 = vector.broadcast %237 : vector<1x32xf32> to vector<8x32xf32>
    %239 = arith.mulf %236, %238 : vector<8x32xf32>
    %240 = vector.shape_cast %218 : vector<32xf32> to vector<1x32xf32>
    %241 = vector.broadcast %240 : vector<1x32xf32> to vector<8x32xf32>
    %242 = arith.addf %239, %241 : vector<8x32xf32>
    %243 = vector.extract_strided_slice %62 {offsets = [10, 0], sizes = [1, 32], strides = [1, 1]} : vector<26x32xf32> to vector<1x32xf32>
    %244 = vector.shape_cast %243 : vector<1x32xf32> to vector<32xf32>
    %245 = vector.shape_cast %244 : vector<32xf32> to vector<1x32xf32>
    %246 = vector.broadcast %245 : vector<1x32xf32> to vector<8x32xf32>
    %247 = arith.mulf %242, %246 : vector<8x32xf32>
    %248 = vector.extract_strided_slice %62 {offsets = [11, 0], sizes = [1, 32], strides = [1, 1]} : vector<26x32xf32> to vector<1x32xf32>
    %249 = vector.shape_cast %248 : vector<1x32xf32> to vector<32xf32>
    %250 = vector.shape_cast %249 : vector<32xf32> to vector<1x32xf32>
    %251 = vector.broadcast %250 : vector<1x32xf32> to vector<8x32xf32>
    %252 = arith.addf %247, %251 : vector<8x32xf32>
    %253 = arith.truncf %252 : vector<8x32xf32> to vector<8x32xbf16>
    %254 = vector.extract_strided_slice %56 {offsets = [0, 256], sizes = [32, 64], strides = [1, 1]} : vector<32x480xbf16> to vector<32x64xbf16>
    %cst_51 = arith.constant dense<0.000000e+00> : vector<8x64xf32>
    %255 = tpu.matmul %253, %254, %cst_51 {dimension_numbers = #tpu.dot_dimension_numbers<[1], [0], [0], [1], [0, 0, 1, 1], [], []>} : vector<8x32xbf16>, vector<32x64xbf16>, vector<8x64xf32> -> vector<8x64xf32>
    %256 = vector.extract_strided_slice %60 {offsets = [2, 0], sizes = [1, 64], strides = [1, 1]} : vector<4x128xf32> to vector<1x64xf32>
    %257 = vector.broadcast %256 : vector<1x64xf32> to vector<8x64xf32>
    %258 = arith.addf %255, %257 : vector<8x64xf32>
    %259 = vector.extract_strided_slice %258 {offsets = [0, 0], sizes = [8, 32], strides = [1, 1]} : vector<8x64xf32> to vector<8x32xf32>
    %260 = vector.extract_strided_slice %258 {offsets = [0, 32], sizes = [8, 32], strides = [1, 1]} : vector<8x64xf32> to vector<8x32xf32>
    %261 = arith.negf %260 : vector<8x32xf32>
    %262 = math.exp %261 : vector<8x32xf32>
    %cst_52 = arith.constant 1.000000e+00 : f32
    %263 = vector.broadcast %cst_52 : f32 to vector<8x32xf32>
    %264 = arith.addf %263, %262 : vector<8x32xf32>
    %265 = arith.divf %263, %264 : vector<8x32xf32>
    %266 = arith.mulf %259, %265 : vector<8x32xf32>
    %cst_53 = arith.constant 0.000000e+00 : f32
    %267 = vector.broadcast %cst_53 : f32 to vector<8x32xf32>
    %268 = arith.select %54, %266, %267 : vector<8x32xi1>, vector<8x32xf32>
    %269 = vector.extract_strided_slice %62 {offsets = [14, 0], sizes = [1, 32], strides = [1, 1]} : vector<26x32xf32> to vector<1x32xf32>
    %270 = vector.shape_cast %269 : vector<1x32xf32> to vector<32xf32>
    %271 = vector.shape_cast %270 : vector<32xf32> to vector<1x32xf32>
    %272 = vector.broadcast %271 : vector<1x32xf32> to vector<8x32xf32>
    %273 = arith.mulf %268, %272 : vector<8x32xf32>
    %c2_i32 = arith.constant 2 : i32
    %274 = tpu.dynamic_rotate %268 by %c2_i32 dim 0 : vector<8x32xf32>, i32 -> vector<8x32xf32>
    %c-2_i32 = arith.constant -2 : i32
    %275 = vector.broadcast %c-2_i32 : i32 to vector<8x32xi32>
    %276 = arith.addi %52, %275 : vector<8x32xi32>
    %c0_i32 = arith.constant 0 : i32
    %277 = vector.broadcast %c0_i32 : i32 to vector<8x32xi32>
    %278 = arith.cmpi sge, %276, %277 : vector<8x32xi32>
    %c-2_i32_54 = arith.constant -2 : i32
    %279 = vector.broadcast %c-2_i32_54 : i32 to vector<8x32xi32>
    %280 = arith.addi %52, %279 : vector<8x32xi32>
    %c8_i32 = arith.constant 8 : i32
    %281 = vector.broadcast %c8_i32 : i32 to vector<8x32xi32>
    %282 = arith.cmpi slt, %280, %281 : vector<8x32xi32>
    %283 = arith.andi %278, %282 : vector<8x32xi1>
    %cst_55 = arith.constant 0.000000e+00 : f32
    %284 = vector.broadcast %cst_55 : f32 to vector<8x32xf32>
    %285 = arith.select %283, %274, %284 : vector<8x32xi1>, vector<8x32xf32>
    %286 = vector.extract_strided_slice %62 {offsets = [12, 0], sizes = [1, 32], strides = [1, 1]} : vector<26x32xf32> to vector<1x32xf32>
    %287 = vector.shape_cast %286 : vector<1x32xf32> to vector<32xf32>
    %288 = vector.shape_cast %287 : vector<32xf32> to vector<1x32xf32>
    %289 = vector.broadcast %288 : vector<1x32xf32> to vector<8x32xf32>
    %290 = arith.mulf %285, %289 : vector<8x32xf32>
    %291 = arith.addf %273, %290 : vector<8x32xf32>
    %c1_i32 = arith.constant 1 : i32
    %292 = tpu.dynamic_rotate %268 by %c1_i32 dim 0 : vector<8x32xf32>, i32 -> vector<8x32xf32>
    %c-1_i32 = arith.constant -1 : i32
    %293 = vector.broadcast %c-1_i32 : i32 to vector<8x32xi32>
    %294 = arith.addi %52, %293 : vector<8x32xi32>
    %c0_i32_56 = arith.constant 0 : i32
    %295 = vector.broadcast %c0_i32_56 : i32 to vector<8x32xi32>
    %296 = arith.cmpi sge, %294, %295 : vector<8x32xi32>
    %c-1_i32_57 = arith.constant -1 : i32
    %297 = vector.broadcast %c-1_i32_57 : i32 to vector<8x32xi32>
    %298 = arith.addi %52, %297 : vector<8x32xi32>
    %c8_i32_58 = arith.constant 8 : i32
    %299 = vector.broadcast %c8_i32_58 : i32 to vector<8x32xi32>
    %300 = arith.cmpi slt, %298, %299 : vector<8x32xi32>
    %301 = arith.andi %296, %300 : vector<8x32xi1>
    %cst_59 = arith.constant 0.000000e+00 : f32
    %302 = vector.broadcast %cst_59 : f32 to vector<8x32xf32>
    %303 = arith.select %301, %292, %302 : vector<8x32xi1>, vector<8x32xf32>
    %304 = vector.extract_strided_slice %62 {offsets = [13, 0], sizes = [1, 32], strides = [1, 1]} : vector<26x32xf32> to vector<1x32xf32>
    %305 = vector.shape_cast %304 : vector<1x32xf32> to vector<32xf32>
    %306 = vector.shape_cast %305 : vector<32xf32> to vector<1x32xf32>
    %307 = vector.broadcast %306 : vector<1x32xf32> to vector<8x32xf32>
    %308 = arith.mulf %303, %307 : vector<8x32xf32>
    %309 = arith.addf %291, %308 : vector<8x32xf32>
    %c7_i32 = arith.constant 7 : i32
    %310 = tpu.dynamic_rotate %268 by %c7_i32 dim 0 : vector<8x32xf32>, i32 -> vector<8x32xf32>
    %c1_i32_60 = arith.constant 1 : i32
    %311 = vector.broadcast %c1_i32_60 : i32 to vector<8x32xi32>
    %312 = arith.addi %52, %311 : vector<8x32xi32>
    %c0_i32_61 = arith.constant 0 : i32
    %313 = vector.broadcast %c0_i32_61 : i32 to vector<8x32xi32>
    %314 = arith.cmpi sge, %312, %313 : vector<8x32xi32>
    %c1_i32_62 = arith.constant 1 : i32
    %315 = vector.broadcast %c1_i32_62 : i32 to vector<8x32xi32>
    %316 = arith.addi %52, %315 : vector<8x32xi32>
    %c8_i32_63 = arith.constant 8 : i32
    %317 = vector.broadcast %c8_i32_63 : i32 to vector<8x32xi32>
    %318 = arith.cmpi slt, %316, %317 : vector<8x32xi32>
    %319 = arith.andi %314, %318 : vector<8x32xi1>
    %cst_64 = arith.constant 0.000000e+00 : f32
    %320 = vector.broadcast %cst_64 : f32 to vector<8x32xf32>
    %321 = arith.select %319, %310, %320 : vector<8x32xi1>, vector<8x32xf32>
    %322 = vector.extract_strided_slice %62 {offsets = [15, 0], sizes = [1, 32], strides = [1, 1]} : vector<26x32xf32> to vector<1x32xf32>
    %323 = vector.shape_cast %322 : vector<1x32xf32> to vector<32xf32>
    %324 = vector.shape_cast %323 : vector<32xf32> to vector<1x32xf32>
    %325 = vector.broadcast %324 : vector<1x32xf32> to vector<8x32xf32>
    %326 = arith.mulf %321, %325 : vector<8x32xf32>
    %327 = arith.addf %309, %326 : vector<8x32xf32>
    %c6_i32 = arith.constant 6 : i32
    %328 = tpu.dynamic_rotate %268 by %c6_i32 dim 0 : vector<8x32xf32>, i32 -> vector<8x32xf32>
    %c2_i32_65 = arith.constant 2 : i32
    %329 = vector.broadcast %c2_i32_65 : i32 to vector<8x32xi32>
    %330 = arith.addi %52, %329 : vector<8x32xi32>
    %c0_i32_66 = arith.constant 0 : i32
    %331 = vector.broadcast %c0_i32_66 : i32 to vector<8x32xi32>
    %332 = arith.cmpi sge, %330, %331 : vector<8x32xi32>
    %c2_i32_67 = arith.constant 2 : i32
    %333 = vector.broadcast %c2_i32_67 : i32 to vector<8x32xi32>
    %334 = arith.addi %52, %333 : vector<8x32xi32>
    %c8_i32_68 = arith.constant 8 : i32
    %335 = vector.broadcast %c8_i32_68 : i32 to vector<8x32xi32>
    %336 = arith.cmpi slt, %334, %335 : vector<8x32xi32>
    %337 = arith.andi %332, %336 : vector<8x32xi1>
    %cst_69 = arith.constant 0.000000e+00 : f32
    %338 = vector.broadcast %cst_69 : f32 to vector<8x32xf32>
    %339 = arith.select %337, %328, %338 : vector<8x32xi1>, vector<8x32xf32>
    %340 = vector.extract_strided_slice %62 {offsets = [16, 0], sizes = [1, 32], strides = [1, 1]} : vector<26x32xf32> to vector<1x32xf32>
    %341 = vector.shape_cast %340 : vector<1x32xf32> to vector<32xf32>
    %342 = vector.shape_cast %341 : vector<32xf32> to vector<1x32xf32>
    %343 = vector.broadcast %342 : vector<1x32xf32> to vector<8x32xf32>
    %344 = arith.mulf %339, %343 : vector<8x32xf32>
    %345 = arith.addf %327, %344 : vector<8x32xf32>
    %346 = vector.extract_strided_slice %62 {offsets = [17, 0], sizes = [1, 32], strides = [1, 1]} : vector<26x32xf32> to vector<1x32xf32>
    %347 = vector.shape_cast %346 : vector<1x32xf32> to vector<32xf32>
    %348 = vector.shape_cast %347 : vector<32xf32> to vector<1x32xf32>
    %349 = vector.broadcast %348 : vector<1x32xf32> to vector<8x32xf32>
    %350 = arith.addf %345, %349 : vector<8x32xf32>
    %351 = arith.negf %350 : vector<8x32xf32>
    %352 = math.exp %351 : vector<8x32xf32>
    %cst_70 = arith.constant 1.000000e+00 : f32
    %353 = vector.broadcast %cst_70 : f32 to vector<8x32xf32>
    %354 = arith.addf %353, %352 : vector<8x32xf32>
    %355 = arith.divf %353, %354 : vector<8x32xf32>
    %356 = arith.mulf %350, %355 : vector<8x32xf32>
    %357 = arith.truncf %356 : vector<8x32xf32> to vector<8x32xbf16>
    %358 = vector.extract_strided_slice %56 {offsets = [0, 320], sizes = [32, 32], strides = [1, 1]} : vector<32x480xbf16> to vector<32x32xbf16>
    %cst_71 = arith.constant dense<0.000000e+00> : vector<8x32xf32>
    %359 = tpu.matmul %357, %358, %cst_71 {dimension_numbers = #tpu.dot_dimension_numbers<[1], [0], [0], [1], [0, 0, 1, 1], [], []>} : vector<8x32xbf16>, vector<32x32xbf16>, vector<8x32xf32> -> vector<8x32xf32>
    %360 = vector.extract_strided_slice %62 {offsets = [18, 0], sizes = [1, 32], strides = [1, 1]} : vector<26x32xf32> to vector<1x32xf32>
    %361 = vector.shape_cast %360 : vector<1x32xf32> to vector<32xf32>
    %362 = vector.shape_cast %361 : vector<32xf32> to vector<1x32xf32>
    %363 = vector.broadcast %362 : vector<1x32xf32> to vector<8x32xf32>
    %364 = arith.addf %359, %363 : vector<8x32xf32>
    %365 = arith.addf %242, %364 : vector<8x32xf32>
    %366 = vector.extract_strided_slice %62 {offsets = [19, 0], sizes = [1, 32], strides = [1, 1]} : vector<26x32xf32> to vector<1x32xf32>
    %367 = vector.shape_cast %366 : vector<1x32xf32> to vector<32xf32>
    %368 = vector.extract_strided_slice %62 {offsets = [20, 0], sizes = [1, 32], strides = [1, 1]} : vector<26x32xf32> to vector<1x32xf32>
    %369 = vector.shape_cast %368 : vector<1x32xf32> to vector<32xf32>
    %cst_72 = arith.constant dense<0.000000e+00> : vector<8xf32>
    %370 = vector.multi_reduction <add>, %365, %cst_72 [1] : vector<8x32xf32> to vector<8xf32>
    %371 = vector.shape_cast %370 : vector<8xf32> to vector<8x1xf32>
    %cst_73 = arith.constant 3.200000e+01 : f32
    %372 = vector.broadcast %cst_73 : f32 to vector<8x1xf32>
    %373 = arith.divf %371, %372 : vector<8x1xf32>
    %374 = vector.broadcast %373 : vector<8x1xf32> to vector<8x32xf32>
    %375 = arith.subf %365, %374 : vector<8x32xf32>
    %376 = arith.mulf %375, %375 : vector<8x32xf32>
    %cst_74 = arith.constant dense<0.000000e+00> : vector<8xf32>
    %377 = vector.multi_reduction <add>, %376, %cst_74 [1] : vector<8x32xf32> to vector<8xf32>
    %378 = vector.shape_cast %377 : vector<8xf32> to vector<8x1xf32>
    %cst_75 = arith.constant 3.200000e+01 : f32
    %379 = vector.broadcast %cst_75 : f32 to vector<8x1xf32>
    %380 = arith.divf %378, %379 : vector<8x1xf32>
    %381 = vector.broadcast %373 : vector<8x1xf32> to vector<8x32xf32>
    %382 = arith.subf %365, %381 : vector<8x32xf32>
    %cst_76 = arith.constant 9.99999974E-6 : f32
    %383 = vector.broadcast %cst_76 : f32 to vector<8x1xf32>
    %384 = arith.addf %380, %383 : vector<8x1xf32>
    %385 = math.rsqrt %384 : vector<8x1xf32>
    %386 = vector.broadcast %385 : vector<8x1xf32> to vector<8x32xf32>
    %387 = arith.mulf %382, %386 : vector<8x32xf32>
    %388 = vector.shape_cast %367 : vector<32xf32> to vector<1x32xf32>
    %389 = vector.broadcast %388 : vector<1x32xf32> to vector<8x32xf32>
    %390 = arith.mulf %387, %389 : vector<8x32xf32>
    %391 = vector.shape_cast %369 : vector<32xf32> to vector<1x32xf32>
    %392 = vector.broadcast %391 : vector<1x32xf32> to vector<8x32xf32>
    %393 = arith.addf %390, %392 : vector<8x32xf32>
    %394 = vector.extract_strided_slice %62 {offsets = [21, 0], sizes = [1, 32], strides = [1, 1]} : vector<26x32xf32> to vector<1x32xf32>
    %395 = vector.shape_cast %394 : vector<1x32xf32> to vector<32xf32>
    %396 = vector.shape_cast %395 : vector<32xf32> to vector<1x32xf32>
    %397 = vector.broadcast %396 : vector<1x32xf32> to vector<8x32xf32>
    %398 = arith.mulf %393, %397 : vector<8x32xf32>
    %399 = vector.extract_strided_slice %62 {offsets = [22, 0], sizes = [1, 32], strides = [1, 1]} : vector<26x32xf32> to vector<1x32xf32>
    %400 = vector.shape_cast %399 : vector<1x32xf32> to vector<32xf32>
    %401 = vector.shape_cast %400 : vector<32xf32> to vector<1x32xf32>
    %402 = vector.broadcast %401 : vector<1x32xf32> to vector<8x32xf32>
    %403 = arith.addf %398, %402 : vector<8x32xf32>
    %404 = arith.truncf %403 : vector<8x32xf32> to vector<8x32xbf16>
    %405 = vector.extract_strided_slice %56 {offsets = [0, 352], sizes = [32, 128], strides = [1, 1]} : vector<32x480xbf16> to vector<32x128xbf16>
    %cst_77 = arith.constant dense<0.000000e+00> : vector<8x128xf32>
    %406 = tpu.matmul %404, %405, %cst_77 {dimension_numbers = #tpu.dot_dimension_numbers<[1], [0], [0], [1], [0, 0, 1, 1], [], []>} : vector<8x32xbf16>, vector<32x128xbf16>, vector<8x128xf32> -> vector<8x128xf32>
    %407 = vector.extract_strided_slice %60 {offsets = [3, 0], sizes = [1, 128], strides = [1, 1]} : vector<4x128xf32> to vector<1x128xf32>
    %408 = vector.broadcast %407 : vector<1x128xf32> to vector<8x128xf32>
    %409 = arith.addf %406, %408 : vector<8x128xf32>
    %410 = arith.negf %409 : vector<8x128xf32>
    %411 = math.exp %410 : vector<8x128xf32>
    %cst_78 = arith.constant 1.000000e+00 : f32
    %412 = vector.broadcast %cst_78 : f32 to vector<8x128xf32>
    %413 = arith.addf %412, %411 : vector<8x128xf32>
    %414 = arith.divf %412, %413 : vector<8x128xf32>
    %415 = arith.mulf %409, %414 : vector<8x128xf32>
    %416 = arith.truncf %415 : vector<8x128xf32> to vector<8x128xbf16>
    %417 = vector.extract_strided_slice %58 {offsets = [0, 32], sizes = [128, 32], strides = [1, 1]} : vector<128x64xbf16> to vector<128x32xbf16>
    %cst_79 = arith.constant dense<0.000000e+00> : vector<8x32xf32>
    %418 = tpu.matmul %416, %417, %cst_79 {dimension_numbers = #tpu.dot_dimension_numbers<[1], [0], [0], [1], [0, 0, 1, 1], [], []>} : vector<8x128xbf16>, vector<128x32xbf16>, vector<8x32xf32> -> vector<8x32xf32>
    %419 = vector.extract_strided_slice %62 {offsets = [23, 0], sizes = [1, 32], strides = [1, 1]} : vector<26x32xf32> to vector<1x32xf32>
    %420 = vector.shape_cast %419 : vector<1x32xf32> to vector<32xf32>
    %421 = vector.shape_cast %420 : vector<32xf32> to vector<1x32xf32>
    %422 = vector.broadcast %421 : vector<1x32xf32> to vector<8x32xf32>
    %423 = arith.addf %418, %422 : vector<8x32xf32>
    %424 = arith.addf %393, %423 : vector<8x32xf32>
    %425 = vector.extract_strided_slice %62 {offsets = [24, 0], sizes = [1, 32], strides = [1, 1]} : vector<26x32xf32> to vector<1x32xf32>
    %426 = vector.shape_cast %425 : vector<1x32xf32> to vector<32xf32>
    %427 = vector.extract_strided_slice %62 {offsets = [25, 0], sizes = [1, 32], strides = [1, 1]} : vector<26x32xf32> to vector<1x32xf32>
    %428 = vector.shape_cast %427 : vector<1x32xf32> to vector<32xf32>
    %cst_80 = arith.constant dense<0.000000e+00> : vector<8xf32>
    %429 = vector.multi_reduction <add>, %424, %cst_80 [1] : vector<8x32xf32> to vector<8xf32>
    %430 = vector.shape_cast %429 : vector<8xf32> to vector<8x1xf32>
    %cst_81 = arith.constant 3.200000e+01 : f32
    %431 = vector.broadcast %cst_81 : f32 to vector<8x1xf32>
    %432 = arith.divf %430, %431 : vector<8x1xf32>
    %433 = vector.broadcast %432 : vector<8x1xf32> to vector<8x32xf32>
    %434 = arith.subf %424, %433 : vector<8x32xf32>
    %435 = arith.mulf %434, %434 : vector<8x32xf32>
    %cst_82 = arith.constant dense<0.000000e+00> : vector<8xf32>
    %436 = vector.multi_reduction <add>, %435, %cst_82 [1] : vector<8x32xf32> to vector<8xf32>
    %437 = vector.shape_cast %436 : vector<8xf32> to vector<8x1xf32>
    %cst_83 = arith.constant 3.200000e+01 : f32
    %438 = vector.broadcast %cst_83 : f32 to vector<8x1xf32>
    %439 = arith.divf %437, %438 : vector<8x1xf32>
    %440 = vector.broadcast %432 : vector<8x1xf32> to vector<8x32xf32>
    %441 = arith.subf %424, %440 : vector<8x32xf32>
    %cst_84 = arith.constant 9.99999974E-6 : f32
    %442 = vector.broadcast %cst_84 : f32 to vector<8x1xf32>
    %443 = arith.addf %439, %442 : vector<8x1xf32>
    %444 = math.rsqrt %443 : vector<8x1xf32>
    %445 = vector.broadcast %444 : vector<8x1xf32> to vector<8x32xf32>
    %446 = arith.mulf %441, %445 : vector<8x32xf32>
    %447 = vector.shape_cast %426 : vector<32xf32> to vector<1x32xf32>
    %448 = vector.broadcast %447 : vector<1x32xf32> to vector<8x32xf32>
    %449 = arith.mulf %446, %448 : vector<8x32xf32>
    %450 = vector.shape_cast %428 : vector<32xf32> to vector<1x32xf32>
    %451 = vector.broadcast %450 : vector<1x32xf32> to vector<8x32xf32>
    %452 = arith.addf %449, %451 : vector<8x32xf32>
    %c1_85 = arith.constant 1 : index
    %c0_86 = arith.constant 0 : index
    %c0_87 = arith.constant 0 : index
    %453 = vector.load %arg6[%c1_85, %c0_86, %c0_87] : memref<2x32x480xbf16, #tpu.memory_space<vmem>>, vector<1x32x480xbf16>
    %454 = vector.shape_cast %453 : vector<1x32x480xbf16> to vector<32x480xbf16>
    %c1_88 = arith.constant 1 : index
    %c0_89 = arith.constant 0 : index
    %c0_90 = arith.constant 0 : index
    %455 = vector.load %arg7[%c1_88, %c0_89, %c0_90] : memref<2x128x64xbf16, #tpu.memory_space<vmem>>, vector<1x128x64xbf16>
    %456 = vector.shape_cast %455 : vector<1x128x64xbf16> to vector<128x64xbf16>
    %c1_91 = arith.constant 1 : index
    %c0_92 = arith.constant 0 : index
    %c0_93 = arith.constant 0 : index
    %457 = vector.load %arg8[%c1_91, %c0_92, %c0_93] : memref<2x4x128xf32, #tpu.memory_space<vmem>>, vector<1x4x128xf32>
    %458 = vector.shape_cast %457 : vector<1x4x128xf32> to vector<4x128xf32>
    %c1_94 = arith.constant 1 : index
    %c0_95 = arith.constant 0 : index
    %c0_96 = arith.constant 0 : index
    %459 = vector.load %arg9[%c1_94, %c0_95, %c0_96] : memref<2x26x32xf32, #tpu.memory_space<vmem>>, vector<1x26x32xf32>
    %460 = vector.shape_cast %459 : vector<1x26x32xf32> to vector<26x32xf32>
    %461 = vector.extract_strided_slice %460 {offsets = [0, 0], sizes = [1, 32], strides = [1, 1]} : vector<26x32xf32> to vector<1x32xf32>
    %462 = vector.shape_cast %461 : vector<1x32xf32> to vector<32xf32>
    %463 = vector.shape_cast %462 : vector<32xf32> to vector<1x32xf32>
    %464 = vector.broadcast %463 : vector<1x32xf32> to vector<8x32xf32>
    %465 = arith.mulf %452, %464 : vector<8x32xf32>
    %466 = vector.extract_strided_slice %460 {offsets = [1, 0], sizes = [1, 32], strides = [1, 1]} : vector<26x32xf32> to vector<1x32xf32>
    %467 = vector.shape_cast %466 : vector<1x32xf32> to vector<32xf32>
    %468 = vector.shape_cast %467 : vector<32xf32> to vector<1x32xf32>
    %469 = vector.broadcast %468 : vector<1x32xf32> to vector<8x32xf32>
    %470 = arith.addf %465, %469 : vector<8x32xf32>
    %471 = arith.truncf %470 : vector<8x32xf32> to vector<8x32xbf16>
    %472 = vector.extract_strided_slice %454 {offsets = [0, 0], sizes = [32, 96], strides = [1, 1]} : vector<32x480xbf16> to vector<32x96xbf16>
    %cst_97 = arith.constant dense<0.000000e+00> : vector<8x96xf32>
    %473 = tpu.matmul %471, %472, %cst_97 {dimension_numbers = #tpu.dot_dimension_numbers<[1], [0], [0], [1], [0, 0, 1, 1], [], []>} : vector<8x32xbf16>, vector<32x96xbf16>, vector<8x96xf32> -> vector<8x96xf32>
    %474 = vector.extract_strided_slice %458 {offsets = [0, 0], sizes = [1, 96], strides = [1, 1]} : vector<4x128xf32> to vector<1x96xf32>
    %475 = vector.broadcast %474 : vector<1x96xf32> to vector<8x96xf32>
    %476 = arith.addf %473, %475 : vector<8x96xf32>
    %477 = vector.extract_strided_slice %476 {offsets = [0, 0], sizes = [8, 32], strides = [1, 1]} : vector<8x96xf32> to vector<8x32xf32>
    %478 = vector.extract_strided_slice %476 {offsets = [0, 32], sizes = [8, 32], strides = [1, 1]} : vector<8x96xf32> to vector<8x32xf32>
    %479 = vector.extract_strided_slice %476 {offsets = [0, 64], sizes = [8, 32], strides = [1, 1]} : vector<8x96xf32> to vector<8x32xf32>
    %480 = vector.extract_strided_slice %477 {offsets = [0, 0], sizes = [8, 8], strides = [1, 1]} : vector<8x32xf32> to vector<8x8xf32>
    %481 = vector.extract_strided_slice %477 {offsets = [0, 8], sizes = [8, 8], strides = [1, 1]} : vector<8x32xf32> to vector<8x8xf32>
    %482 = vector.extract_strided_slice %477 {offsets = [0, 16], sizes = [8, 8], strides = [1, 1]} : vector<8x32xf32> to vector<8x8xf32>
    %483 = vector.extract_strided_slice %477 {offsets = [0, 24], sizes = [8, 8], strides = [1, 1]} : vector<8x32xf32> to vector<8x8xf32>
    %484 = vector.shape_cast %480 : vector<8x8xf32> to vector<1x8x8xf32>
    %485 = vector.shape_cast %481 : vector<8x8xf32> to vector<1x8x8xf32>
    %486 = vector.shape_cast %482 : vector<8x8xf32> to vector<1x8x8xf32>
    %487 = vector.shape_cast %483 : vector<8x8xf32> to vector<1x8x8xf32>
    %488 = tpu.concatenate %484, %485, %486, %487 in 0 : vector<1x8x8xf32>, vector<1x8x8xf32>, vector<1x8x8xf32>, vector<1x8x8xf32> -> vector<4x8x8xf32>
    %489 = arith.truncf %488 : vector<4x8x8xf32> to vector<4x8x8xbf16>
    %490 = vector.extract_strided_slice %478 {offsets = [0, 0], sizes = [8, 8], strides = [1, 1]} : vector<8x32xf32> to vector<8x8xf32>
    %491 = vector.extract_strided_slice %478 {offsets = [0, 8], sizes = [8, 8], strides = [1, 1]} : vector<8x32xf32> to vector<8x8xf32>
    %492 = vector.extract_strided_slice %478 {offsets = [0, 16], sizes = [8, 8], strides = [1, 1]} : vector<8x32xf32> to vector<8x8xf32>
    %493 = vector.extract_strided_slice %478 {offsets = [0, 24], sizes = [8, 8], strides = [1, 1]} : vector<8x32xf32> to vector<8x8xf32>
    %494 = vector.shape_cast %490 : vector<8x8xf32> to vector<1x8x8xf32>
    %495 = vector.shape_cast %491 : vector<8x8xf32> to vector<1x8x8xf32>
    %496 = vector.shape_cast %492 : vector<8x8xf32> to vector<1x8x8xf32>
    %497 = vector.shape_cast %493 : vector<8x8xf32> to vector<1x8x8xf32>
    %498 = tpu.concatenate %494, %495, %496, %497 in 0 : vector<1x8x8xf32>, vector<1x8x8xf32>, vector<1x8x8xf32>, vector<1x8x8xf32> -> vector<4x8x8xf32>
    %499 = arith.truncf %498 : vector<4x8x8xf32> to vector<4x8x8xbf16>
    %500 = vector.extract_strided_slice %479 {offsets = [0, 0], sizes = [8, 8], strides = [1, 1]} : vector<8x32xf32> to vector<8x8xf32>
    %501 = vector.extract_strided_slice %479 {offsets = [0, 8], sizes = [8, 8], strides = [1, 1]} : vector<8x32xf32> to vector<8x8xf32>
    %502 = vector.extract_strided_slice %479 {offsets = [0, 16], sizes = [8, 8], strides = [1, 1]} : vector<8x32xf32> to vector<8x8xf32>
    %503 = vector.extract_strided_slice %479 {offsets = [0, 24], sizes = [8, 8], strides = [1, 1]} : vector<8x32xf32> to vector<8x8xf32>
    %504 = vector.shape_cast %500 : vector<8x8xf32> to vector<1x8x8xf32>
    %505 = vector.shape_cast %501 : vector<8x8xf32> to vector<1x8x8xf32>
    %506 = vector.shape_cast %502 : vector<8x8xf32> to vector<1x8x8xf32>
    %507 = vector.shape_cast %503 : vector<8x8xf32> to vector<1x8x8xf32>
    %508 = tpu.concatenate %504, %505, %506, %507 in 0 : vector<1x8x8xf32>, vector<1x8x8xf32>, vector<1x8x8xf32>, vector<1x8x8xf32> -> vector<4x8x8xf32>
    %509 = arith.truncf %508 : vector<4x8x8xf32> to vector<4x8x8xbf16>
    "tpu.trace_start"() <{level = 10 : i32, message = "htd,hsd->hts"}> : () -> ()
    %cst_98 = arith.constant dense<0.000000e+00> : vector<4x8x8xf32>
    %510 = tpu.matmul %489, %499, %cst_98 {dimension_numbers = #tpu.dot_dimension_numbers<[2], [2], [1], [1], [0, 0, 0, 1, 1, 1], [0], [0]>} : vector<4x8x8xbf16>, vector<4x8x8xbf16>, vector<4x8x8xf32> -> vector<4x8x8xf32>
    "tpu.trace_stop"() : () -> ()
    %cst_99 = arith.constant 0.353553385 : f32
    %511 = vector.broadcast %cst_99 : f32 to vector<4x8x8xf32>
    %512 = arith.mulf %510, %511 : vector<4x8x8xf32>
    %513 = vector.shape_cast %51 : vector<8x8xi1> to vector<1x8x8xi1>
    %cst_100 = arith.constant -1.000000e+04 : f32
    %514 = vector.shape_cast %513 : vector<1x8x8xi1> to vector<1x8x8xi1>
    %515 = vector.broadcast %514 : vector<1x8x8xi1> to vector<4x8x8xi1>
    %516 = vector.broadcast %cst_100 : f32 to vector<4x8x8xf32>
    %517 = arith.select %515, %512, %516 : vector<4x8x8xi1>, vector<4x8x8xf32>
    %cst_101 = arith.constant dense<0xFF800000> : vector<4x8xf32>
    %518 = vector.multi_reduction <maximumf>, %517, %cst_101 [2] : vector<4x8x8xf32> to vector<4x8xf32>
    %cst_102 = arith.constant 0xFF800000 : f32
    %519 = vector.broadcast %cst_102 : f32 to vector<4x8xf32>
    %520 = arith.maximumf %519, %518 : vector<4x8xf32>
    %521 = vector.shape_cast %520 : vector<4x8xf32> to vector<4x8x1xf32>
    %522 = vector.broadcast %521 : vector<4x8x1xf32> to vector<4x8x8xf32>
    %523 = arith.subf %517, %522 : vector<4x8x8xf32>
    %524 = math.exp %523 : vector<4x8x8xf32>
    %cst_103 = arith.constant dense<0.000000e+00> : vector<4x8xf32>
    %525 = vector.multi_reduction <add>, %524, %cst_103 [2] : vector<4x8x8xf32> to vector<4x8xf32>
    %526 = vector.shape_cast %525 : vector<4x8xf32> to vector<4x8x1xf32>
    %527 = vector.broadcast %526 : vector<4x8x1xf32> to vector<4x8x8xf32>
    %528 = arith.divf %524, %527 : vector<4x8x8xf32>
    %529 = vector.shape_cast %51 : vector<8x8xi1> to vector<1x8x8xi1>
    %cst_104 = arith.constant 0.000000e+00 : f32
    %530 = vector.shape_cast %529 : vector<1x8x8xi1> to vector<1x8x8xi1>
    %531 = vector.broadcast %530 : vector<1x8x8xi1> to vector<4x8x8xi1>
    %532 = vector.broadcast %cst_104 : f32 to vector<4x8x8xf32>
    %533 = arith.select %531, %528, %532 : vector<4x8x8xi1>, vector<4x8x8xf32>
    %534 = arith.truncf %533 : vector<4x8x8xf32> to vector<4x8x8xbf16>
    "tpu.trace_start"() <{level = 10 : i32, message = "hts,hsd->htd"}> : () -> ()
    %cst_105 = arith.constant dense<0.000000e+00> : vector<4x8x8xf32>
    %535 = tpu.matmul %534, %509, %cst_105 {dimension_numbers = #tpu.dot_dimension_numbers<[2], [1], [1], [2], [0, 0, 0, 1, 1, 2], [0], [0]>} : vector<4x8x8xbf16>, vector<4x8x8xbf16>, vector<4x8x8xf32> -> vector<4x8x8xf32>
    "tpu.trace_stop"() : () -> ()
    %536 = vector.extract_strided_slice %535 {offsets = [0, 0, 0], sizes = [1, 8, 8], strides = [1, 1, 1]} : vector<4x8x8xf32> to vector<1x8x8xf32>
    %537 = vector.shape_cast %536 : vector<1x8x8xf32> to vector<8x8xf32>
    %538 = vector.extract_strided_slice %535 {offsets = [1, 0, 0], sizes = [1, 8, 8], strides = [1, 1, 1]} : vector<4x8x8xf32> to vector<1x8x8xf32>
    %539 = vector.shape_cast %538 : vector<1x8x8xf32> to vector<8x8xf32>
    %540 = vector.extract_strided_slice %535 {offsets = [2, 0, 0], sizes = [1, 8, 8], strides = [1, 1, 1]} : vector<4x8x8xf32> to vector<1x8x8xf32>
    %541 = vector.shape_cast %540 : vector<1x8x8xf32> to vector<8x8xf32>
    %542 = vector.extract_strided_slice %535 {offsets = [3, 0, 0], sizes = [1, 8, 8], strides = [1, 1, 1]} : vector<4x8x8xf32> to vector<1x8x8xf32>
    %543 = vector.shape_cast %542 : vector<1x8x8xf32> to vector<8x8xf32>
    %544 = tpu.concatenate %537, %539, %541, %543 in 1 : vector<8x8xf32>, vector<8x8xf32>, vector<8x8xf32>, vector<8x8xf32> -> vector<8x32xf32>
    %545 = arith.truncf %544 : vector<8x32xf32> to vector<8x32xbf16>
    %546 = vector.extract_strided_slice %454 {offsets = [0, 96], sizes = [32, 32], strides = [1, 1]} : vector<32x480xbf16> to vector<32x32xbf16>
    %cst_106 = arith.constant dense<0.000000e+00> : vector<8x32xf32>
    %547 = tpu.matmul %545, %546, %cst_106 {dimension_numbers = #tpu.dot_dimension_numbers<[1], [0], [0], [1], [0, 0, 1, 1], [], []>} : vector<8x32xbf16>, vector<32x32xbf16>, vector<8x32xf32> -> vector<8x32xf32>
    %548 = vector.extract_strided_slice %460 {offsets = [2, 0], sizes = [1, 32], strides = [1, 1]} : vector<26x32xf32> to vector<1x32xf32>
    %549 = vector.shape_cast %548 : vector<1x32xf32> to vector<32xf32>
    %550 = vector.shape_cast %549 : vector<32xf32> to vector<1x32xf32>
    %551 = vector.broadcast %550 : vector<1x32xf32> to vector<8x32xf32>
    %552 = arith.addf %547, %551 : vector<8x32xf32>
    %553 = arith.addf %452, %552 : vector<8x32xf32>
    %554 = vector.extract_strided_slice %460 {offsets = [3, 0], sizes = [1, 32], strides = [1, 1]} : vector<26x32xf32> to vector<1x32xf32>
    %555 = vector.shape_cast %554 : vector<1x32xf32> to vector<32xf32>
    %556 = vector.extract_strided_slice %460 {offsets = [4, 0], sizes = [1, 32], strides = [1, 1]} : vector<26x32xf32> to vector<1x32xf32>
    %557 = vector.shape_cast %556 : vector<1x32xf32> to vector<32xf32>
    %cst_107 = arith.constant dense<0.000000e+00> : vector<8xf32>
    %558 = vector.multi_reduction <add>, %553, %cst_107 [1] : vector<8x32xf32> to vector<8xf32>
    %559 = vector.shape_cast %558 : vector<8xf32> to vector<8x1xf32>
    %cst_108 = arith.constant 3.200000e+01 : f32
    %560 = vector.broadcast %cst_108 : f32 to vector<8x1xf32>
    %561 = arith.divf %559, %560 : vector<8x1xf32>
    %562 = vector.broadcast %561 : vector<8x1xf32> to vector<8x32xf32>
    %563 = arith.subf %553, %562 : vector<8x32xf32>
    %564 = arith.mulf %563, %563 : vector<8x32xf32>
    %cst_109 = arith.constant dense<0.000000e+00> : vector<8xf32>
    %565 = vector.multi_reduction <add>, %564, %cst_109 [1] : vector<8x32xf32> to vector<8xf32>
    %566 = vector.shape_cast %565 : vector<8xf32> to vector<8x1xf32>
    %cst_110 = arith.constant 3.200000e+01 : f32
    %567 = vector.broadcast %cst_110 : f32 to vector<8x1xf32>
    %568 = arith.divf %566, %567 : vector<8x1xf32>
    %569 = vector.broadcast %561 : vector<8x1xf32> to vector<8x32xf32>
    %570 = arith.subf %553, %569 : vector<8x32xf32>
    %cst_111 = arith.constant 9.99999974E-6 : f32
    %571 = vector.broadcast %cst_111 : f32 to vector<8x1xf32>
    %572 = arith.addf %568, %571 : vector<8x1xf32>
    %573 = math.rsqrt %572 : vector<8x1xf32>
    %574 = vector.broadcast %573 : vector<8x1xf32> to vector<8x32xf32>
    %575 = arith.mulf %570, %574 : vector<8x32xf32>
    %576 = vector.shape_cast %555 : vector<32xf32> to vector<1x32xf32>
    %577 = vector.broadcast %576 : vector<1x32xf32> to vector<8x32xf32>
    %578 = arith.mulf %575, %577 : vector<8x32xf32>
    %579 = vector.shape_cast %557 : vector<32xf32> to vector<1x32xf32>
    %580 = vector.broadcast %579 : vector<1x32xf32> to vector<8x32xf32>
    %581 = arith.addf %578, %580 : vector<8x32xf32>
    %582 = vector.extract_strided_slice %460 {offsets = [5, 0], sizes = [1, 32], strides = [1, 1]} : vector<26x32xf32> to vector<1x32xf32>
    %583 = vector.shape_cast %582 : vector<1x32xf32> to vector<32xf32>
    %584 = vector.shape_cast %583 : vector<32xf32> to vector<1x32xf32>
    %585 = vector.broadcast %584 : vector<1x32xf32> to vector<8x32xf32>
    %586 = arith.mulf %581, %585 : vector<8x32xf32>
    %587 = vector.extract_strided_slice %460 {offsets = [6, 0], sizes = [1, 32], strides = [1, 1]} : vector<26x32xf32> to vector<1x32xf32>
    %588 = vector.shape_cast %587 : vector<1x32xf32> to vector<32xf32>
    %589 = vector.shape_cast %588 : vector<32xf32> to vector<1x32xf32>
    %590 = vector.broadcast %589 : vector<1x32xf32> to vector<8x32xf32>
    %591 = arith.addf %586, %590 : vector<8x32xf32>
    %592 = arith.truncf %591 : vector<8x32xf32> to vector<8x32xbf16>
    %593 = vector.extract_strided_slice %454 {offsets = [0, 128], sizes = [32, 128], strides = [1, 1]} : vector<32x480xbf16> to vector<32x128xbf16>
    %cst_112 = arith.constant dense<0.000000e+00> : vector<8x128xf32>
    %594 = tpu.matmul %592, %593, %cst_112 {dimension_numbers = #tpu.dot_dimension_numbers<[1], [0], [0], [1], [0, 0, 1, 1], [], []>} : vector<8x32xbf16>, vector<32x128xbf16>, vector<8x128xf32> -> vector<8x128xf32>
    %595 = vector.extract_strided_slice %458 {offsets = [1, 0], sizes = [1, 128], strides = [1, 1]} : vector<4x128xf32> to vector<1x128xf32>
    %596 = vector.broadcast %595 : vector<1x128xf32> to vector<8x128xf32>
    %597 = arith.addf %594, %596 : vector<8x128xf32>
    %598 = arith.negf %597 : vector<8x128xf32>
    %599 = math.exp %598 : vector<8x128xf32>
    %cst_113 = arith.constant 1.000000e+00 : f32
    %600 = vector.broadcast %cst_113 : f32 to vector<8x128xf32>
    %601 = arith.addf %600, %599 : vector<8x128xf32>
    %602 = arith.divf %600, %601 : vector<8x128xf32>
    %603 = arith.mulf %597, %602 : vector<8x128xf32>
    %604 = arith.truncf %603 : vector<8x128xf32> to vector<8x128xbf16>
    %605 = vector.extract_strided_slice %456 {offsets = [0, 0], sizes = [128, 32], strides = [1, 1]} : vector<128x64xbf16> to vector<128x32xbf16>
    %cst_114 = arith.constant dense<0.000000e+00> : vector<8x32xf32>
    %606 = tpu.matmul %604, %605, %cst_114 {dimension_numbers = #tpu.dot_dimension_numbers<[1], [0], [0], [1], [0, 0, 1, 1], [], []>} : vector<8x128xbf16>, vector<128x32xbf16>, vector<8x32xf32> -> vector<8x32xf32>
    %607 = vector.extract_strided_slice %460 {offsets = [7, 0], sizes = [1, 32], strides = [1, 1]} : vector<26x32xf32> to vector<1x32xf32>
    %608 = vector.shape_cast %607 : vector<1x32xf32> to vector<32xf32>
    %609 = vector.shape_cast %608 : vector<32xf32> to vector<1x32xf32>
    %610 = vector.broadcast %609 : vector<1x32xf32> to vector<8x32xf32>
    %611 = arith.addf %606, %610 : vector<8x32xf32>
    %612 = arith.addf %581, %611 : vector<8x32xf32>
    %613 = vector.extract_strided_slice %460 {offsets = [8, 0], sizes = [1, 32], strides = [1, 1]} : vector<26x32xf32> to vector<1x32xf32>
    %614 = vector.shape_cast %613 : vector<1x32xf32> to vector<32xf32>
    %615 = vector.extract_strided_slice %460 {offsets = [9, 0], sizes = [1, 32], strides = [1, 1]} : vector<26x32xf32> to vector<1x32xf32>
    %616 = vector.shape_cast %615 : vector<1x32xf32> to vector<32xf32>
    %cst_115 = arith.constant dense<0.000000e+00> : vector<8xf32>
    %617 = vector.multi_reduction <add>, %612, %cst_115 [1] : vector<8x32xf32> to vector<8xf32>
    %618 = vector.shape_cast %617 : vector<8xf32> to vector<8x1xf32>
    %cst_116 = arith.constant 3.200000e+01 : f32
    %619 = vector.broadcast %cst_116 : f32 to vector<8x1xf32>
    %620 = arith.divf %618, %619 : vector<8x1xf32>
    %621 = vector.broadcast %620 : vector<8x1xf32> to vector<8x32xf32>
    %622 = arith.subf %612, %621 : vector<8x32xf32>
    %623 = arith.mulf %622, %622 : vector<8x32xf32>
    %cst_117 = arith.constant dense<0.000000e+00> : vector<8xf32>
    %624 = vector.multi_reduction <add>, %623, %cst_117 [1] : vector<8x32xf32> to vector<8xf32>
    %625 = vector.shape_cast %624 : vector<8xf32> to vector<8x1xf32>
    %cst_118 = arith.constant 3.200000e+01 : f32
    %626 = vector.broadcast %cst_118 : f32 to vector<8x1xf32>
    %627 = arith.divf %625, %626 : vector<8x1xf32>
    %628 = vector.broadcast %620 : vector<8x1xf32> to vector<8x32xf32>
    %629 = arith.subf %612, %628 : vector<8x32xf32>
    %cst_119 = arith.constant 9.99999974E-6 : f32
    %630 = vector.broadcast %cst_119 : f32 to vector<8x1xf32>
    %631 = arith.addf %627, %630 : vector<8x1xf32>
    %632 = math.rsqrt %631 : vector<8x1xf32>
    %633 = vector.broadcast %632 : vector<8x1xf32> to vector<8x32xf32>
    %634 = arith.mulf %629, %633 : vector<8x32xf32>
    %635 = vector.shape_cast %614 : vector<32xf32> to vector<1x32xf32>
    %636 = vector.broadcast %635 : vector<1x32xf32> to vector<8x32xf32>
    %637 = arith.mulf %634, %636 : vector<8x32xf32>
    %638 = vector.shape_cast %616 : vector<32xf32> to vector<1x32xf32>
    %639 = vector.broadcast %638 : vector<1x32xf32> to vector<8x32xf32>
    %640 = arith.addf %637, %639 : vector<8x32xf32>
    %641 = vector.extract_strided_slice %460 {offsets = [10, 0], sizes = [1, 32], strides = [1, 1]} : vector<26x32xf32> to vector<1x32xf32>
    %642 = vector.shape_cast %641 : vector<1x32xf32> to vector<32xf32>
    %643 = vector.shape_cast %642 : vector<32xf32> to vector<1x32xf32>
    %644 = vector.broadcast %643 : vector<1x32xf32> to vector<8x32xf32>
    %645 = arith.mulf %640, %644 : vector<8x32xf32>
    %646 = vector.extract_strided_slice %460 {offsets = [11, 0], sizes = [1, 32], strides = [1, 1]} : vector<26x32xf32> to vector<1x32xf32>
    %647 = vector.shape_cast %646 : vector<1x32xf32> to vector<32xf32>
    %648 = vector.shape_cast %647 : vector<32xf32> to vector<1x32xf32>
    %649 = vector.broadcast %648 : vector<1x32xf32> to vector<8x32xf32>
    %650 = arith.addf %645, %649 : vector<8x32xf32>
    %651 = arith.truncf %650 : vector<8x32xf32> to vector<8x32xbf16>
    %652 = vector.extract_strided_slice %454 {offsets = [0, 256], sizes = [32, 64], strides = [1, 1]} : vector<32x480xbf16> to vector<32x64xbf16>
    %cst_120 = arith.constant dense<0.000000e+00> : vector<8x64xf32>
    %653 = tpu.matmul %651, %652, %cst_120 {dimension_numbers = #tpu.dot_dimension_numbers<[1], [0], [0], [1], [0, 0, 1, 1], [], []>} : vector<8x32xbf16>, vector<32x64xbf16>, vector<8x64xf32> -> vector<8x64xf32>
    %654 = vector.extract_strided_slice %458 {offsets = [2, 0], sizes = [1, 64], strides = [1, 1]} : vector<4x128xf32> to vector<1x64xf32>
    %655 = vector.broadcast %654 : vector<1x64xf32> to vector<8x64xf32>
    %656 = arith.addf %653, %655 : vector<8x64xf32>
    %657 = vector.extract_strided_slice %656 {offsets = [0, 0], sizes = [8, 32], strides = [1, 1]} : vector<8x64xf32> to vector<8x32xf32>
    %658 = vector.extract_strided_slice %656 {offsets = [0, 32], sizes = [8, 32], strides = [1, 1]} : vector<8x64xf32> to vector<8x32xf32>
    %659 = arith.negf %658 : vector<8x32xf32>
    %660 = math.exp %659 : vector<8x32xf32>
    %cst_121 = arith.constant 1.000000e+00 : f32
    %661 = vector.broadcast %cst_121 : f32 to vector<8x32xf32>
    %662 = arith.addf %661, %660 : vector<8x32xf32>
    %663 = arith.divf %661, %662 : vector<8x32xf32>
    %664 = arith.mulf %657, %663 : vector<8x32xf32>
    %cst_122 = arith.constant 0.000000e+00 : f32
    %665 = vector.broadcast %cst_122 : f32 to vector<8x32xf32>
    %666 = arith.select %54, %664, %665 : vector<8x32xi1>, vector<8x32xf32>
    %667 = vector.extract_strided_slice %460 {offsets = [14, 0], sizes = [1, 32], strides = [1, 1]} : vector<26x32xf32> to vector<1x32xf32>
    %668 = vector.shape_cast %667 : vector<1x32xf32> to vector<32xf32>
    %669 = vector.shape_cast %668 : vector<32xf32> to vector<1x32xf32>
    %670 = vector.broadcast %669 : vector<1x32xf32> to vector<8x32xf32>
    %671 = arith.mulf %666, %670 : vector<8x32xf32>
    %c2_i32_123 = arith.constant 2 : i32
    %672 = tpu.dynamic_rotate %666 by %c2_i32_123 dim 0 : vector<8x32xf32>, i32 -> vector<8x32xf32>
    %c-2_i32_124 = arith.constant -2 : i32
    %673 = vector.broadcast %c-2_i32_124 : i32 to vector<8x32xi32>
    %674 = arith.addi %52, %673 : vector<8x32xi32>
    %c0_i32_125 = arith.constant 0 : i32
    %675 = vector.broadcast %c0_i32_125 : i32 to vector<8x32xi32>
    %676 = arith.cmpi sge, %674, %675 : vector<8x32xi32>
    %c-2_i32_126 = arith.constant -2 : i32
    %677 = vector.broadcast %c-2_i32_126 : i32 to vector<8x32xi32>
    %678 = arith.addi %52, %677 : vector<8x32xi32>
    %c8_i32_127 = arith.constant 8 : i32
    %679 = vector.broadcast %c8_i32_127 : i32 to vector<8x32xi32>
    %680 = arith.cmpi slt, %678, %679 : vector<8x32xi32>
    %681 = arith.andi %676, %680 : vector<8x32xi1>
    %cst_128 = arith.constant 0.000000e+00 : f32
    %682 = vector.broadcast %cst_128 : f32 to vector<8x32xf32>
    %683 = arith.select %681, %672, %682 : vector<8x32xi1>, vector<8x32xf32>
    %684 = vector.extract_strided_slice %460 {offsets = [12, 0], sizes = [1, 32], strides = [1, 1]} : vector<26x32xf32> to vector<1x32xf32>
    %685 = vector.shape_cast %684 : vector<1x32xf32> to vector<32xf32>
    %686 = vector.shape_cast %685 : vector<32xf32> to vector<1x32xf32>
    %687 = vector.broadcast %686 : vector<1x32xf32> to vector<8x32xf32>
    %688 = arith.mulf %683, %687 : vector<8x32xf32>
    %689 = arith.addf %671, %688 : vector<8x32xf32>
    %c1_i32_129 = arith.constant 1 : i32
    %690 = tpu.dynamic_rotate %666 by %c1_i32_129 dim 0 : vector<8x32xf32>, i32 -> vector<8x32xf32>
    %c-1_i32_130 = arith.constant -1 : i32
    %691 = vector.broadcast %c-1_i32_130 : i32 to vector<8x32xi32>
    %692 = arith.addi %52, %691 : vector<8x32xi32>
    %c0_i32_131 = arith.constant 0 : i32
    %693 = vector.broadcast %c0_i32_131 : i32 to vector<8x32xi32>
    %694 = arith.cmpi sge, %692, %693 : vector<8x32xi32>
    %c-1_i32_132 = arith.constant -1 : i32
    %695 = vector.broadcast %c-1_i32_132 : i32 to vector<8x32xi32>
    %696 = arith.addi %52, %695 : vector<8x32xi32>
    %c8_i32_133 = arith.constant 8 : i32
    %697 = vector.broadcast %c8_i32_133 : i32 to vector<8x32xi32>
    %698 = arith.cmpi slt, %696, %697 : vector<8x32xi32>
    %699 = arith.andi %694, %698 : vector<8x32xi1>
    %cst_134 = arith.constant 0.000000e+00 : f32
    %700 = vector.broadcast %cst_134 : f32 to vector<8x32xf32>
    %701 = arith.select %699, %690, %700 : vector<8x32xi1>, vector<8x32xf32>
    %702 = vector.extract_strided_slice %460 {offsets = [13, 0], sizes = [1, 32], strides = [1, 1]} : vector<26x32xf32> to vector<1x32xf32>
    %703 = vector.shape_cast %702 : vector<1x32xf32> to vector<32xf32>
    %704 = vector.shape_cast %703 : vector<32xf32> to vector<1x32xf32>
    %705 = vector.broadcast %704 : vector<1x32xf32> to vector<8x32xf32>
    %706 = arith.mulf %701, %705 : vector<8x32xf32>
    %707 = arith.addf %689, %706 : vector<8x32xf32>
    %c7_i32_135 = arith.constant 7 : i32
    %708 = tpu.dynamic_rotate %666 by %c7_i32_135 dim 0 : vector<8x32xf32>, i32 -> vector<8x32xf32>
    %c1_i32_136 = arith.constant 1 : i32
    %709 = vector.broadcast %c1_i32_136 : i32 to vector<8x32xi32>
    %710 = arith.addi %52, %709 : vector<8x32xi32>
    %c0_i32_137 = arith.constant 0 : i32
    %711 = vector.broadcast %c0_i32_137 : i32 to vector<8x32xi32>
    %712 = arith.cmpi sge, %710, %711 : vector<8x32xi32>
    %c1_i32_138 = arith.constant 1 : i32
    %713 = vector.broadcast %c1_i32_138 : i32 to vector<8x32xi32>
    %714 = arith.addi %52, %713 : vector<8x32xi32>
    %c8_i32_139 = arith.constant 8 : i32
    %715 = vector.broadcast %c8_i32_139 : i32 to vector<8x32xi32>
    %716 = arith.cmpi slt, %714, %715 : vector<8x32xi32>
    %717 = arith.andi %712, %716 : vector<8x32xi1>
    %cst_140 = arith.constant 0.000000e+00 : f32
    %718 = vector.broadcast %cst_140 : f32 to vector<8x32xf32>
    %719 = arith.select %717, %708, %718 : vector<8x32xi1>, vector<8x32xf32>
    %720 = vector.extract_strided_slice %460 {offsets = [15, 0], sizes = [1, 32], strides = [1, 1]} : vector<26x32xf32> to vector<1x32xf32>
    %721 = vector.shape_cast %720 : vector<1x32xf32> to vector<32xf32>
    %722 = vector.shape_cast %721 : vector<32xf32> to vector<1x32xf32>
    %723 = vector.broadcast %722 : vector<1x32xf32> to vector<8x32xf32>
    %724 = arith.mulf %719, %723 : vector<8x32xf32>
    %725 = arith.addf %707, %724 : vector<8x32xf32>
    %c6_i32_141 = arith.constant 6 : i32
    %726 = tpu.dynamic_rotate %666 by %c6_i32_141 dim 0 : vector<8x32xf32>, i32 -> vector<8x32xf32>
    %c2_i32_142 = arith.constant 2 : i32
    %727 = vector.broadcast %c2_i32_142 : i32 to vector<8x32xi32>
    %728 = arith.addi %52, %727 : vector<8x32xi32>
    %c0_i32_143 = arith.constant 0 : i32
    %729 = vector.broadcast %c0_i32_143 : i32 to vector<8x32xi32>
    %730 = arith.cmpi sge, %728, %729 : vector<8x32xi32>
    %c2_i32_144 = arith.constant 2 : i32
    %731 = vector.broadcast %c2_i32_144 : i32 to vector<8x32xi32>
    %732 = arith.addi %52, %731 : vector<8x32xi32>
    %c8_i32_145 = arith.constant 8 : i32
    %733 = vector.broadcast %c8_i32_145 : i32 to vector<8x32xi32>
    %734 = arith.cmpi slt, %732, %733 : vector<8x32xi32>
    %735 = arith.andi %730, %734 : vector<8x32xi1>
    %cst_146 = arith.constant 0.000000e+00 : f32
    %736 = vector.broadcast %cst_146 : f32 to vector<8x32xf32>
    %737 = arith.select %735, %726, %736 : vector<8x32xi1>, vector<8x32xf32>
    %738 = vector.extract_strided_slice %460 {offsets = [16, 0], sizes = [1, 32], strides = [1, 1]} : vector<26x32xf32> to vector<1x32xf32>
    %739 = vector.shape_cast %738 : vector<1x32xf32> to vector<32xf32>
    %740 = vector.shape_cast %739 : vector<32xf32> to vector<1x32xf32>
    %741 = vector.broadcast %740 : vector<1x32xf32> to vector<8x32xf32>
    %742 = arith.mulf %737, %741 : vector<8x32xf32>
    %743 = arith.addf %725, %742 : vector<8x32xf32>
    %744 = vector.extract_strided_slice %460 {offsets = [17, 0], sizes = [1, 32], strides = [1, 1]} : vector<26x32xf32> to vector<1x32xf32>
    %745 = vector.shape_cast %744 : vector<1x32xf32> to vector<32xf32>
    %746 = vector.shape_cast %745 : vector<32xf32> to vector<1x32xf32>
    %747 = vector.broadcast %746 : vector<1x32xf32> to vector<8x32xf32>
    %748 = arith.addf %743, %747 : vector<8x32xf32>
    %749 = arith.negf %748 : vector<8x32xf32>
    %750 = math.exp %749 : vector<8x32xf32>
    %cst_147 = arith.constant 1.000000e+00 : f32
    %751 = vector.broadcast %cst_147 : f32 to vector<8x32xf32>
    %752 = arith.addf %751, %750 : vector<8x32xf32>
    %753 = arith.divf %751, %752 : vector<8x32xf32>
    %754 = arith.mulf %748, %753 : vector<8x32xf32>
    %755 = arith.truncf %754 : vector<8x32xf32> to vector<8x32xbf16>
    %756 = vector.extract_strided_slice %454 {offsets = [0, 320], sizes = [32, 32], strides = [1, 1]} : vector<32x480xbf16> to vector<32x32xbf16>
    %cst_148 = arith.constant dense<0.000000e+00> : vector<8x32xf32>
    %757 = tpu.matmul %755, %756, %cst_148 {dimension_numbers = #tpu.dot_dimension_numbers<[1], [0], [0], [1], [0, 0, 1, 1], [], []>} : vector<8x32xbf16>, vector<32x32xbf16>, vector<8x32xf32> -> vector<8x32xf32>
    %758 = vector.extract_strided_slice %460 {offsets = [18, 0], sizes = [1, 32], strides = [1, 1]} : vector<26x32xf32> to vector<1x32xf32>
    %759 = vector.shape_cast %758 : vector<1x32xf32> to vector<32xf32>
    %760 = vector.shape_cast %759 : vector<32xf32> to vector<1x32xf32>
    %761 = vector.broadcast %760 : vector<1x32xf32> to vector<8x32xf32>
    %762 = arith.addf %757, %761 : vector<8x32xf32>
    %763 = arith.addf %640, %762 : vector<8x32xf32>
    %764 = vector.extract_strided_slice %460 {offsets = [19, 0], sizes = [1, 32], strides = [1, 1]} : vector<26x32xf32> to vector<1x32xf32>
    %765 = vector.shape_cast %764 : vector<1x32xf32> to vector<32xf32>
    %766 = vector.extract_strided_slice %460 {offsets = [20, 0], sizes = [1, 32], strides = [1, 1]} : vector<26x32xf32> to vector<1x32xf32>
    %767 = vector.shape_cast %766 : vector<1x32xf32> to vector<32xf32>
    %cst_149 = arith.constant dense<0.000000e+00> : vector<8xf32>
    %768 = vector.multi_reduction <add>, %763, %cst_149 [1] : vector<8x32xf32> to vector<8xf32>
    %769 = vector.shape_cast %768 : vector<8xf32> to vector<8x1xf32>
    %cst_150 = arith.constant 3.200000e+01 : f32
    %770 = vector.broadcast %cst_150 : f32 to vector<8x1xf32>
    %771 = arith.divf %769, %770 : vector<8x1xf32>
    %772 = vector.broadcast %771 : vector<8x1xf32> to vector<8x32xf32>
    %773 = arith.subf %763, %772 : vector<8x32xf32>
    %774 = arith.mulf %773, %773 : vector<8x32xf32>
    %cst_151 = arith.constant dense<0.000000e+00> : vector<8xf32>
    %775 = vector.multi_reduction <add>, %774, %cst_151 [1] : vector<8x32xf32> to vector<8xf32>
    %776 = vector.shape_cast %775 : vector<8xf32> to vector<8x1xf32>
    %cst_152 = arith.constant 3.200000e+01 : f32
    %777 = vector.broadcast %cst_152 : f32 to vector<8x1xf32>
    %778 = arith.divf %776, %777 : vector<8x1xf32>
    %779 = vector.broadcast %771 : vector<8x1xf32> to vector<8x32xf32>
    %780 = arith.subf %763, %779 : vector<8x32xf32>
    %cst_153 = arith.constant 9.99999974E-6 : f32
    %781 = vector.broadcast %cst_153 : f32 to vector<8x1xf32>
    %782 = arith.addf %778, %781 : vector<8x1xf32>
    %783 = math.rsqrt %782 : vector<8x1xf32>
    %784 = vector.broadcast %783 : vector<8x1xf32> to vector<8x32xf32>
    %785 = arith.mulf %780, %784 : vector<8x32xf32>
    %786 = vector.shape_cast %765 : vector<32xf32> to vector<1x32xf32>
    %787 = vector.broadcast %786 : vector<1x32xf32> to vector<8x32xf32>
    %788 = arith.mulf %785, %787 : vector<8x32xf32>
    %789 = vector.shape_cast %767 : vector<32xf32> to vector<1x32xf32>
    %790 = vector.broadcast %789 : vector<1x32xf32> to vector<8x32xf32>
    %791 = arith.addf %788, %790 : vector<8x32xf32>
    %792 = vector.extract_strided_slice %460 {offsets = [21, 0], sizes = [1, 32], strides = [1, 1]} : vector<26x32xf32> to vector<1x32xf32>
    %793 = vector.shape_cast %792 : vector<1x32xf32> to vector<32xf32>
    %794 = vector.shape_cast %793 : vector<32xf32> to vector<1x32xf32>
    %795 = vector.broadcast %794 : vector<1x32xf32> to vector<8x32xf32>
    %796 = arith.mulf %791, %795 : vector<8x32xf32>
    %797 = vector.extract_strided_slice %460 {offsets = [22, 0], sizes = [1, 32], strides = [1, 1]} : vector<26x32xf32> to vector<1x32xf32>
    %798 = vector.shape_cast %797 : vector<1x32xf32> to vector<32xf32>
    %799 = vector.shape_cast %798 : vector<32xf32> to vector<1x32xf32>
    %800 = vector.broadcast %799 : vector<1x32xf32> to vector<8x32xf32>
    %801 = arith.addf %796, %800 : vector<8x32xf32>
    %802 = arith.truncf %801 : vector<8x32xf32> to vector<8x32xbf16>
    %803 = vector.extract_strided_slice %454 {offsets = [0, 352], sizes = [32, 128], strides = [1, 1]} : vector<32x480xbf16> to vector<32x128xbf16>
    %cst_154 = arith.constant dense<0.000000e+00> : vector<8x128xf32>
    %804 = tpu.matmul %802, %803, %cst_154 {dimension_numbers = #tpu.dot_dimension_numbers<[1], [0], [0], [1], [0, 0, 1, 1], [], []>} : vector<8x32xbf16>, vector<32x128xbf16>, vector<8x128xf32> -> vector<8x128xf32>
    %805 = vector.extract_strided_slice %458 {offsets = [3, 0], sizes = [1, 128], strides = [1, 1]} : vector<4x128xf32> to vector<1x128xf32>
    %806 = vector.broadcast %805 : vector<1x128xf32> to vector<8x128xf32>
    %807 = arith.addf %804, %806 : vector<8x128xf32>
    %808 = arith.negf %807 : vector<8x128xf32>
    %809 = math.exp %808 : vector<8x128xf32>
    %cst_155 = arith.constant 1.000000e+00 : f32
    %810 = vector.broadcast %cst_155 : f32 to vector<8x128xf32>
    %811 = arith.addf %810, %809 : vector<8x128xf32>
    %812 = arith.divf %810, %811 : vector<8x128xf32>
    %813 = arith.mulf %807, %812 : vector<8x128xf32>
    %814 = arith.truncf %813 : vector<8x128xf32> to vector<8x128xbf16>
    %815 = vector.extract_strided_slice %456 {offsets = [0, 32], sizes = [128, 32], strides = [1, 1]} : vector<128x64xbf16> to vector<128x32xbf16>
    %cst_156 = arith.constant dense<0.000000e+00> : vector<8x32xf32>
    %816 = tpu.matmul %814, %815, %cst_156 {dimension_numbers = #tpu.dot_dimension_numbers<[1], [0], [0], [1], [0, 0, 1, 1], [], []>} : vector<8x128xbf16>, vector<128x32xbf16>, vector<8x32xf32> -> vector<8x32xf32>
    %817 = vector.extract_strided_slice %460 {offsets = [23, 0], sizes = [1, 32], strides = [1, 1]} : vector<26x32xf32> to vector<1x32xf32>
    %818 = vector.shape_cast %817 : vector<1x32xf32> to vector<32xf32>
    %819 = vector.shape_cast %818 : vector<32xf32> to vector<1x32xf32>
    %820 = vector.broadcast %819 : vector<1x32xf32> to vector<8x32xf32>
    %821 = arith.addf %816, %820 : vector<8x32xf32>
    %822 = arith.addf %791, %821 : vector<8x32xf32>
    %823 = vector.extract_strided_slice %460 {offsets = [24, 0], sizes = [1, 32], strides = [1, 1]} : vector<26x32xf32> to vector<1x32xf32>
    %824 = vector.shape_cast %823 : vector<1x32xf32> to vector<32xf32>
    %825 = vector.extract_strided_slice %460 {offsets = [25, 0], sizes = [1, 32], strides = [1, 1]} : vector<26x32xf32> to vector<1x32xf32>
    %826 = vector.shape_cast %825 : vector<1x32xf32> to vector<32xf32>
    %cst_157 = arith.constant dense<0.000000e+00> : vector<8xf32>
    %827 = vector.multi_reduction <add>, %822, %cst_157 [1] : vector<8x32xf32> to vector<8xf32>
    %828 = vector.shape_cast %827 : vector<8xf32> to vector<8x1xf32>
    %cst_158 = arith.constant 3.200000e+01 : f32
    %829 = vector.broadcast %cst_158 : f32 to vector<8x1xf32>
    %830 = arith.divf %828, %829 : vector<8x1xf32>
    %831 = vector.broadcast %830 : vector<8x1xf32> to vector<8x32xf32>
    %832 = arith.subf %822, %831 : vector<8x32xf32>
    %833 = arith.mulf %832, %832 : vector<8x32xf32>
    %cst_159 = arith.constant dense<0.000000e+00> : vector<8xf32>
    %834 = vector.multi_reduction <add>, %833, %cst_159 [1] : vector<8x32xf32> to vector<8xf32>
    %835 = vector.shape_cast %834 : vector<8xf32> to vector<8x1xf32>
    %cst_160 = arith.constant 3.200000e+01 : f32
    %836 = vector.broadcast %cst_160 : f32 to vector<8x1xf32>
    %837 = arith.divf %835, %836 : vector<8x1xf32>
    %838 = vector.broadcast %830 : vector<8x1xf32> to vector<8x32xf32>
    %839 = arith.subf %822, %838 : vector<8x32xf32>
    %cst_161 = arith.constant 9.99999974E-6 : f32
    %840 = vector.broadcast %cst_161 : f32 to vector<8x1xf32>
    %841 = arith.addf %837, %840 : vector<8x1xf32>
    %842 = math.rsqrt %841 : vector<8x1xf32>
    %843 = vector.broadcast %842 : vector<8x1xf32> to vector<8x32xf32>
    %844 = arith.mulf %839, %843 : vector<8x32xf32>
    %845 = vector.shape_cast %824 : vector<32xf32> to vector<1x32xf32>
    %846 = vector.broadcast %845 : vector<1x32xf32> to vector<8x32xf32>
    %847 = arith.mulf %844, %846 : vector<8x32xf32>
    %848 = vector.shape_cast %826 : vector<32xf32> to vector<1x32xf32>
    %849 = vector.broadcast %848 : vector<1x32xf32> to vector<8x32xf32>
    %850 = arith.addf %847, %849 : vector<8x32xf32>
    %851 = arith.truncf %850 : vector<8x32xf32> to vector<8x32xbf16>
    %c0_162 = arith.constant 0 : index
    %c0_163 = arith.constant 0 : index
    %852 = vector.load %arg10[%c0_162, %c0_163] : memref<32x16xbf16, #tpu.memory_space<vmem>>, vector<32x16xbf16>
    %cst_164 = arith.constant dense<0.000000e+00> : vector<8x16xf32>
    %853 = tpu.matmul %851, %852, %cst_164 {dimension_numbers = #tpu.dot_dimension_numbers<[1], [0], [0], [1], [0, 0, 1, 1], [], []>} : vector<8x32xbf16>, vector<32x16xbf16>, vector<8x16xf32> -> vector<8x16xf32>
    %c0_165 = arith.constant 0 : index
    %c0_166 = arith.constant 0 : index
    %854 = vector.load %arg11[%c0_165, %c0_166] : memref<1x16xf32, #tpu.memory_space<vmem>>, vector<1x16xf32>
    %855 = vector.broadcast %854 : vector<1x16xf32> to vector<8x16xf32>
    %856 = arith.addf %853, %855 : vector<8x16xf32>
    %857 = tpu.transpose %856, [1, 0] : vector<8x16xf32> -> vector<16x8xf32>
    %c0_167 = arith.constant 0 : index
    %c0_168 = arith.constant 0 : index
    %c0_169 = arith.constant 0 : index
    %858 = vector.load %arg12[%c0_167, %c0_168, %c0_169] : memref<1x16x8xf32, #tpu.memory_space<vmem>>, vector<1x16x8xf32>
    %859 = vector.shape_cast %858 : vector<1x16x8xf32> to vector<16x8xf32>
    %860 = vector.shape_cast %857 : vector<16x8xf32> to vector<1x16x8xf32>
    tpu.vector_store %arg12[%c0_167, %c0_168, %c0_169], %860 {strides = array<i32>} : memref<1x16x8xf32, #tpu.memory_space<vmem>>, vector<1x16x8xf32>,
    return
  }
  func.func @transform_0(%arg0: i32, %arg1: memref<2xi32, #tpu.memory_space<smem>>) -> (i32, i32, i32) {
    %c0_i32 = arith.constant 0 : i32
    %c0_i32_0 = arith.constant 0 : i32
    %c0_i32_1 = arith.constant 0 : i32
    return %arg0, %c0_i32, %c0_i32_0 : i32, i32, i32
  }
  func.func @transform_1(%arg0: i32, %arg1: memref<2xi32, #tpu.memory_space<smem>>) -> (i32, i32) {
    %c0_i32 = arith.constant 0 : i32
    %c0_i32_0 = arith.constant 0 : i32
    %c0_i32_1 = arith.constant 0 : i32
    return %c0_i32, %c0_i32_0 : i32, i32
  }
  func.func @transform_2(%arg0: i32, %arg1: memref<2xi32, #tpu.memory_space<smem>>) -> (i32, i32) {
    %c0_i32 = arith.constant 0 : i32
    %c0_i32_0 = arith.constant 0 : i32
    %c0_i32_1 = arith.constant 0 : i32
    return %c0_i32, %c0_i32_0 : i32, i32
  }
  func.func @transform_3(%arg0: i32, %arg1: memref<2xi32, #tpu.memory_space<smem>>) -> (i32, i32) {
    %c0_i32 = arith.constant 0 : i32
    %c0_i32_0 = arith.constant 0 : i32
    %c0_i32_1 = arith.constant 0 : i32
    return %c0_i32, %c0_i32_0 : i32, i32
  }
  func.func @transform_4(%arg0: i32, %arg1: memref<2xi32, #tpu.memory_space<smem>>) -> (i32, i32, i32) {
    %c0_i32 = arith.constant 0 : i32
    %c0_i32_0 = arith.constant 0 : i32
    %c0_i32_1 = arith.constant 0 : i32
    %c0_i32_2 = arith.constant 0 : i32
    return %c0_i32, %c0_i32_0, %c0_i32_1 : i32, i32, i32
  }
  func.func @transform_5(%arg0: i32, %arg1: memref<2xi32, #tpu.memory_space<smem>>) -> (i32, i32, i32) {
    %c0_i32 = arith.constant 0 : i32
    %c0_i32_0 = arith.constant 0 : i32
    %c0_i32_1 = arith.constant 0 : i32
    %c0_i32_2 = arith.constant 0 : i32
    return %c0_i32, %c0_i32_0, %c0_i32_1 : i32, i32, i32
  }
  func.func @transform_6(%arg0: i32, %arg1: memref<2xi32, #tpu.memory_space<smem>>) -> (i32, i32, i32) {
    %c0_i32 = arith.constant 0 : i32
    %c0_i32_0 = arith.constant 0 : i32
    %c0_i32_1 = arith.constant 0 : i32
    %c0_i32_2 = arith.constant 0 : i32
    return %c0_i32, %c0_i32_0, %c0_i32_1 : i32, i32, i32
  }
  func.func @transform_7(%arg0: i32, %arg1: memref<2xi32, #tpu.memory_space<smem>>) -> (i32, i32, i32) {
    %c0_i32 = arith.constant 0 : i32
    %c0_i32_0 = arith.constant 0 : i32
    %c0_i32_1 = arith.constant 0 : i32
    %c0_i32_2 = arith.constant 0 : i32
    return %c0_i32, %c0_i32_0, %c0_i32_1 : i32, i32, i32
  }
  func.func @transform_8(%arg0: i32, %arg1: memref<2xi32, #tpu.memory_space<smem>>) -> (i32, i32) {
    %c0_i32 = arith.constant 0 : i32
    %c0_i32_0 = arith.constant 0 : i32
    %c0_i32_1 = arith.constant 0 : i32
    return %c0_i32, %c0_i32_0 : i32, i32
  }
  func.func @transform_9(%arg0: i32, %arg1: memref<2xi32, #tpu.memory_space<smem>>) -> (i32, i32) {
    %c0_i32 = arith.constant 0 : i32
    %c0_i32_0 = arith.constant 0 : i32
    %c0_i32_1 = arith.constant 0 : i32
    return %c0_i32, %c0_i32_0 : i32, i32
  }
  func.func @transform_10(%arg0: i32, %arg1: memref<2xi32, #tpu.memory_space<smem>>) -> (i32, i32, i32) {
    %c0_i32 = arith.constant 0 : i32
    %c0_i32_0 = arith.constant 0 : i32
    %c0_i32_1 = arith.constant 0 : i32
    return %arg0, %c0_i32, %c0_i32_0 : i32, i32, i32
  }
}

</mosaic_0001>

<bundles_post_ra>
// kernel: squeezeformer_encoder.1
= control target key start
LH: loop header
LB: loop body
LE: loop exit
PB: predicated region body
PF: predicated region fallthrough
CT: control target
= control target key end

     0   :  { %s4852_s0 = inlined_call_operand.vmem [shape: s32[2], index: 0, kind: input, shape index: {}]   ;;  %s4853_s1 = inlined_call_operand.vmem [shape: f32[2,16,8], index: 1, kind: input, shape index: {}]   ;;  %s4854_s2 = inlined_call_operand.vmem [shape: f32[8,32], index: 2, kind: input, shape index: {}]   ;;  %s4855_s3 = inlined_call_operand.vmem [shape: bf16[16,32], index: 3, kind: input, shape index: {}]   ;;  %s4856_s4 = inlined_call_operand.vmem [shape: f32[3,32], index: 4, kind: input, shape index: {}]   ;;  %s4857_s5 = inlined_call_operand.vmem [shape: bf16[2,32,480], index: 5, kind: input, shape index: {}]   ;;  %s4858_s6 = inlined_call_operand.hbm [shape: bf16[2,128,64], index: 6, kind: input, shape index: {}]   ;;  %s4859_s7 = inlined_call_operand.vmem [shape: f32[2,4,128], index: 7, kind: input, shape index: {}]   ;;  %s4860_s8 = inlined_call_operand.hbm [shape: f32[2,26,32], index: 8, kind: input, shape index: {}]   ;;  %s4861_s9 = inlined_call_operand.vmem [shape: bf16[32,16], index: 9, kind: input, shape index: {}]   ;;  %s4862_s10 = inlined_call_operand.vmem [shape: f32[1,16], index: 10, kind: input, shape index: {}]   ;;  %s4863_s11 = inlined_call_operand.vmem [shape: f32[2,16,8], index: 11, kind: output, shape index: {}]  }
   0x1   :  { %s16_s19 = sshll.u32 %s4852_s0, 4  ;;  %s17_s19 = int_to_ptr.vmem [resolvable:$true] %s16_s19 }
   0x2   :  { %s3859_s20 = scalar_lea.vmem %s17_s19, 16  ;;  %p3864_p1 = scmp.lt.s32.totalorder %s17_s19, %s17_s19 }
   0x3   :  { %p3860_p0 = scmp.ne.s32.totalorder %s17_s19, %s3859_s20  ;;  %p3865_p2 = scmp.lt.s32.totalorder %s3859_s20, %s3859_s20 }
   0x5   :  { %p3866_p3 = por %p3865_p2, %p3864_p1 }
   0x7   :  { %p3867_p4 = pnand %p3866_p3, %p3860_p0 }
   0x9   :  { %3870 = shalt.err (!%p3867_p4)  }
   0xa   :  { %s3941_s21 = smov [#allocation3]  }
   0xb   :  { %19 = dma.vmem_to_smem %s17_s19, 16, %s3941_s21, [#allocation2] }
   0xc   :  { %3927 = dma.done.wait [#allocation2], 16 }
   0xd   :  { %3928 = vsyncadd [#allocation2], 4294967280 }
   0xe   :  { %21 = sfence }
   0xf   :  { %22 = vsyncpa [#allocation5], 0 }
  0x10   :  { %23 = vsyncpa [#allocation7], 0  ;;  %s4022_s22 = smov 0  }
  0x11 LB: > { %s3942_s0 = smov [#allocation4]   ;;  %s4028_s24 = sadd.s32 4294967295, %s3939_s22   ;;  %s3939_s22 = sphi %s4022_s22, %s29_s22  }
  0x12   : > { %s299_s23 = sshll.u32 %s3942_s0, 4  ;;  %p3193_p5 = scmp.ge.s32.totalorder %s3939_s22, 1  ;;  %s300_s23 = int_to_ptr.vmem [resolvable:$true] %s299_s23 }
  0x13   : > { %p275_p6 = scmp.lt.s32.totalorder %s3939_s22, 3  ;;  %p3704_p8 = scmp.eq.s32.totalorder %s4028_s24, 0 }
  0x14   : > { %s3943_s26 = smov [#allocation6]   ;;  %s3882_s29 = scalar_lea.vmem %s300_s23, 2048 }
  0x15   : > { %p4032_p7 = pnand %p3193_p5, %p275_p6  ;;  %s315_s27 = sshll.u32 %s3943_s26, 4  ;;  %s316_s27 = int_to_ptr.vmem [resolvable:$true] %s315_s27 }
  0x16   : > { %p3883_p12 = scmp.ne.s32.totalorder %s300_s23, %s3882_s29  ;;  %p3890_p1 = scmp.lt.s32.totalorder %s300_s23, %s300_s23 }
  0x17   : > { %p3697_p9 = pneg %p4032_p7  ;;  %p3891_p2 = scmp.lt.s32.totalorder %s3882_s29, %s3882_s29 }
  0x19   : > { %p4041_p10 = pnand %p3704_p8, %p3697_p9  ;;  %p3892_p3 = por %p3891_p2, %p3890_p1 }
  0x1b   : > { %p3873_p11 = pneg %p4041_p10 }
  0x1d   : > { %p3885_p13 = pnand %p3883_p12, %p3873_p11 }
  0x1f   : > { %p3886_p0 = pneg %p3885_p13 }
  0x21   : > { %p3893_p4 = pnand %p3892_p3, %p3886_p0 }
  0x23   : > { %3896 = shalt.err (!%p3893_p4)
}
  0x24   : > { %s3944_s30 = smov 64   ;;  %s3945_s12 = smov 4  }
  0x25   : > { %3700 = dma.hbm_to_vmem [thread:$0]  (!%p4041_p10), %s4858_s6, 2048, %s300_s23, [#allocation5], %s3944_s30, %s3944_s30, %s3945_s12  }
  0x26   : > { %s3908_s15 = scalar_lea.vmem %s316_s27, 1024  ;;  %p3916_p12 = scmp.lt.s32.totalorder %s316_s27, %s316_s27 }
  0x27   : > { %p3909_p5 = scmp.ne.s32.totalorder %s316_s27, %s3908_s15  ;;  %p3917_p13 = scmp.lt.s32.totalorder %s3908_s15, %s3908_s15 }
  0x29   : > { %p3911_p6 = pnand %p3909_p5, %p3873_p11  ;;  %p3918_p1 = por %p3917_p13, %p3916_p12 }
  0x2b   : > { %p3912_p9 = pneg %p3911_p6 }
  0x2d   : > { %p3919_p0 = pnand %p3918_p1, %p3912_p9 }
  0x2f   : > { %3922 = shalt.err (!%p3919_p0)
}
  0x30   : > { %s3946_s16 = smov 128   ;;  %s3947_s17 = smov 8  }
  0x31   : > { %3703 = dma.hbm_to_vmem [thread:$0]  (!%p4041_p10), %s4860_s8, 1024, %s316_s27, [#allocation7], %s3946_s16, %s3946_s16, %s3947_s17  }
  0x32   : > { %345 = sbr.rel (%p4032_p7) target bundleno = 9364 (0x2494), region = 60 }
  0x37   : > { %3930 = dma.done.wait (%p3704_p8), [#allocation5], 2048  }
  0x38   : > { %3932 = vsyncadd (%p3704_p8), [#allocation5], 4294965248 }
  0x39   : > { %3934 = dma.done.wait (%p3704_p8), [#allocation7], 1024  }
  0x3a   : > { %3936 = vsyncadd (%p3704_p8), [#allocation7], 4294966272  ;;  %p387_p11 = scmp.lt.s32.totalorder %s4028_s24, 1  ;;  %v3948_v0 = vmov 0.0   ;;  %vm3949_vm0 = vmmov 0   ;;  %v3734_v3 = vld [vmem:[%s4855_s3] sm:$0xff]   ;;  %v521_v26 = vlaneseq }
  0x3b   : > { %3403 = vmatprep.subr.bf16.mxu0 %v3948_v0  ;;  %3423 = vmatprep.subr.bf16.mxu1 %v3948_v0  ;;  %vm447_vm1 = vcmask 130048   ;;  %v3204_v6 = vld [vmem:[%s4856_s4] ss:$0 sm:$0xff]  ;;  %vm496_vm2 = vcmask 261120   ;;  %v3207_v30 = vld [vmem:[%s4856_s4 + $0x1] ss:$0 sm:$0xff] }
  0x3c   : > { %s4077_s20 = scalar_select %p387_p11, %s4028_s24, 1  ;;  %3405 = vmatprep.mubr.msk.bf16.mxu0 %vm3949_vm0, %v3948_v0  ;;  %3425 = vmatprep.mubr.msk.bf16.mxu1 %vm3949_vm0, %v3948_v0  ;;  %v492_v10 = vld [vmem:[%s4854_s2] sm:$0xff]  ;;  %v4119_v27 = vshrl.u32 %v521_v26, 7  ;;  %vm645_vm3 = vcmask 64512   ;;  %vm906_vm7 = vcmask 1043456   ;;  %vm1108_vm8 = vcmask 195584  }
  0x3d   : > { %3404 = vmatpush3.bf16.msra.mxu0 %v3734_v3  ;;  %v4107_v21 = vld [vmem:[%s4857_s5 + $0x20] ss:$16 sps:$4 sm:$0xff]   ;;  %s3950_s26 = smov 112   ;;  %s3951_s27 = smov 120  }
  0x3e   : > { %s3292_s21 = sshll.u32 %s4077_s20, 4  ;;  %3409 = vmatprep.subr.bf16.mxu0 %v3948_v0  ;;  %v4113_v22 = vld [vmem:[%s4857_s5] ss:$16 sps:$4 sm:$0xff]   ;;  %v4122_v28 = vsub.s32 0, %v4119_v27  ;;  %v4130_v33 = vsub.s32 1, %v4119_v27  ;;  %s3952_s28 = smov 104  }
  0x3f   : > { %s391_s25 = scalar_lea.vmem %s4853_s1, %s3292_s21  ;;  %v4127_v31 = vld [vmem:[#allocation6] sm:$0xff]  ;;  %s3953_s29 = smov 96  }
  0x40   : > { %v399_v1 = vld [vmem:[%s391_s25] sm:$0xff]  ;;  %v400_v2 = vld [vmem:[%s391_s25 + $0x8] sm:$0xff]  ;;  %v561_v36 = vrot.slane %v4127_v31, %v4122_v28  ;;  %v566_v38 = vrot.slane %v4127_v31, %v4130_v33  ;;  %s398_s30 = sld [smem:[#allocation3 + %s4028_s24]]  ;;  %s3954_s24 = smov 64  }
  0x41   : > { %401 = vxpose.xlu0.b32.start [1/2] (short) (narrow) %v399_v1, 8  ;;  %v3208_v34 = vld [vmem:[%s4856_s4 + $0x2] ss:$0 sm:$0xff]  ;;  %v524_v1 = vand.u32 127, %v521_v26  ;;  %s3955_s12 = smov 32   ;;  %s3956_s13 = smov 8  }
  0x42   : > { %v4148_v42 = vld [vmem:[%s4859_s7] sm:$0xf]  ;;  %s3957_s14 = smov 16   ;;  %s3958_s15 = smov 24  }
  0x43   : > { %v572_v43 = vrot.slane %v4148_v42, %v4122_v28 }
  0x45   : > { %402 = vxpose.xlu0.b32.end [2/2] (short) (narrow) %v400_v2, 8 }
  0x46   : > { %v525_v2 = vstv %s398_s30 }
  0x47   : > { %vm4198_vm4 = vcmp.lt.s32.totalorder %v4119_v27, %v525_v2  ;;  %vm527_vm5 = vcmp.lt.s32.totalorder %v524_v1, %v525_v2 }
  0x48   : > { %vm4204_vm6 = vmand %vm4198_vm4, %vm527_vm5 }
  0xbd   : > { %v417_v4 = vpop.trf.xlu0 }
  0xbe   : > { %v433_v5 = vpack.c.bf16 %v417_v4, %v417_v4 }
  0xc0   : > { %3406 = vmatmul.mubr.msk.bf16.vlgmr.msra.gmra.mxu0 %vm447_vm1, %v433_v5 }
  0xc1   : > { %3413 = vmatprep.mubr.msk.bf16.mxu0 %vm3949_vm0, %v3948_v0  ;;  %3410 = vmatpush3.bf16.msra.mxu0 %v4107_v21 }
  0xc2   : > { %3411 = vmatprep.subr.bf16.mxu0 %v3948_v0 }
  0xc5   : > { %3412 = vmatpush3.bf16.msra.mxu0 %v4113_v22 }
  0xc6   : > { %3417 = vmatprep.subr.bf16.mxu0 %v3948_v0 }
 0x180   : > { %v485_v7 = vpop.f32.mrf.mxu0 }
 0x181   : > { %v486_v8 = vadd.f32 %v3204_v6, %v485_v7 }
 0x182   : > { %v3407_v9 = vpop.f32.mrf.mxu0 }
 0x183   : > { %v491_v11 = vmul.f32 5.656854, %v486_v8 }
 0x184   : > { %v488_v12 = vpop.f32.mrf.mxu0 }
 0x185   : > { %v493_v13 = vadd.f32 %v492_v10, %v491_v11 }
 0x186   : > { %v3408_v14 = vpop.f32.mrf.mxu0 }
 0x187   : > { %v497_v15 = vsel %vm496_vm2, %v493_v13, 0.0 }
 0x188   : > { %498 = vadd.xlane.f32.xlu1 %v497_v15 }
 0x211   : > { %v499_v16 = vpop.xlane.xlu1 %498 }
 0x212   : > { %v501_v17 = vmul.f32 0.03125, %v499_v16 }
 0x214   : > { %v502_v18 = vsub.f32 %v493_v13, %v501_v17 }
 0x216   : > { %v503_v19 = vmul.f32 %v502_v18, %v502_v18 }
 0x218   : > { %v504_v20 = vsel %vm496_vm2, %v503_v19, 0.0 }
 0x219   : > { %505 = vadd.xlane.f32.xlu1 %v504_v20 }
 0x2a2   : > { %v506_v23 = vpop.xlane.xlu1 %505 }
 0x2a3   : > { %v507_v24 = vmul.f32 0.03125, %v506_v23 }
 0x2a5   : > { %v508_v25 = vadd.f32 1e-05, %v507_v24 }
 0x2a7   : > { %3777 = vrsqrt.f32 %v508_v25 }
 0x2b4   : > { %v3778_v29 = vpop.eup %3777 }
 0x2b5   : > { %v510_v32 = vmul.f32 %v3778_v29, %v502_v18 }
 0x2b7   : > { %v515_v35 = vmul.f32 %v3207_v30, %v510_v32 }
 0x2b9   : > { %v4137_v37 = vadd.f32 %v3208_v34, %v515_v35 }
 0x2bb   : > { %v562_v39 = vmul.f32 %v561_v36, %v4137_v37 }
 0x2bd   : > { %v567_v40 = vadd.f32 %v566_v38, %v562_v39 }
 0x2bf   : > { %v568_v41 = vpack.c.bf16 %v567_v40, %v567_v40 }
 0x2c1   : > { %3414 = vmatmul.mubr.msk.bf16.vlgmr.msra.gmra.mxu0 %vm496_vm2, %v568_v41 }
 0x2c2   : > { %3419 = vmatprep.mubr.msk.bf16.mxu0 %vm3949_vm0, %v3948_v0 }
 0x381   : > { %v622_v44 = vpop.f32.mrf.mxu0 }
 0x382   : > { %v623_v45 = vadd.f32 %v622_v44, %v572_v43 }
 0x383   : > { %v3415_v46 = vpop.f32.mrf.mxu0 }
 0x384   : > { %632 = vrot.lane.b32.xlu1 %v623_v45, %s3950_s26  ;;  %629 = vrot.lane.b32.xlu0 %v623_v45, %s3951_s27  ;;  %v4155_v49 = vpack.c.bf16 %v623_v45, %v623_v45 }
 0x385   : > { %v625_v47 = vpop.f32.mrf.mxu0 }
 0x387   : > { %v3416_v48 = vpop.f32.mrf.mxu0 }
 0x388   : > { %635 = vrot.lane.b32.xlu1 %v623_v45, %s3952_s28 }
 0x38c   : > { %643 = vrot.lane.b32.xlu1 %v4155_v49, %s3953_s29 }
 0x3f6   : > { %v633_v50 = vpop.permute.xlu1 %632  ;;  %v630_v51 = vpop.permute.xlu0 %629 }
 0x3f7   : > { %v4159_v52 = vpack.c.bf16 %v630_v51, %v630_v51  ;;  %v4163_v54 = vpack.c.bf16 %v633_v50, %v633_v50 }
 0x3f9   : > { %693 = vrot.lane.b32.xlu1 %v4159_v52, %s3953_s29 }
 0x3fa   : > { %v636_v53 = vpop.permute.xlu1 %635 }
 0x3fb   : > { %v4167_v56 = vpack.c.bf16 %v636_v53, %v636_v53 }
 0x3fd   : > { %742 = vrot.lane.b32.xlu1 %v4163_v54, %s3953_s29 }
 0x3fe   : > { %v644_v55 = vpop.permute.xlu1 %643 }
 0x3ff   : > { %v650_v57 = vsel %vm645_vm3, %v644_v55, 0 }
 0x400   : > { %3418 = vmatpush3.bf16.xpose.msra.mxu0 %v650_v57 }
 0x401   : > { %791 = vrot.lane.b32.xlu1 %v4167_v56, %s3953_s29  ;;  %3429 = vmatprep.subr.bf16.mxu0 %v3948_v0 }
 0x407   : > { %3420 = vmatmul.mubr.msk.bf16.vlgmr.msra.gmra.mxu0 %vm645_vm3, %v4155_v49 }
 0x408   : > { %3431 = vmatprep.mubr.msk.bf16.mxu0 %vm3949_vm0, %v3948_v0 }
 0x46b   : > { %v694_v58 = vpop.permute.xlu1 %693 }
 0x46c   : > { %v699_v59 = vsel %vm645_vm3, %v694_v58, 0 }
 0x46d   : > { %3424 = vmatpush3.bf16.xpose.msra.mxu1 %v699_v59 }
 0x46e   : > { %3435 = vmatprep.subr.bf16.mxu1 %v3948_v0 }
 0x46f   : > { %v743_v60 = vpop.permute.xlu1 %742 }
 0x470   : > { %v748_v61 = vsel %vm645_vm3, %v743_v60, 0 }
 0x471   : > { %3430 = vmatpush3.bf16.xpose.msra.mxu0 %v748_v61 }
 0x472   : > { %3441 = vmatprep.subr.bf16.mxu0 %v3948_v0 }
 0x473   : > { %v792_v62 = vpop.permute.xlu1 %791 }
 0x474   : > { %v797_v63 = vsel %vm645_vm3, %v792_v62, 0  ;;  %3426 = vmatmul.mubr.msk.bf16.vlgmr.msra.gmra.mxu1 %vm645_vm3, %v4159_v52 }
 0x475   : > { %3436 = vmatpush3.bf16.xpose.msra.mxu1 %v797_v63  ;;  %3437 = vmatprep.mubr.msk.bf16.mxu1 %vm3949_vm0, %v3948_v0 }
 0x476   : > { %3447 = vmatprep.subr.bf16.mxu1 %v3948_v0 }
 0x478   : > { %3432 = vmatmul.mubr.msk.bf16.vlgmr.msra.gmra.mxu0 %vm645_vm3, %v4163_v54 }
 0x479   : > { %3443 = vmatprep.mubr.msk.bf16.mxu0 %vm3949_vm0, %v3948_v0 }
 0x47c   : > { %3438 = vmatmul.mubr.msk.bf16.vlgmr.msra.gmra.mxu1 %vm645_vm3, %v4167_v56 }
 0x47d   : > { %3449 = vmatprep.mubr.msk.bf16.mxu1 %vm3949_vm0, %v3948_v0 }
 0x4c7   : > { %v686_v4 = vpop.f32.mrf.mxu0 }
 0x4c8   : > { %v839_v6 = vmul.f32 0.35355338, %v686_v4 }
 0x4c9   : > { %v3421_v7 = vpop.f32.mrf.mxu0 }
 0x4ca   : > { %v845_v8 = vsel %vm4204_vm6, %v839_v6, -10000.0 }
 0x4cb   : > { %v689_v9 = vpop.f32.mrf.mxu0  ;;  %v849_v10 = vsel %vm645_vm3, %v845_v8, -inf }
 0x4cc   : > { %850 = vmax.xlane.f32.xlu1 %v849_v10 }
 0x4cd   : > { %v3422_v11 = vpop.f32.mrf.mxu0 }
 0x534   : > { %v735_v12 = vpop.f32.mrf.mxu1 }
 0x535   : > { %v840_v13 = vmul.f32 0.35355338, %v735_v12 }
 0x536   : > { %v3427_v14 = vpop.f32.mrf.mxu1 }
 0x537   : > { %v846_v15 = vsel %vm4204_vm6, %v840_v13, -10000.0 }
 0x538   : > { %v738_v16 = vpop.f32.mrf.mxu1  ;;  %v784_v17 = vpop.f32.mrf.mxu0  ;;  %v852_v18 = vsel %vm645_vm3, %v846_v15, -inf }
 0x539   : > { %v841_v19 = vmul.f32 0.35355338, %v784_v17  ;;  %853 = vmax.xlane.f32.xlu0 %v852_v18 }
 0x53a   : > { %v3428_v20 = vpop.f32.mrf.mxu1  ;;  %v3433_v23 = vpop.f32.mrf.mxu0 }
 0x53b   : > { %v847_v24 = vsel %vm4204_vm6, %v841_v19, -10000.0 }
 0x53c   : > { %v787_v25 = vpop.f32.mrf.mxu0  ;;  %v833_v26 = vpop.f32.mrf.mxu1  ;;  %v855_v29 = vsel %vm645_vm3, %v847_v24, -inf }
 0x53d   : > { %v842_v30 = vmul.f32 0.35355338, %v833_v26  ;;  %856 = vmax.xlane.f32.xlu0 %v855_v29 }
 0x53e   : > { %v3434_v32 = vpop.f32.mrf.mxu0  ;;  %v3439_v34 = vpop.f32.mrf.mxu1 }
 0x53f   : > { %v848_v35 = vsel %vm4204_vm6, %v842_v30, -10000.0 }
 0x540   : > { %v836_v36 = vpop.f32.mrf.mxu1  ;;  %v858_v38 = vsel %vm645_vm3, %v848_v35, -inf }
 0x541   : > { %859 = vmax.xlane.f32.xlu1 %v858_v38 }
 0x542   : > { %v3440_v39 = vpop.f32.mrf.mxu1 }
 0x552   : > { %950 = vrot.lane.b32.xlu1 %v4159_v52, %s3954_s24 }
 0x555   : > { %v851_v40 = vpop.xlane.xlu1 %850 }
 0x556   : > { %v861_v41 = vsub.f32 %v845_v8, %v851_v40 }
 0x558   : > { %v865_v43 = vmul.f32 1.442695, %v861_v41 }
 0x55a   : > { %3779 = vpow2.f32 %v865_v43 }
 0x567   : > { %v3780_v44 = vpop.eup %3779 }
 0x568   : > { %v873_v45 = vsel %vm645_vm3, %v3780_v44, 0.0 }
 0x569   : > { %874 = vadd.xlane.f32.xlu0 %v873_v45 }
 0x57f   : > { %901 = vrot.lane.b32.xlu0 %v4155_v49, %s3954_s24 }
 0x5c2   : > { %v854_v46 = vpop.xlane.xlu0 %853 }
 0x5c3   : > { %v862_v47 = vsub.f32 %v846_v15, %v854_v46 }
 0x5c5   : > { %v867_v48 = vmul.f32 1.442695, %v862_v47 }
 0x5c6   : > { %v857_v50 = vpop.xlane.xlu0 %856 }
 0x5c7   : > { %3781 = vpow2.f32 %v867_v48  ;;  %v863_v51 = vsub.f32 %v847_v24, %v857_v50 }
 0x5c9   : > { %v869_v53 = vmul.f32 1.442695, %v863_v51 }
 0x5ca   : > { %v860_v55 = vpop.xlane.xlu1 %859 }
 0x5cb   : > { %3783 = vpow2.f32 %v869_v53  ;;  %v864_v52 = vsub.f32 %v848_v35, %v860_v55 }
 0x5cd   : > { %v871_v57 = vmul.f32 1.442695, %v864_v52 }
 0x5ce   : > { %v951_v58 = vpop.permute.xlu1 %950 }
 0x5cf   : > { %3785 = vpow2.f32 %v871_v57  ;;  %v956_v59 = vsel %vm906_vm7, %v951_v58, 0 }
 0x5d0   : > { %3448 = vmatpush3.bf16.msra.mxu1 %v956_v59 }
 0x5d1   : > { %3459 = vmatprep.subr.bf16.mxu1 %v3948_v0 }
 0x5d4   : > { %v3782_v49 = vpop.eup %3781 }
 0x5d5   : > { %v876_v60 = vsel %vm645_vm3, %v3782_v49, 0.0 }
 0x5d6   : > { %877 = vadd.xlane.f32.xlu1 %v876_v60 }
 0x5d8   : > { %v3784_v61 = vpop.eup %3783 }
 0x5d9   : > { %v879_v62 = vsel %vm645_vm3, %v3784_v61, 0.0 }
 0x5da   : > { %880 = vadd.xlane.f32.xlu0 %v879_v62 }
 0x5dc   : > { %v3786_v63 = vpop.eup %3785 }
 0x5dd   : > { %v882_v1 = vsel %vm645_vm3, %v3786_v63, 0.0 }
 0x5de   : > { %883 = vadd.xlane.f32.xlu1 %v882_v1 }
 0x5ef   : > { %998 = vrot.lane.b32.xlu1 %v4163_v54, %s3954_s24 }
 0x5f0   : > { %1046 = vrot.lane.b32.xlu0 %v4167_v56, %s3954_s24 }
 0x5f2   : > { %v875_v2 = vpop.xlane.xlu0 %874 }
 0x5f3   : > { %3787 = vrcp.f32 %v875_v2  ;;  %1117 = vrot.lane.b32.xlu1 %v4107_v21, %s3955_s12 }
 0x5f6   : > { %v902_v4 = vpop.permute.xlu0 %901 }
 0x5f7   : > { %v908_v6 = vsel %vm906_vm7, %v902_v4, 0 }
 0x5f8   : > { %3442 = vmatpush3.bf16.msra.mxu0 %v908_v6 }
 0x5f9   : > { %3453 = vmatprep.subr.bf16.mxu0 %v3948_v0 }
 0x600   : > { %v3788_v7 = vpop.eup %3787 }
 0x601   : > { %v886_v8 = vmul.f32 %v3788_v7, %v3780_v44 }
 0x603   : > { %v893_v9 = vsel %vm4204_vm6, %v886_v8, 0.0 }
 0x604   : > { %v897_v10 = vpack.c.bf16 %v893_v9, %v893_v9 }
 0x606   : > { %3444 = vmatmul.mubr.msk.bf16.vlgmr.msra.gmra.mxu0 %vm645_vm3, %v897_v10 }
 0x607   : > { %3455 = vmatprep.mubr.msk.bf16.mxu0 %vm3949_vm0, %v3948_v0 }
 0x65f   : > { %v878_v54 = vpop.xlane.xlu1 %877 }
 0x660   : > { %3789 = vrcp.f32 %v878_v54 }
 0x663   : > { %v881_v56 = vpop.xlane.xlu0 %880 }
 0x664   : > { %3791 = vrcp.f32 %v881_v56 }
 0x667   : > { %v884_v11 = vpop.xlane.xlu1 %883  ;;  %v1047_v16 = vpop.permute.xlu0 %1046 }
 0x668   : > { %3793 = vrcp.f32 %v884_v11  ;;  %v1052_v23 = vsel %vm906_vm7, %v1047_v16, 0  ;;  %v4292_v16 = vsub.s32 3, %v4119_v27 }
 0x66b   : > { %v999_v12 = vpop.permute.xlu1 %998 }
 0x66c   : > { %v1004_v13 = vsel %vm906_vm7, %v999_v12, 0  ;;  %v3739_v12 = vld [vmem:[%s4857_s5 + $0x24] ss:$16 sps:$4 sm:$0xff]  }
 0x66d   : > { %v3790_v14 = vpop.eup %3789  ;;  %3454 = vmatpush3.bf16.msra.mxu0 %v1004_v13 }
 0x66e   : > { %v888_v15 = vmul.f32 %v3790_v14, %v3782_v49  ;;  %3465 = vmatprep.subr.bf16.mxu0 %v3948_v0 }
 0x66f   : > { %v1118_v39 = vpop.permute.xlu1 %1117 }
 0x670   : > { %v894_v17 = vsel %vm4204_vm6, %v888_v15, 0.0 }
 0x671   : > { %v3792_v18 = vpop.eup %3791  ;;  %v898_v19 = vpack.c.bf16 %v894_v17, %v894_v17  ;;  %v4295_v17 = vsub.s32 4, %v4119_v27 }
 0x672   : > { %v890_v20 = vmul.f32 %v3792_v18, %v3784_v61  ;;  %v1181_v18 = vrot.slane %v4127_v31, %v4292_v16 }
 0x673   : > { %3450 = vmatmul.mubr.msk.bf16.vlgmr.msra.gmra.mxu1 %vm645_vm3, %v898_v19  ;;  %v4300_v19 = vsub.s32 5, %v4119_v27 }
 0x674   : > { %3460 = vmatpush3.bf16.msra.mxu1 %v1052_v23  ;;  %v895_v24 = vsel %vm4204_vm6, %v890_v20, 0.0  ;;  %3461 = vmatprep.mubr.msk.bf16.mxu1 %vm3949_vm0, %v3948_v0 }
 0x675   : > { %v3794_v25 = vpop.eup %3793  ;;  %v899_v26 = vpack.c.bf16 %v895_v24, %v895_v24  ;;  %3473 = vmatprep.subr.bf16.mxu1 %v3948_v0  ;;  %v1186_v24 = vrot.slane %v4127_v31, %v4295_v17 }
 0x676   : > { %v892_v29 = vmul.f32 %v3794_v25, %v3786_v63  ;;  %v4305_v25 = vsub.s32 6, %v4119_v27 }
 0x677   : > { %3456 = vmatmul.mubr.msk.bf16.vlgmr.msra.gmra.mxu0 %vm645_vm3, %v899_v26 }
 0x678   : > { %v896_v30 = vsel %vm4204_vm6, %v892_v29, 0.0  ;;  %3469 = vmatprep.mubr.msk.bf16.mxu0 %vm3949_vm0, %v3948_v0  ;;  %3466 = vmatpush3.bf16.msra.mxu0 %v1118_v39  ;;  %v1191_v29 = vrot.slane %v4127_v31, %v4300_v19  ;;  %v4318_v39 = vld [vmem:[#allocation4 + $0x30] sm:$0xff]  }
 0x679   : > { %v900_v32 = vpack.c.bf16 %v896_v30, %v896_v30  ;;  %3467 = vmatprep.subr.bf16.mxu0 %v3948_v0 }
 0x67b   : > { %3462 = vmatmul.mubr.msk.bf16.vlgmr.msra.gmra.mxu1 %vm645_vm3, %v900_v32  ;;  %v1196_v32 = vrot.slane %v4127_v31, %v4305_v25 }
 0x67c   : > { %3477 = vmatprep.mubr.msk.bf16.mxu1 %vm3949_vm0, %v3948_v0  ;;  %3474 = vmatpush3.bf16.msra.mxu1 %v3739_v12 }
 0x67d   : > { %3475 = vmatprep.subr.bf16.mxu1 %v3948_v0 }
 0x6c6   : > { %v944_v34 = vpop.f32.mrf.mxu0 }
 0x6c8   : > { %v3445_v35 = vpop.f32.mrf.mxu0 }
 0x6ca   : > { %v947_v36 = vpop.f32.mrf.mxu0 }
 0x6cc   : > { %v3446_v38 = vpop.f32.mrf.mxu0 }
 0x6cd   : > { %v4314_v38 = vld [vmem:[#allocation4 + $0x38] sm:$0xff]  }
 0x733   : > { %v992_v40 = vpop.f32.mrf.mxu1 }
 0x734   : > { %1095 = vrot.lane.b32.xlu0 %v992_v40, %s3956_s13  ;;  %v4322_v40 = vld [vmem:[#allocation4 + $0x28] sm:$0xff]  }
 0x735   : > { %v3451_v41 = vpop.f32.mrf.mxu1 }
 0x736   : > { %v4326_v41 = vld [vmem:[#allocation4 + $0x20] sm:$0xff]  }
 0x737   : > { %v995_v43 = vpop.f32.mrf.mxu1  ;;  %v1040_v44 = vpop.f32.mrf.mxu0 }
 0x738   : > { %1099 = vrot.lane.b32.xlu1 %v1040_v44, %s3957_s14  ;;  %v4330_v43 = vld [vmem:[#allocation4 + $0x18] sm:$0xff]   ;;  %v4334_v44 = vld [vmem:[#allocation4 + $0x10] sm:$0xff]  }
 0x739   : > { %v3452_v45 = vpop.f32.mrf.mxu1  ;;  %v3457_v21 = vpop.f32.mrf.mxu0 }
 0x73a   : > { %v4338_v45 = vld [vmem:[#allocation4 + $0x8] sm:$0xff]   ;;  %v4342_v21 = vld [vmem:[#allocation4] sm:$0xff]  }
 0x73b   : > { %v1043_v46 = vpop.f32.mrf.mxu0  ;;  %v1088_v47 = vpop.f32.mrf.mxu1 }
 0x73c   : > { %1103 = vrot.lane.b32.xlu0 %v1088_v47, %s3958_s15  ;;  %1115 = vrot.lane.b32.xlu1 %v4113_v22, %s3955_s12  ;;  %v4276_v22 = vsub.s32 2, %v4119_v27  ;;  %v1202_v46 = vrot.slane %v4148_v42, %v4130_v33 }
 0x73d   : > { %v3458_v48 = vpop.f32.mrf.mxu0  ;;  %v3463_v50 = vpop.f32.mrf.mxu1 }
 0x73e   : > { %v1114_v62 = vrot.slane %v4127_v31, %v4276_v22 }
 0x73f   : > { %v1091_v51 = vpop.f32.mrf.mxu1 }
 0x741   : > { %v3464_v53 = vpop.f32.mrf.mxu1 }
 0x7a6   : > { %v1096_v55 = vpop.permute.xlu0 %1095 }
 0x7a7   : > { %v1106_v57 = vsel %vm645_vm3, %v944_v34, %v1096_v55 }
 0x7aa   : > { %v1100_v52 = vpop.permute.xlu1 %1099 }
 0x7ab   : > { %v1107_v58 = vsel %vm447_vm1, %v1106_v57, %v1100_v52 }
 0x7ae   : > { %v1104_v59 = vpop.permute.xlu0 %1103  ;;  %v1116_v49 = vpop.permute.xlu1 %1115 }
 0x7af   : > { %v1109_v60 = vsel %vm1108_vm8, %v1107_v58, %v1104_v59  ;;  %3468 = vmatpush3.bf16.msra.mxu0 %v1116_v49 }
 0x7b0   : > { %v1110_v61 = vpack.c.bf16 %v1109_v60, %v1109_v60  ;;  %3481 = vmatprep.subr.bf16.mxu0 %v3948_v0  ;;  %v4351_v60 = vsub.s32 7, %v4119_v27 }
 0x7b2   : > { %3470 = vmatmul.mubr.msk.bf16.vlgmr.msra.gmra.mxu0 %vm496_vm2, %v1110_v61  ;;  %v1265_v61 = vrot.slane %v4127_v31, %v4351_v60  ;;  %v4360_v31 = vld [vmem:[%s4857_s5 + $0x28] ss:$16 sps:$4 sm:$0xff]  }
 0x7b3   : > { %3497 = vmatprep.mubr.msk.bf16.mxu0 %vm3949_vm0, %v3948_v0  ;;  %3482 = vmatpush3.bf16.msra.mxu0 %v4314_v38 }
 0x7b4   : > { %3483 = vmatprep.subr.bf16.mxu0 %v3948_v0 }
 0x7b7   : > { %3484 = vmatpush3.bf16.msra.mxu0 %v4318_v39 }
 0x7b8   : > { %3485 = vmatprep.subr.bf16.mxu0 %v3948_v0 }
 0x7bb   : > { %3486 = vmatpush3.bf16.msra.mxu0 %v4322_v40 }
 0x7bc   : > { %3487 = vmatprep.subr.bf16.mxu0 %v3948_v0 }
 0x7bf   : > { %3488 = vmatpush3.bf16.msra.mxu0 %v4326_v41 }
 0x7c0   : > { %3489 = vmatprep.subr.bf16.mxu0 %v3948_v0 }
 0x7c3   : > { %3490 = vmatpush3.bf16.msra.mxu0 %v4330_v43 }
 0x7c4   : > { %3491 = vmatprep.subr.bf16.mxu0 %v3948_v0 }
 0x7c7   : > { %3492 = vmatpush3.bf16.msra.mxu0 %v4334_v44 }
 0x7c8   : > { %3493 = vmatprep.subr.bf16.mxu0 %v3948_v0 }
 0x7cb   : > { %3494 = vmatpush3.bf16.msra.mxu0 %v4338_v45 }
 0x7cc   : > { %3495 = vmatprep.subr.bf16.mxu0 %v3948_v0 }
 0x7cf   : > { %3496 = vmatpush3.bf16.msra.mxu0 %v4342_v21 }
 0x7d0   : > { %3545 = vmatprep.subr.bf16.mxu0 %v3948_v0 }
 0x872   : > { %v1158_v63 = vpop.f32.mrf.mxu0 }
 0x873   : > { %v1159_v1 = vadd.f32 %v1158_v63, %v1114_v62 }
 0x874   : > { %v3471_v2 = vpop.f32.mrf.mxu0 }
 0x875   : > { %v1164_v4 = vadd.f32 %v1159_v1, %v4137_v37  ;;  %v3740_v37 = vld [vmem:[%s4857_s5 + $0x4] ss:$16 sps:$4 sm:$0xff]  }
 0x876   : > { %v1161_v6 = vpop.f32.mrf.mxu0  ;;  %3476 = vmatpush3.bf16.msra.mxu1 %v3740_v37 }
 0x877   : > { %v1165_v7 = vsel %vm496_vm2, %v1164_v4, 0.0  ;;  %3501 = vmatprep.subr.bf16.mxu1 %v3948_v0 }
 0x878   : > { %1166 = vadd.xlane.f32.xlu0 %v1165_v7  ;;  %v3472_v8 = vpop.f32.mrf.mxu0 }
 0x901   : > { %v1167_v9 = vpop.xlane.xlu0 %1166 }
 0x902   : > { %v1168_v10 = vmul.f32 0.03125, %v1167_v9 }
 0x904   : > { %v1169_v54 = vsub.f32 %v1164_v4, %v1168_v10 }
 0x906   : > { %v1170_v56 = vmul.f32 %v1169_v54, %v1169_v54 }
 0x908   : > { %v1171_v11 = vsel %vm496_vm2, %v1170_v56, 0.0 }
 0x909   : > { %1172 = vadd.xlane.f32.xlu1 %v1171_v11  ;;  %v4366_v11 = vld [vmem:[%s4857_s5 + $0x8] ss:$16 sps:$4 sm:$0xff]  }
 0x992   : > { %v1173_v13 = vpop.xlane.xlu1 %1172 }
 0x993   : > { %v1174_v14 = vmul.f32 0.03125, %v1173_v13 }
 0x995   : > { %v1175_v15 = vadd.f32 1e-05, %v1174_v14  ;;  %v4373_v14 = vld [vmem:[#allocation6 + $0x8] sm:$0xff] }
 0x997   : > { %3795 = vrsqrt.f32 %v1175_v15  ;;  %v1371_v15 = vrot.slane %v4373_v14, %v4122_v28 }
 0x9a4   : > { %v3796_v20 = vpop.eup %3795 }
 0x9a5   : > { %v1177_v23 = vmul.f32 %v3796_v20, %v1169_v54 }
 0x9a7   : > { %v1182_v26 = vmul.f32 %v1181_v18, %v1177_v23  ;;  %v1376_v23 = vrot.slane %v4373_v14, %v4130_v33 }
 0x9a9   : > { %v1187_v30 = vadd.f32 %v1186_v24, %v1182_v26  ;;  %v1381_v26 = vrot.slane %v4373_v14, %v4276_v22 }
 0x9ab   : > { %v1192_v34 = vmul.f32 %v1191_v29, %v1187_v30 }
 0x9ad   : > { %v1197_v35 = vadd.f32 %v1196_v32, %v1192_v34 }
 0x9af   : > { %v1198_v36 = vpack.c.bf16 %v1197_v35, %v1197_v35 }
 0x9b1   : > { %3478 = vmatmul.mubr.msk.bf16.vlgmr.msra.gmra.mxu1 %vm496_vm2, %v1198_v36  ;;  %v1392_v36 = vrot.slane %v4148_v42, %v4276_v22 }
 0x9b2   : > { %3505 = vmatprep.mubr.msk.bf16.mxu1 %vm3949_vm0, %v3948_v0  ;;  %3502 = vmatpush3.bf16.msra.mxu1 %v4360_v31 }
 0x9b3   : > { %3503 = vmatprep.subr.bf16.mxu1 %v3948_v0 }
 0x9b6   : > { %3504 = vmatpush3.bf16.msra.mxu1 %v4366_v11 }
 0x9b7   : > { %3509 = vmatprep.subr.bf16.mxu1 %v3948_v0 }
 0xa71   : > { %v1248_v47 = vpop.f32.mrf.mxu1 }
 0xa72   : > { %v1249_v48 = vadd.f32 %v1248_v47, %v1202_v46 }
 0xa73   : > { %v3479_v50 = vpop.f32.mrf.mxu1 }
 0xa74   : > { %v3224_v51 = vmul.f32 -1.442695, %v1249_v48 }
 0xa75   : > { %v1251_v53 = vpop.f32.mrf.mxu1 }
 0xa76   : > { %3797 = vpow2.f32 %v3224_v51 }
 0xa77   : > { %v3480_v55 = vpop.f32.mrf.mxu1 }
 0xa83   : > { %v3798_v52 = vpop.eup %3797 }
 0xa84   : > { %v1257_v57 = vadd.f32 1.0, %v3798_v52 }
 0xa86   : > { %3799 = vrcp.f32 %v1257_v57 }
 0xa93   : > { %v3800_v58 = vpop.eup %3799 }
 0xa94   : > { %v1260_v59 = vmul.f32 %v3800_v58, %v1249_v48 }
 0xa96   : > { %v1261_v49 = vpack.c.bf16 %v1260_v59, %v1260_v59  ;;  %v4396_v59 = vadd.s32 4294967294, %v4119_v27 }
 0xa98   : > { %3498 = vmatmul.mubr.bf16.vlgmr.msra.gmra.mxu0 %v1261_v49  ;;  %v4399_v49 = vadd.s32 4294967295, %v4119_v27  ;;  %vm1467_vm9 = vcmp.ge.s32.totalorder %v4396_v59, 0 }
 0xa99   : > { %3549 = vmatprep.mubr.msk.bf16.mxu0 %vm3949_vm0, %v3948_v0 }
 0xa9a   : > { %vm1479_vm10 = vcmp.ge.s32.totalorder %v4399_v49, 0 }
 0xb58   : > { %v1348_v62 = vpop.f32.mrf.mxu0 }
 0xb59   : > { %v1349_v63 = vadd.f32 %v1348_v62, %v1265_v61  ;;  %v4402_v62 = vadd.s32 1, %v4119_v27 }
 0xb5a   : > { %v3499_v1 = vpop.f32.mrf.mxu0 }
 0xb5b   : > { %v1354_v2 = vadd.f32 %v1349_v63, %v1187_v30  ;;  %v1386_v30 = vrot.slane %v4373_v14, %v4292_v16  ;;  %v1463_v1 = vrot.slane %v4373_v14, %v4305_v25  ;;  %vm1492_vm11 = vcmp.lt.s32.totalorder %v4402_v62, 8 }
 0xb5c   : > { %v1351_v4 = vpop.f32.mrf.mxu0 }
 0xb5d   : > { %v1355_v6 = vsel %vm496_vm2, %v1354_v2, 0.0  ;;  %v4411_v4 = vadd.s32 2, %v4119_v27 }
 0xb5e   : > { %1356 = vadd.xlane.f32.xlu0 %v1355_v6  ;;  %v3500_v7 = vpop.f32.mrf.mxu0 }
 0xb5f   : > { %vm1504_vm12 = vcmp.lt.s32.totalorder %v4411_v4, 8 }
 0xbe7   : > { %v1357_v8 = vpop.xlane.xlu0 %1356 }
 0xbe8   : > { %v1358_v9 = vmul.f32 0.03125, %v1357_v8 }
 0xbea   : > { %v1359_v10 = vsub.f32 %v1354_v2, %v1358_v9  ;;  %v1474_v2 = vrot.slane %v4373_v14, %v4295_v17 }
 0xbec   : > { %v1360_v54 = vmul.f32 %v1359_v10, %v1359_v10 }
 0xbee   : > { %v1361_v56 = vsel %vm496_vm2, %v1360_v54, 0.0  ;;  %v1486_v54 = vrot.slane %v4373_v14, %v4300_v19 }
 0xbef   : > { %1362 = vadd.xlane.f32.xlu0 %v1361_v56  ;;  %v4418_v56 = vld [vmem:[#allocation6 + $0x10] sm:$0xff] }
 0xc05   : > { %1532 = vrot.lane.b32.xlu0 %v4360_v31, %s3954_s24 }
 0xc78   : > { %v1363_v12 = vpop.xlane.xlu0 %1362 }
 0xc79   : > { %v1364_v37 = vmul.f32 0.03125, %v1363_v12 }
 0xc7b   : > { %v1365_v13 = vadd.f32 1e-05, %v1364_v37 }
 0xc7c   : > { %v1533_v58 = vpop.permute.xlu0 %1532 }
 0xc7d   : > { %3801 = vrsqrt.f32 %v1365_v13  ;;  %v1498_v13 = vrot.slane %v4373_v14, %v4351_v60  ;;  %v1516_v14 = vrot.slane %v4418_v56, %v4130_v33 }
 0xc8a   : > { %v3802_v18 = vpop.eup %3801 }
 0xc8b   : > { %v1367_v20 = vmul.f32 %v3802_v18, %v1359_v10 }
 0xc8d   : > { %v1372_v24 = vmul.f32 %v1371_v15, %v1367_v20 }
 0xc8f   : > { %v4381_v29 = vadd.f32 %v1376_v23, %v1372_v24  ;;  %v1510_v23 = vrot.slane %v4418_v56, %v4122_v28 }
 0xc91   : > { %v1382_v32 = vmul.f32 %v1381_v26, %v4381_v29 }
 0xc93   : > { %v1387_v34 = vadd.f32 %v1386_v30, %v1382_v32 }
 0xc95   : > { %v1388_v35 = vpack.c.bf16 %v1387_v34, %v1387_v34 }
 0xc97   : > { %3506 = vmatmul.mubr.msk.bf16.vlgmr.msra.gmra.mxu1 %vm496_vm2, %v1388_v35 }
 0xc98   : > { %3513 = vmatprep.mubr.msk.bf16.mxu1 %vm3949_vm0, %v3948_v0  ;;  %3510 = vmatpush3.bf16.msra.mxu1 %v1533_v58 }
 0xc99   : > { %3511 = vmatprep.subr.bf16.mxu1 %v3948_v0 }
 0xd57   : > { %v1442_v46 = vpop.f32.mrf.mxu1 }
 0xd58   : > { %v1443_v47 = vadd.f32 %v1442_v46, %v1392_v36 }
 0xd59   : > { %v3507_v48 = vpop.f32.mrf.mxu1 }
 0xd5a   : > { %v3236_v50 = vmul.f32 -1.442695, %v1443_v47 }
 0xd5b   : > { %v1445_v51 = vpop.f32.mrf.mxu1 }
 0xd5c   : > { %3803 = vpow2.f32 %v3236_v50 }
 0xd5d   : > { %v3508_v53 = vpop.f32.mrf.mxu1 }
 0xd69   : > { %v3804_v55 = vpop.eup %3803 }
 0xd6a   : > { %v1451_v52 = vadd.f32 1.0, %v3804_v55 }
 0xd6c   : > { %3805 = vrcp.f32 %v1451_v52 }
 0xd79   : > { %v3806_v57 = vpop.eup %3805 }
 0xd7a   : > { %1455 = vrot.lane.b32.xlu1 %v3806_v57, %s3953_s29  ;;  %v1529_v57 = vrot.slane %v4418_v56, %v4276_v22 }
 0xd7e   : > { %1530 = vrot.lane.b32.xlu1 %v4366_v11, %s3954_s24 }
 0xdec   : > { %v1456_v61 = vpop.permute.xlu1 %1455 }
 0xded   : > { %v1458_v63 = vmul.f32 %v1456_v61, %v1443_v47 }
 0xdef   : > { %v1459_v6 = vsel %vm4198_vm4, %v1458_v63, 0.0 }
 0xdf0   : > { %v1465_v7 = vrot.slane %v1459_v6, 6  ;;  %v1477_v8 = vrot.slane %v1459_v6, 7  ;;  %v1489_v9 = vrot.slane %v1459_v6, 1  ;;  %v1531_v10 = vpop.permute.xlu1 %1530  ;;  %v1501_v37 = vrot.slane %v1459_v6, 2 }
 0xdf1   : > { %3512 = vmatpush3.bf16.msra.mxu1 %v1531_v10  ;;  %v1464_v15 = vmul.f32 %v1463_v1, %v1459_v6 }
 0xdf2   : > { %v1470_v12 = vsel %vm1467_vm9, %v1465_v7, 0.0  ;;  %v1482_v27 = vsel %vm1479_vm10, %v1477_v8, 0.0  ;;  %3517 = vmatprep.subr.bf16.mxu1 %v3948_v0  ;;  %v1494_v20 = vsel %vm1492_vm11, %v1489_v9, 0.0  ;;  %v1506_v30 = vsel %vm1504_vm12, %v1501_v37, 0.0  ;;  %v3753_v8 = vld [vmem:[%s4857_s5 + $0x2c] ss:$16 sps:$4 sm:$0xff]  }
 0xdf3   : > { %v1475_v18 = vmul.f32 %v1474_v2, %v1470_v12  ;;  %v1487_v26 = vmul.f32 %v1486_v54, %v1482_v27  ;;  %v1499_v34 = vmul.f32 %v1498_v13, %v1494_v20  ;;  %v1511_v36 = vmul.f32 %v1510_v23, %v1506_v30 }
 0xdf4   : > { %v1606_v20 = vrot.slane %v4418_v56, %v4300_v19 }
 0xdf5   : > { %v1476_v24 = vadd.f32 %v1475_v18, %v1464_v15  ;;  %v1601_v15 = vrot.slane %v4418_v56, %v4295_v17 }
 0xdf7   : > { %v1488_v32 = vadd.f32 %v1487_v26, %v1476_v24  ;;  %v1611_v24 = vrot.slane %v4418_v56, %v4305_v25 }
 0xdf9   : > { %v1500_v35 = vadd.f32 %v1499_v34, %v1488_v32 }
 0xdfb   : > { %v1512_v46 = vadd.f32 %v1511_v36, %v1500_v35 }
 0xdfd   : > { %v1517_v47 = vadd.f32 %v1516_v14, %v1512_v46 }
 0xdff   : > { %v3237_v48 = vmul.f32 -1.442695, %v1517_v47 }
 0xe01   : > { %3807 = vpow2.f32 %v3237_v48 }
 0xe0e   : > { %v3808_v50 = vpop.eup %3807 }
 0xe0f   : > { %v1521_v51 = vadd.f32 1.0, %v3808_v50 }
 0xe11   : > { %3809 = vrcp.f32 %v1521_v51  ;;  %v1617_v51 = vrot.slane %v4148_v42, %v4292_v16  ;;  %v1691_v42 = vrot.slane %v4418_v56, %v4351_v60 }
 0xe1e   : > { %v3810_v53 = vpop.eup %3809 }
 0xe1f   : > { %v1524_v55 = vmul.f32 %v3810_v53, %v1517_v47 }
 0xe21   : > { %v1525_v52 = vpack.c.bf16 %v1524_v55, %v1524_v55 }
 0xe23   : > { %3514 = vmatmul.mubr.msk.bf16.vlgmr.msra.gmra.mxu1 %vm496_vm2, %v1525_v52 }
 0xe24   : > { %3521 = vmatprep.mubr.msk.bf16.mxu1 %vm3949_vm0, %v3948_v0 }
 0xee3   : > { %v1573_v58 = vpop.f32.mrf.mxu1 }
 0xee4   : > { %v1574_v61 = vadd.f32 %v1573_v58, %v1529_v57 }
 0xee5   : > { %v3515_v63 = vpop.f32.mrf.mxu1 }
 0xee6   : > { %v1579_v1 = vadd.f32 %v1574_v61, %v4381_v29 }
 0xee7   : > { %v1576_v2 = vpop.f32.mrf.mxu1 }
 0xee8   : > { %v1580_v6 = vsel %vm496_vm2, %v1579_v1, 0.0 }
 0xee9   : > { %1581 = vadd.xlane.f32.xlu1 %v1580_v6  ;;  %v3516_v7 = vpop.f32.mrf.mxu1 }
 0xefa   : > { %1630 = vrot.lane.b32.xlu1 %v3753_v8, %s3955_s12 }
 0xefe   : > { %1624 = vrot.lane.b32.xlu1 %v4366_v11, %s3955_s12 }
 0xf02   : > { %1706 = vrot.lane.b32.xlu1 %v4314_v38, %s3953_s29  ;;  %v3754_v38 = vld [vmem:[%s4857_s5 + $0xc] ss:$16 sps:$4 sm:$0xff]  }
 0xf06   : > { %1702 = vrot.lane.b32.xlu1 %v4322_v40, %s3953_s29 }
 0xf0a   : > { %1698 = vrot.lane.b32.xlu1 %v4330_v43, %s3953_s29 }
 0xf0e   : > { %1694 = vrot.lane.b32.xlu1 %v4338_v45, %s3953_s29 }
 0xf72   : > { %v1582_v29 = vpop.xlane.xlu1 %1581 }
 0xf73   : > { %v1583_v9 = vmul.f32 0.03125, %v1582_v29 }
 0xf75   : > { %v1584_v10 = vsub.f32 %v1579_v1, %v1583_v9 }
 0xf76   : > { %v1631_v43 = vpop.permute.xlu1 %1630 }
 0xf77   : > { %v1585_v54 = vmul.f32 %v1584_v10, %v1584_v10 }
 0xf79   : > { %v1586_v12 = vsel %vm496_vm2, %v1585_v54, 0.0 }
 0xf7a   : > { %1587 = vadd.xlane.f32.xlu0 %v1586_v12  ;;  %v1625_v37 = vpop.permute.xlu1 %1624 }
 0xf7e   : > { %v1707_v34 = vpop.permute.xlu1 %1706 }
 0xf82   : > { %v1703_v36 = vpop.permute.xlu1 %1702 }
 0xf86   : > { %v1699_v46 = vpop.permute.xlu1 %1698 }
 0xf8a   : > { %v1695_v48 = vpop.permute.xlu1 %1694 }
 0xf90   : > { %1628 = vrot.lane.b32.xlu0 %v4360_v31, %s3955_s12 }
 0xf94   : > { %1626 = vrot.lane.b32.xlu0 %v3754_v38, %s3955_s12 }
 0xf98   : > { %1704 = vrot.lane.b32.xlu0 %v4318_v39, %s3953_s29 }
 0xf9c   : > { %1700 = vrot.lane.b32.xlu0 %v4326_v41, %s3953_s29 }
 0xfa0   : > { %1696 = vrot.lane.b32.xlu0 %v4334_v44, %s3953_s29  ;;  %v1596_v44 = vrot.slane %v4418_v56, %v4292_v16  ;;  %v4506_v56 = vld [vmem:[%s4857_s5 + $0x60] ss:$16 sps:$4 sm:$0xff]  }
 0xfa1   : > { %3546 = vmatpush3.bf16.msra.mxu0 %v4506_v56 }
 0xfa2   : > { %3547 = vmatprep.subr.bf16.mxu0 %v3948_v0 }
 0xfa4   : > { %1692 = vrot.lane.b32.xlu0 %v4342_v21, %s3953_s29 }
0x1003   : > { %v1588_v40 = vpop.xlane.xlu0 %1587 }
0x1004   : > { %v1589_v45 = vmul.f32 0.03125, %v1588_v40 }
0x1006   : > { %v1590_v31 = vadd.f32 1e-05, %v1589_v45 }
0x1007   : > { %v1629_v11 = vpop.permute.xlu0 %1628 }
0x1008   : > { %3811 = vrsqrt.f32 %v1590_v31  ;;  %v1634_v27 = vsel %vm496_vm2, %v1629_v11, %v1631_v43 }
0x1009   : > { %3518 = vmatpush3.bf16.msra.mxu1 %v1634_v27  ;;  %v4512_v27 = vld [vmem:[%s4857_s5 + $0x40] ss:$16 sps:$4 sm:$0xff]  }
0x100a   : > { %3519 = vmatprep.subr.bf16.mxu1 %v3948_v0  ;;  %3548 = vmatpush3.bf16.msra.mxu0 %v4512_v27 }
0x100b   : > { %v1627_v39 = vpop.permute.xlu0 %1626  ;;  %3553 = vmatprep.subr.bf16.mxu0 %v3948_v0 }
0x100c   : > { %v1633_v41 = vsel %vm496_vm2, %v1625_v37, %v1627_v39 }
0x100d   : > { %3520 = vmatpush3.bf16.msra.mxu1 %v1633_v41 }
0x100e   : > { %3525 = vmatprep.subr.bf16.mxu1 %v3948_v0 }
0x100f   : > { %v1705_v35 = vpop.permute.xlu0 %1704 }
0x1013   : > { %v1701_v14 = vpop.permute.xlu0 %1700 }
0x1015   : > { %v3812_v21 = vpop.eup %3811 }
0x1016   : > { %v1592_v13 = vmul.f32 %v3812_v21, %v1584_v10 }
0x1017   : > { %v1697_v47 = vpop.permute.xlu0 %1696 }
0x1018   : > { %v1597_v18 = vmul.f32 %v1596_v44, %v1592_v13  ;;  %v557_v44 = vld [vmem:[#allocation6 + $0x18] sm:$0x3] }
0x1019   : > { %v1773_v21 = vrot.slane %v557_v44, %v4122_v28 }
0x101a   : > { %v1602_v23 = vadd.f32 %v1601_v15, %v1597_v18  ;;  %v4518_v15 = vld [vmem:[#allocation6 + $0x20] sm:$0xff] }
0x101b   : > { %v1693_v50 = vpop.permute.xlu0 %1692 }
0x101c   : > { %v1607_v26 = vmul.f32 %v1606_v20, %v1602_v23  ;;  %v1778_v20 = vrot.slane %v557_v44, %v4130_v33 }
0x101e   : > { %v1612_v30 = vadd.f32 %v1611_v24, %v1607_v26  ;;  %v1816_v24 = vrot.slane %v4518_v15, %v4122_v28 }
0x1020   : > { %v1613_v32 = vpack.c.bf16 %v1612_v30, %v1612_v30  ;;  %v1821_v30 = vrot.slane %v4518_v15, %v4130_v33 }
0x1022   : > { %3522 = vmatmul.mubr.msk.bf16.vlgmr.msra.gmra.mxu1 %vm496_vm2, %v1613_v32 }
0x1023   : > { %3541 = vmatprep.mubr.msk.bf16.mxu1 %vm3949_vm0, %v3948_v0  ;;  %3526 = vmatpush3.bf16.msra.mxu1 %v1707_v34 }
0x1024   : > { %3527 = vmatprep.subr.bf16.mxu1 %v3948_v0 }
0x1027   : > { %3528 = vmatpush3.bf16.msra.mxu1 %v1705_v35 }
0x1028   : > { %3529 = vmatprep.subr.bf16.mxu1 %v3948_v0 }
0x102b   : > { %3530 = vmatpush3.bf16.msra.mxu1 %v1703_v36  ;;  %v4534_v36 = vld [vmem:[%s4859_s7 + $0x4] sm:$0xf] }
0x102c   : > { %3531 = vmatprep.subr.bf16.mxu1 %v3948_v0 }
0x102f   : > { %3532 = vmatpush3.bf16.msra.mxu1 %v1701_v14  ;;  %v1827_v14 = vrot.slane %v4534_v36, %v4122_v28 }
0x1030   : > { %3533 = vmatprep.subr.bf16.mxu1 %v3948_v0 }
0x1033   : > { %3534 = vmatpush3.bf16.msra.mxu1 %v1699_v46 }
0x1034   : > { %3535 = vmatprep.subr.bf16.mxu1 %v3948_v0 }
0x1037   : > { %3536 = vmatpush3.bf16.msra.mxu1 %v1697_v47 }
0x1038   : > { %3537 = vmatprep.subr.bf16.mxu1 %v3948_v0 }
0x103b   : > { %3538 = vmatpush3.bf16.msra.mxu1 %v1695_v48 }
0x103c   : > { %3539 = vmatprep.subr.bf16.mxu1 %v3948_v0 }
0x103f   : > { %3540 = vmatpush3.bf16.msra.mxu1 %v1693_v50 }
0x1040   : > { %3571 = vmatprep.subr.bf16.mxu1 %v3948_v0 }
0x10e2   : > { %v1674_v53 = vpop.f32.mrf.mxu1 }
0x10e3   : > { %v1675_v55 = vadd.f32 %v1674_v53, %v1617_v51 }
0x10e4   : > { %v3523_v52 = vpop.f32.mrf.mxu1 }
0x10e5   : > { %v3242_v57 = vmul.f32 -1.442695, %v1675_v55 }
0x10e6   : > { %v1677_v58 = vpop.f32.mrf.mxu1 }
0x10e7   : > { %3813 = vpow2.f32 %v3242_v57 }
0x10e8   : > { %v3524_v61 = vpop.f32.mrf.mxu1 }
0x10f4   : > { %v3814_v63 = vpop.eup %3813 }
0x10f5   : > { %v1683_v1 = vadd.f32 1.0, %v3814_v63 }
0x10f7   : > { %3815 = vrcp.f32 %v1683_v1 }
0x1104   : > { %v3816_v2 = vpop.eup %3815 }
0x1105   : > { %v1686_v6 = vmul.f32 %v3816_v2, %v1675_v55 }
0x1107   : > { %v1687_v7 = vpack.c.bf16 %v1686_v6, %v1686_v6 }
0x1109   : > { %3542 = vmatmul.mubr.bf16.vlgmr.msra.gmra.mxu1 %v1687_v7 }
0x110a   : > { %3573 = vmatprep.mubr.msk.bf16.mxu1 %vm3949_vm0, %v3948_v0 }
0x11c9   : > { %v1750_v8 = vpop.f32.mrf.mxu1 }
0x11ca   : > { %v1751_v29 = vadd.f32 %v1750_v8, %v1691_v42 }
0x11cb   : > { %v3543_v9 = vpop.f32.mrf.mxu1 }
0x11cc   : > { %v1756_v10 = vadd.f32 %v1751_v29, %v1602_v23 }
0x11cd   : > { %v1753_v54 = vpop.f32.mrf.mxu1 }
0x11ce   : > { %v1757_v12 = vsel %vm496_vm2, %v1756_v10, 0.0 }
0x11cf   : > { %1758 = vadd.xlane.f32.xlu1 %v1757_v12  ;;  %v3544_v38 = vpop.f32.mrf.mxu1 }
0x1258   : > { %v1759_v40 = vpop.xlane.xlu1 %1758 }
0x1259   : > { %v1760_v43 = vmul.f32 0.03125, %v1759_v40 }
0x125b   : > { %v1761_v45 = vsub.f32 %v1756_v10, %v1760_v43 }
0x125d   : > { %v1762_v31 = vmul.f32 %v1761_v45, %v1761_v45 }
0x125f   : > { %v1763_v11 = vsel %vm496_vm2, %v1762_v31, 0.0 }
0x1260   : > { %1764 = vadd.xlane.f32.xlu0 %v1763_v11 }
0x12e9   : > { %v1765_v37 = vpop.xlane.xlu0 %1764 }
0x12ea   : > { %v1766_v39 = vmul.f32 0.03125, %v1765_v37 }
0x12ec   : > { %v1767_v41 = vadd.f32 1e-05, %v1766_v39 }
0x12ee   : > { %3817 = vrsqrt.f32 %v1767_v41 }
0x12fb   : > { %v3818_v13 = vpop.eup %3817 }
0x12fc   : > { %v1769_v18 = vmul.f32 %v3818_v13, %v1761_v45 }
0x12fe   : > { %v1774_v23 = vmul.f32 %v1773_v21, %v1769_v18 }
0x1300   : > { %v4523_v26 = vadd.f32 %v1778_v20, %v1774_v23 }
0x1302   : > { %v1817_v32 = vmul.f32 %v1816_v24, %v4523_v26 }
0x1304   : > { %v1822_v34 = vadd.f32 %v1821_v30, %v1817_v32 }
0x1306   : > { %v1823_v35 = vpack.c.bf16 %v1822_v34, %v1822_v34 }
0x1308   : > { %3550 = vmatmul.mubr.msk.bf16.vlgmr.msra.gmra.mxu0 %vm496_vm2, %v1823_v35 }
0x1309   : > { %3555 = vmatprep.mubr.msk.bf16.mxu0 %vm3949_vm0, %v3948_v0 }
0x13c8   : > { %v1877_v46 = vpop.f32.mrf.mxu0 }
0x13c9   : > { %v1878_v47 = vadd.f32 %v1877_v46, %v1827_v14 }
0x13ca   : > { %v3551_v48 = vpop.f32.mrf.mxu0 }
0x13cb   : > { %1887 = vrot.lane.b32.xlu1 %v1878_v47, %s3950_s26  ;;  %1884 = vrot.lane.b32.xlu0 %v1878_v47, %s3951_s27  ;;  %v4540_v51 = vpack.c.bf16 %v1878_v47, %v1878_v47 }
0x13cc   : > { %v1880_v50 = vpop.f32.mrf.mxu0 }
0x13ce   : > { %v3552_v53 = vpop.f32.mrf.mxu0 }
0x13cf   : > { %1890 = vrot.lane.b32.xlu1 %v1878_v47, %s3952_s28  ;;  %1898 = vrot.lane.b32.xlu0 %v4540_v51, %s3953_s29 }
0x143d   : > { %v1888_v55 = vpop.permute.xlu1 %1887  ;;  %v1885_v52 = vpop.permute.xlu0 %1884 }
0x143e   : > { %v4545_v57 = vpack.c.bf16 %v1888_v55, %v1888_v55  ;;  %v4547_v58 = vpack.c.bf16 %v1885_v52, %v1885_v52 }
0x1440   : > { %1947 = vrot.lane.b32.xlu1 %v4547_v58, %s3953_s29  ;;  %1996 = vrot.lane.b32.xlu0 %v4545_v57, %s3953_s29 }
0x1441   : > { %v1891_v61 = vpop.permute.xlu1 %1890  ;;  %v1899_v63 = vpop.permute.xlu0 %1898 }
0x1442   : > { %v4553_v1 = vpack.c.bf16 %v1891_v61, %v1891_v61  ;;  %v1904_v2 = vsel %vm645_vm3, %v1899_v63, 0 }
0x1443   : > { %3554 = vmatpush3.bf16.xpose.msra.mxu0 %v1904_v2 }
0x1444   : > { %2045 = vrot.lane.b32.xlu1 %v4553_v1, %s3953_s29  ;;  %3559 = vmatprep.subr.bf16.mxu0 %v3948_v0 }
0x144a   : > { %3556 = vmatmul.mubr.msk.bf16.vlgmr.msra.gmra.mxu0 %vm645_vm3, %v4540_v51 }
0x144b   : > { %3561 = vmatprep.mubr.msk.bf16.mxu0 %vm3949_vm0, %v3948_v0 }
0x14b2   : > { %v1948_v6 = vpop.permute.xlu1 %1947  ;;  %v1997_v29 = vpop.permute.xlu0 %1996 }
0x14b3   : > { %v1953_v7 = vsel %vm645_vm3, %v1948_v6, 0  ;;  %v2002_v9 = vsel %vm645_vm3, %v1997_v29, 0 }
0x14b4   : > { %3560 = vmatpush3.bf16.xpose.msra.mxu0 %v1953_v7 }
0x14b5   : > { %3565 = vmatprep.subr.bf16.mxu0 %v3948_v0 }
0x14b6   : > { %v2046_v42 = vpop.permute.xlu1 %2045 }
0x14b7   : > { %v2051_v8 = vsel %vm645_vm3, %v2046_v42, 0 }
0x14b8   : > { %3572 = vmatpush3.bf16.xpose.msra.mxu1 %v2051_v8 }
0x14b9   : > { %3583 = vmatprep.subr.bf16.mxu1 %v3948_v0 }
0x14bb   : > { %3562 = vmatmul.mubr.msk.bf16.vlgmr.msra.gmra.mxu0 %vm645_vm3, %v4547_v58 }
0x14bc   : > { %3566 = vmatpush3.bf16.xpose.msra.mxu0 %v2002_v9  ;;  %3567 = vmatprep.mubr.msk.bf16.mxu0 %vm3949_vm0, %v3948_v0 }
0x14bd   : > { %3577 = vmatprep.subr.bf16.mxu0 %v3948_v0 }
0x14bf   : > { %3574 = vmatmul.mubr.msk.bf16.vlgmr.msra.gmra.mxu1 %vm645_vm3, %v4553_v1 }
0x14c0   : > { %3585 = vmatprep.mubr.msk.bf16.mxu1 %vm3949_vm0, %v3948_v0 }
0x14c3   : > { %3568 = vmatmul.mubr.msk.bf16.vlgmr.msra.gmra.mxu0 %vm645_vm3, %v4545_v57 }
0x14c4   : > { %3579 = vmatprep.mubr.msk.bf16.mxu0 %vm3949_vm0, %v3948_v0 }
0x150a   : > { %v1940_v10 = vpop.f32.mrf.mxu0 }
0x150b   : > { %v2093_v54 = vmul.f32 0.35355338, %v1940_v10 }
0x150c   : > { %v3557_v12 = vpop.f32.mrf.mxu0 }
0x150d   : > { %v2097_v38 = vsel %vm4204_vm6, %v2093_v54, -10000.0 }
0x150e   : > { %v1943_v40 = vpop.f32.mrf.mxu0  ;;  %v2101_v43 = vsel %vm645_vm3, %v2097_v38, -inf }
0x150f   : > { %2102 = vmax.xlane.f32.xlu0 %v2101_v43 }
0x1510   : > { %v3558_v45 = vpop.f32.mrf.mxu0 }
0x157b   : > { %v1989_v31 = vpop.f32.mrf.mxu0 }
0x157c   : > { %v2094_v11 = vmul.f32 0.35355338, %v1989_v31 }
0x157d   : > { %v3563_v37 = vpop.f32.mrf.mxu0 }
0x157e   : > { %v2098_v39 = vsel %vm4204_vm6, %v2094_v11, -10000.0 }
0x157f   : > { %v1992_v41 = vpop.f32.mrf.mxu0  ;;  %v2087_v44 = vpop.f32.mrf.mxu1  ;;  %v2104_v21 = vsel %vm645_vm3, %v2098_v39, -inf }
0x1580   : > { %2105 = vmax.xlane.f32.xlu1 %v2104_v21  ;;  %v2096_v24 = vmul.f32 0.35355338, %v2087_v44 }
0x1581   : > { %v3564_v13 = vpop.f32.mrf.mxu0  ;;  %v3575_v18 = vpop.f32.mrf.mxu1 }
0x1582   : > { %v2100_v47 = vsel %vm4204_vm6, %v2096_v24, -10000.0 }
0x1583   : > { %v2038_v20 = vpop.f32.mrf.mxu0  ;;  %v2090_v23 = vpop.f32.mrf.mxu1  ;;  %v2110_v50 = vsel %vm645_vm3, %v2100_v47, -inf }
0x1584   : > { %v2095_v30 = vmul.f32 0.35355338, %v2038_v20 }
0x1585   : > { %v3569_v32 = vpop.f32.mrf.mxu0  ;;  %v3576_v34 = vpop.f32.mrf.mxu1 }
0x1586   : > { %v2099_v35 = vsel %vm4204_vm6, %v2095_v30, -10000.0 }
0x1587   : > { %v2041_v14 = vpop.f32.mrf.mxu0  ;;  %v2107_v46 = vsel %vm645_vm3, %v2099_v35, -inf }
0x1588   : > { %2108 = vmax.xlane.f32.xlu0 %v2107_v46 }
0x1589   : > { %v3570_v48 = vpop.f32.mrf.mxu0 }
0x158c   : > { %2111 = vmax.xlane.f32.xlu0 %v2110_v50 }
0x1591   : > { %2153 = vrot.lane.b32.xlu1 %v4540_v51, %s3954_s24 }
0x1598   : > { %v2103_v53 = vpop.xlane.xlu0 %2102 }
0x1599   : > { %v2113_v55 = vsub.f32 %v2097_v38, %v2103_v53 }
0x159b   : > { %v2117_v52 = vmul.f32 1.442695, %v2113_v55 }
0x159d   : > { %3819 = vpow2.f32 %v2117_v52 }
0x15aa   : > { %v3820_v61 = vpop.eup %3819 }
0x15ab   : > { %v2125_v63 = vsel %vm645_vm3, %v3820_v61, 0.0 }
0x15b5   : > { %2126 = vadd.xlane.f32.xlu1 %v2125_v63 }
0x15c6   : > { %2249 = vrot.lane.b32.xlu1 %v4545_v57, %s3954_s24 }
0x1609   : > { %v2106_v2 = vpop.xlane.xlu1 %2105 }
0x160a   : > { %v2114_v6 = vsub.f32 %v2098_v39, %v2106_v2 }
0x160c   : > { %v2119_v7 = vmul.f32 1.442695, %v2114_v6 }
0x160d   : > { %v2154_v42 = vpop.permute.xlu1 %2153 }
0x160e   : > { %3821 = vpow2.f32 %v2119_v7  ;;  %v2159_v8 = vsel %vm906_vm7, %v2154_v42, 0 }
0x160f   : > { %3578 = vmatpush3.bf16.msra.mxu0 %v2159_v8 }
0x1610   : > { %3589 = vmatprep.subr.bf16.mxu0 %v3948_v0 }
0x1611   : > { %v2109_v51 = vpop.xlane.xlu0 %2108 }
0x1612   : > { %v2115_v29 = vsub.f32 %v2099_v35, %v2109_v51 }
0x1614   : > { %v2121_v9 = vmul.f32 1.442695, %v2115_v29 }
0x1615   : > { %v2112_v10 = vpop.xlane.xlu0 %2111 }
0x1616   : > { %3823 = vpow2.f32 %v2121_v9  ;;  %v2116_v54 = vsub.f32 %v2100_v47, %v2112_v10 }
0x1618   : > { %v2123_v12 = vmul.f32 1.442695, %v2116_v54 }
0x161a   : > { %3825 = vpow2.f32 %v2123_v12 }
0x161b   : > { %v3822_v38 = vpop.eup %3821 }
0x161c   : > { %v2128_v57 = vsel %vm645_vm3, %v3822_v38, 0.0 }
0x161d   : > { %2129 = vadd.xlane.f32.xlu0 %v2128_v57 }
0x1623   : > { %v3824_v40 = vpop.eup %3823 }
0x1624   : > { %v2131_v43 = vsel %vm645_vm3, %v3824_v40, 0.0 }
0x1625   : > { %2132 = vadd.xlane.f32.xlu1 %v2131_v43 }
0x1627   : > { %v3826_v45 = vpop.eup %3825 }
0x1628   : > { %v2134_v31 = vsel %vm645_vm3, %v3826_v45, 0.0 }
0x1629   : > { %2135 = vadd.xlane.f32.xlu0 %v2134_v31 }
0x1636   : > { %2297 = vrot.lane.b32.xlu1 %v4553_v1, %s3954_s24 }
0x163e   : > { %v2127_v11 = vpop.xlane.xlu1 %2126 }
0x163f   : > { %3827 = vrcp.f32 %v2127_v11  ;;  %2201 = vrot.lane.b32.xlu0 %v4547_v58, %s3954_s24 }
0x1642   : > { %v2250_v41 = vpop.permute.xlu1 %2249 }
0x1643   : > { %2367 = vrot.lane.b32.xlu0 %v4506_v56, %s3955_s12  ;;  %v2255_v13 = vsel %vm906_vm7, %v2250_v41, 0 }
0x164c   : > { %v3828_v37 = vpop.eup %3827 }
0x164d   : > { %v2138_v39 = vmul.f32 %v3828_v37, %v3820_v61 }
0x164f   : > { %v2145_v44 = vsel %vm4204_vm6, %v2138_v39, 0.0 }
0x1650   : > { %v2149_v21 = vpack.c.bf16 %v2145_v44, %v2145_v44 }
0x1652   : > { %3580 = vmatmul.mubr.msk.bf16.vlgmr.msra.gmra.mxu0 %vm645_vm3, %v2149_v21 }
0x1653   : > { %3590 = vmatpush3.bf16.msra.mxu0 %v2255_v13  ;;  %3591 = vmatprep.mubr.msk.bf16.mxu0 %vm3949_vm0, %v3948_v0 }
0x1654   : > { %3601 = vmatprep.subr.bf16.mxu0 %v3948_v0 }
0x16a6   : > { %v2130_v58 = vpop.xlane.xlu0 %2129 }
0x16a7   : > { %3829 = vrcp.f32 %v2130_v58 }
0x16ae   : > { %v2133_v56 = vpop.xlane.xlu1 %2132 }
0x16af   : > { %3831 = vrcp.f32 %v2133_v56 }
0x16b2   : > { %v2136_v1 = vpop.xlane.xlu0 %2135  ;;  %v2298_v32 = vpop.permute.xlu1 %2297 }
0x16b3   : > { %3833 = vrcp.f32 %v2136_v1  ;;  %v2303_v35 = vsel %vm906_vm7, %v2298_v32, 0 }
0x16b4   : > { %v3830_v18 = vpop.eup %3829 }
0x16b5   : > { %v2140_v20 = vmul.f32 %v3830_v18, %v3822_v38 }
0x16b6   : > { %v2202_v23 = vpop.permute.xlu0 %2201 }
0x16b7   : > { %v2207_v24 = vsel %vm906_vm7, %v2202_v23, 0  ;;  %v2146_v30 = vsel %vm4204_vm6, %v2140_v20, 0.0 }
0x16b8   : > { %3584 = vmatpush3.bf16.msra.mxu1 %v2207_v24  ;;  %v2150_v34 = vpack.c.bf16 %v2146_v30, %v2146_v30 }
0x16b9   : > { %3595 = vmatprep.subr.bf16.mxu1 %v3948_v0 }
0x16ba   : > { %v2368_v7 = vpop.permute.xlu0 %2367 }
0x16bb   : > { %3586 = vmatmul.mubr.msk.bf16.vlgmr.msra.gmra.mxu1 %vm645_vm3, %v2150_v34 }
0x16bc   : > { %v3832_v14 = vpop.eup %3831  ;;  %3596 = vmatpush3.bf16.msra.mxu1 %v2303_v35  ;;  %3597 = vmatprep.mubr.msk.bf16.mxu1 %vm3949_vm0, %v3948_v0  ;;  %v3759_v35 = vld [vmem:[%s4857_s5 + $0x64] ss:$16 sps:$4 sm:$0xff]  }
0x16bd   : > { %v2142_v46 = vmul.f32 %v3832_v14, %v3824_v40  ;;  %3609 = vmatprep.subr.bf16.mxu1 %v3948_v0 }
0x16bf   : > { %v2147_v47 = vsel %vm4204_vm6, %v2142_v46, 0.0 }
0x16c0   : > { %v3834_v48 = vpop.eup %3833  ;;  %v2151_v50 = vpack.c.bf16 %v2147_v47, %v2147_v47 }
0x16c1   : > { %v2144_v53 = vmul.f32 %v3834_v48, %v3826_v45  ;;  %v2431_v48 = vrot.slane %v4518_v15, %v4292_v16 }
0x16c2   : > { %3592 = vmatmul.mubr.msk.bf16.vlgmr.msra.gmra.mxu0 %vm645_vm3, %v2151_v50 }
0x16c3   : > { %v2148_v55 = vsel %vm4204_vm6, %v2144_v53, 0.0  ;;  %3605 = vmatprep.mubr.msk.bf16.mxu0 %vm3949_vm0, %v3948_v0  ;;  %3602 = vmatpush3.bf16.msra.mxu0 %v2368_v7 }
0x16c4   : > { %v2152_v52 = vpack.c.bf16 %v2148_v55, %v2148_v55  ;;  %3603 = vmatprep.subr.bf16.mxu0 %v3948_v0  ;;  %v2436_v55 = vrot.slane %v4518_v15, %v4295_v17 }
0x16c6   : > { %3598 = vmatmul.mubr.msk.bf16.vlgmr.msra.gmra.mxu1 %vm645_vm3, %v2152_v52 }
0x16c7   : > { %3613 = vmatprep.mubr.msk.bf16.mxu1 %vm3949_vm0, %v3948_v0  ;;  %3610 = vmatpush3.bf16.msra.mxu1 %v3759_v35 }
0x16c8   : > { %3611 = vmatprep.subr.bf16.mxu1 %v3948_v0 }
0x1712   : > { %v2195_v61 = vpop.f32.mrf.mxu0 }
0x1714   : > { %v3581_v63 = vpop.f32.mrf.mxu0 }
0x1716   : > { %v2198_v2 = vpop.f32.mrf.mxu0 }
0x1717   : > { %v2446_v2 = vrot.slane %v4518_v15, %v4305_v25 }
0x1718   : > { %v3582_v6 = vpop.f32.mrf.mxu0 }
0x177b   : > { %v2243_v42 = vpop.f32.mrf.mxu1 }
0x177c   : > { %2346 = vrot.lane.b32.xlu1 %v2243_v42, %s3956_s13  ;;  %s396_s13 = scalar_lea.vmem %s4863_s11, %s3292_s21 }
0x177d   : > { %v3587_v5 = vpop.f32.mrf.mxu1 }
0x177e   : > { %v4672_v5 = vld [vmem:[#allocation4 + $0x78] sm:$0xff]  }
0x177f   : > { %v2246_v8 = vpop.f32.mrf.mxu1 }
0x1780   : > { %v4676_v8 = vld [vmem:[#allocation4 + $0x70] sm:$0xff]  }
0x1781   : > { %v3588_v51 = vpop.f32.mrf.mxu1 }
0x1782   : > { %v2291_v29 = vpop.f32.mrf.mxu0  ;;  %v4680_v51 = vld [vmem:[#allocation4 + $0x68] sm:$0xff]  }
0x1783   : > { %2350 = vrot.lane.b32.xlu0 %v2291_v29, %s3957_s14  ;;  %v4684_v29 = vld [vmem:[#allocation4 + $0x60] sm:$0xff]  }
0x1784   : > { %v3593_v9 = vpop.f32.mrf.mxu0 }
0x1785   : > { %v4688_v9 = vld [vmem:[#allocation4 + $0x58] sm:$0xff]  }
0x1786   : > { %v2294_v10 = vpop.f32.mrf.mxu0  ;;  %v2339_v54 = vpop.f32.mrf.mxu1 }
0x1787   : > { %2354 = vrot.lane.b32.xlu1 %v2339_v54, %s3958_s15  ;;  %2365 = vrot.lane.b32.xlu0 %v4512_v27, %s3955_s12  ;;  %v2364_v27 = vrot.slane %v4518_v15, %v4276_v22  ;;  %v4692_v10 = vld [vmem:[#allocation4 + $0x50] sm:$0xff]   ;;  %v4696_v54 = vld [vmem:[#allocation4 + $0x48] sm:$0xff]  }
0x1788   : > { %v3594_v12 = vpop.f32.mrf.mxu0  ;;  %v3599_v38 = vpop.f32.mrf.mxu1 }
0x1789   : > { %v4700_v12 = vld [vmem:[#allocation4 + $0x40] sm:$0xff]   ;;  %v2452_v38 = vrot.slane %v4534_v36, %v4130_v33 }
0x178a   : > { %v2342_v57 = vpop.f32.mrf.mxu1 }
0x178c   : > { %v3600_v40 = vpop.f32.mrf.mxu1 }
0x17ee   : > { %v2347_v43 = vpop.permute.xlu1 %2346 }
0x17ef   : > { %v2357_v31 = vsel %vm645_vm3, %v2195_v61, %v2347_v43  ;;  %v2441_v61 = vrot.slane %v4518_v15, %v4300_v19 }
0x17f5   : > { %v2351_v45 = vpop.permute.xlu0 %2350 }
0x17f6   : > { %v2358_v11 = vsel %vm447_vm1, %v2357_v31, %v2351_v45 }
0x17f9   : > { %v2355_v37 = vpop.permute.xlu1 %2354  ;;  %v2366_v39 = vpop.permute.xlu0 %2365 }
0x17fa   : > { %v2359_v41 = vsel %vm1108_vm8, %v2358_v11, %v2355_v37  ;;  %3604 = vmatpush3.bf16.msra.mxu0 %v2366_v39 }
0x17fb   : > { %v2360_v44 = vpack.c.bf16 %v2359_v41, %v2359_v41  ;;  %3617 = vmatprep.subr.bf16.mxu0 %v3948_v0 }
0x17fd   : > { %3606 = vmatmul.mubr.msk.bf16.vlgmr.msra.gmra.mxu0 %vm496_vm2, %v2360_v44 }
0x17fe   : > { %3633 = vmatprep.mubr.msk.bf16.mxu0 %vm3949_vm0, %v3948_v0  ;;  %3618 = vmatpush3.bf16.msra.mxu0 %v4672_v5 }
0x17ff   : > { %3619 = vmatprep.subr.bf16.mxu0 %v3948_v0 }
0x1802   : > { %3620 = vmatpush3.bf16.msra.mxu0 %v4676_v8 }
0x1803   : > { %3621 = vmatprep.subr.bf16.mxu0 %v3948_v0 }
0x1806   : > { %3622 = vmatpush3.bf16.msra.mxu0 %v4680_v51 }
0x1807   : > { %3623 = vmatprep.subr.bf16.mxu0 %v3948_v0 }
0x180a   : > { %3624 = vmatpush3.bf16.msra.mxu0 %v4684_v29 }
0x180b   : > { %3625 = vmatprep.subr.bf16.mxu0 %v3948_v0 }
0x180e   : > { %3626 = vmatpush3.bf16.msra.mxu0 %v4688_v9 }
0x180f   : > { %3627 = vmatprep.subr.bf16.mxu0 %v3948_v0 }
0x1812   : > { %3628 = vmatpush3.bf16.msra.mxu0 %v4692_v10 }
0x1813   : > { %3629 = vmatprep.subr.bf16.mxu0 %v3948_v0 }
0x1816   : > { %3630 = vmatpush3.bf16.msra.mxu0 %v4696_v54 }
0x1817   : > { %3631 = vmatprep.subr.bf16.mxu0 %v3948_v0 }
0x181a   : > { %3632 = vmatpush3.bf16.msra.mxu0 %v4700_v12 }
0x181b   : > { %3681 = vmatprep.subr.bf16.mxu0 %v3948_v0 }
0x18bd   : > { %v2408_v21 = vpop.f32.mrf.mxu0 }
0x18be   : > { %v2409_v13 = vadd.f32 %v2408_v21, %v2364_v27  ;;  %v2515_v21 = vrot.slane %v4518_v15, %v4351_v60  ;;  %v4715_v15 = vld [vmem:[%s4857_s5 + $0x68] ss:$16 sps:$4 sm:$0xff]  }
0x18bf   : > { %v3607_v58 = vpop.f32.mrf.mxu0 }
0x18c0   : > { %v2414_v56 = vadd.f32 %v2409_v13, %v4523_v26  ;;  %v3760_v26 = vld [vmem:[%s4857_s5 + $0x44] ss:$16 sps:$4 sm:$0xff]  }
0x18c1   : > { %v2411_v1 = vpop.f32.mrf.mxu0  ;;  %3612 = vmatpush3.bf16.msra.mxu1 %v3760_v26  ;;  %v4721_v26 = vld [vmem:[%s4857_s5 + $0x48] ss:$16 sps:$4 sm:$0xff]  }
0x18c2   : > { %v2415_v18 = vsel %vm496_vm2, %v2414_v56, 0.0  ;;  %3637 = vmatprep.subr.bf16.mxu1 %v3948_v0 }
0x18c3   : > { %2416 = vadd.xlane.f32.xlu1 %v2415_v18  ;;  %v3608_v20 = vpop.f32.mrf.mxu0 }
0x194c   : > { %v2417_v23 = vpop.xlane.xlu1 %2416 }
0x194d   : > { %v2418_v24 = vmul.f32 0.03125, %v2417_v23 }
0x194f   : > { %v2419_v30 = vsub.f32 %v2414_v56, %v2418_v24 }
0x1951   : > { %v2420_v32 = vmul.f32 %v2419_v30, %v2419_v30 }
0x1953   : > { %v2421_v34 = vsel %vm496_vm2, %v2420_v32, 0.0 }
0x1954   : > { %2422 = vadd.xlane.f32.xlu0 %v2421_v34 }
0x19dd   : > { %v2423_v14 = vpop.xlane.xlu0 %2422 }
0x19de   : > { %v2424_v46 = vmul.f32 0.03125, %v2423_v14 }
0x19e0   : > { %v2425_v47 = vadd.f32 1e-05, %v2424_v46 }
0x19e2   : > { %3835 = vrsqrt.f32 %v2425_v47 }
0x19ef   : > { %v3836_v50 = vpop.eup %3835 }
0x19f0   : > { %v2427_v53 = vmul.f32 %v3836_v50, %v2419_v30 }
0x19f2   : > { %v2432_v52 = vmul.f32 %v2431_v48, %v2427_v53  ;;  %v1810_v48 = vld [vmem:[#allocation6 + $0x28] sm:$0xff] }
0x19f3   : > { %v2621_v50 = vrot.slane %v1810_v48, %v4122_v28 }
0x19f4   : > { %v2437_v63 = vadd.f32 %v2436_v55, %v2432_v52  ;;  %v2626_v52 = vrot.slane %v1810_v48, %v4130_v33 }
0x19f6   : > { %v2442_v6 = vmul.f32 %v2441_v61, %v2437_v63 }
0x19f8   : > { %v2447_v7 = vadd.f32 %v2446_v2, %v2442_v6  ;;  %v2636_v6 = vrot.slane %v1810_v48, %v4292_v16 }
0x19fa   : > { %v2448_v42 = vpack.c.bf16 %v2447_v7, %v2447_v7 }
0x19fc   : > { %3614 = vmatmul.mubr.msk.bf16.vlgmr.msra.gmra.mxu1 %vm496_vm2, %v2448_v42 }
0x19fd   : > { %3641 = vmatprep.mubr.msk.bf16.mxu1 %vm3949_vm0, %v3948_v0  ;;  %3638 = vmatpush3.bf16.msra.mxu1 %v4715_v15 }
0x19fe   : > { %3639 = vmatprep.subr.bf16.mxu1 %v3948_v0 }
0x1a01   : > { %3640 = vmatpush3.bf16.msra.mxu1 %v4721_v26 }
0x1a02   : > { %3645 = vmatprep.subr.bf16.mxu1 %v3948_v0 }
0x1abc   : > { %v2498_v57 = vpop.f32.mrf.mxu1 }
0x1abd   : > { %v2499_v40 = vadd.f32 %v2498_v57, %v2452_v38  ;;  %v2642_v57 = vrot.slane %v4534_v36, %v4276_v22 }
0x1abe   : > { %v3615_v43 = vpop.f32.mrf.mxu1 }
0x1abf   : > { %v3267_v45 = vmul.f32 -1.442695, %v2499_v40 }
0x1ac0   : > { %v2501_v31 = vpop.f32.mrf.mxu1 }
0x1ac1   : > { %3837 = vpow2.f32 %v3267_v45 }
0x1ac2   : > { %v3616_v11 = vpop.f32.mrf.mxu1 }
0x1ace   : > { %v3838_v37 = vpop.eup %3837 }
0x1acf   : > { %v2507_v39 = vadd.f32 1.0, %v3838_v37 }
0x1ad1   : > { %3839 = vrcp.f32 %v2507_v39 }
0x1ade   : > { %v3840_v41 = vpop.eup %3839 }
0x1adf   : > { %v2510_v44 = vmul.f32 %v3840_v41, %v2499_v40 }
0x1ae1   : > { %v2511_v27 = vpack.c.bf16 %v2510_v44, %v2510_v44 }
0x1ae3   : > { %3634 = vmatmul.mubr.bf16.vlgmr.msra.gmra.mxu0 %v2511_v27 }
0x1ae4   : > { %3685 = vmatprep.mubr.msk.bf16.mxu0 %vm3949_vm0, %v3948_v0 }
0x1ba3   : > { %v2598_v13 = vpop.f32.mrf.mxu0 }
0x1ba4   : > { %v2599_v58 = vadd.f32 %v2598_v13, %v2515_v21 }
0x1ba5   : > { %v3635_v56 = vpop.f32.mrf.mxu0 }
0x1ba6   : > { %v2604_v1 = vadd.f32 %v2599_v58, %v2437_v63  ;;  %v2631_v63 = vrot.slane %v1810_v48, %v4276_v22  ;;  %v2713_v56 = vrot.slane %v1810_v48, %v4305_v25 }
0x1ba7   : > { %v2601_v18 = vpop.f32.mrf.mxu0 }
0x1ba8   : > { %v2605_v20 = vsel %vm496_vm2, %v2604_v1, 0.0 }
0x1ba9   : > { %2606 = vadd.xlane.f32.xlu0 %v2605_v20  ;;  %v3636_v23 = vpop.f32.mrf.mxu0 }
0x1c32   : > { %v2607_v24 = vpop.xlane.xlu0 %2606 }
0x1c33   : > { %v2608_v30 = vmul.f32 0.03125, %v2607_v24 }
0x1c35   : > { %v2609_v32 = vsub.f32 %v2604_v1, %v2608_v30  ;;  %v2720_v1 = vrot.slane %v1810_v48, %v4295_v17  ;;  %v2728_v30 = vrot.slane %v1810_v48, %v4300_v19 }
0x1c37   : > { %v2610_v34 = vmul.f32 %v2609_v32, %v2609_v32 }
0x1c39   : > { %v2611_v35 = vsel %vm496_vm2, %v2610_v34, 0.0 }
0x1c3a   : > { %2612 = vadd.xlane.f32.xlu1 %v2611_v35 }
0x1c4b   : > { %2766 = vrot.lane.b32.xlu1 %v4715_v15, %s3954_s24 }
0x1c4f   : > { %2764 = vrot.lane.b32.xlu1 %v4721_v26, %s3954_s24 }
0x1cc3   : > { %v2613_v14 = vpop.xlane.xlu1 %2612 }
0x1cc4   : > { %v2614_v46 = vmul.f32 0.03125, %v2613_v14 }
0x1cc6   : > { %v2615_v47 = vadd.f32 1e-05, %v2614_v46  ;;  %v2736_v46 = vrot.slane %v1810_v48, %v4351_v60 }
0x1cc7   : > { %v2767_v27 = vpop.permute.xlu1 %2766 }
0x1cc8   : > { %3841 = vrsqrt.f32 %v2615_v47 }
0x1ccb   : > { %v2765_v21 = vpop.permute.xlu1 %2764 }
0x1cd5   : > { %v3842_v53 = vpop.eup %3841 }
0x1cd6   : > { %v2617_v55 = vmul.f32 %v3842_v53, %v2609_v32  ;;  %v4750_v32 = vld [vmem:[#allocation6 + $0x30] sm:$0xff] }
0x1cd7   : > { %v2744_v53 = vrot.slane %v4750_v32, %v4122_v28  ;;  %v2750_v48 = vrot.slane %v4750_v32, %v4130_v33  ;;  %v2763_v4 = vrot.slane %v4750_v32, %v4276_v22 }
0x1cd8   : > { %v2622_v61 = vmul.f32 %v2621_v50, %v2617_v55 }
0x1cda   : > { %v4733_v2 = vadd.f32 %v2626_v52, %v2622_v61 }
0x1cdc   : > { %v2632_v7 = vmul.f32 %v2631_v63, %v4733_v2 }
0x1cde   : > { %v2637_v42 = vadd.f32 %v2636_v6, %v2632_v7 }
0x1ce0   : > { %v2638_v38 = vpack.c.bf16 %v2637_v42, %v2637_v42 }
0x1ce2   : > { %3642 = vmatmul.mubr.msk.bf16.vlgmr.msra.gmra.mxu1 %vm496_vm2, %v2638_v38 }
0x1ce3   : > { %3649 = vmatprep.mubr.msk.bf16.mxu1 %vm3949_vm0, %v3948_v0  ;;  %3646 = vmatpush3.bf16.msra.mxu1 %v2767_v27 }
0x1ce4   : > { %3647 = vmatprep.subr.bf16.mxu1 %v3948_v0 }
0x1ce7   : > { %3648 = vmatpush3.bf16.msra.mxu1 %v2765_v21 }
0x1ce8   : > { %3653 = vmatprep.subr.bf16.mxu1 %v3948_v0 }
0x1da2   : > { %v2692_v40 = vpop.f32.mrf.mxu1 }
0x1da3   : > { %v2693_v43 = vadd.f32 %v2692_v40, %v2642_v57 }
0x1da4   : > { %v3643_v45 = vpop.f32.mrf.mxu1 }
0x1da5   : > { %v3279_v31 = vmul.f32 -1.442695, %v2693_v43 }
0x1da6   : > { %v2695_v11 = vpop.f32.mrf.mxu1 }
0x1da7   : > { %3843 = vpow2.f32 %v3279_v31 }
0x1da8   : > { %v3644_v37 = vpop.f32.mrf.mxu1 }
0x1db4   : > { %v3844_v39 = vpop.eup %3843 }
0x1db5   : > { %v2701_v41 = vadd.f32 1.0, %v3844_v39 }
0x1db7   : > { %3845 = vrcp.f32 %v2701_v41 }
0x1dc4   : > { %v3846_v44 = vpop.eup %3845 }
0x1dc5   : > { %2705 = vrot.lane.b32.xlu0 %v3846_v44, %s3953_s29 }
0x1e37   : > { %v2706_v13 = vpop.permute.xlu0 %2705 }
0x1e38   : > { %v2708_v58 = vmul.f32 %v2706_v13, %v2693_v43 }
0x1e3a   : > { %v2709_v18 = vsel %vm4198_vm4, %v2708_v58, 0.0 }
0x1e3b   : > { %v2715_v20 = vrot.slane %v2709_v18, 6  ;;  %v2723_v23 = vrot.slane %v2709_v18, 7  ;;  %v2731_v24 = vrot.slane %v2709_v18, 1  ;;  %v2739_v14 = vrot.slane %v2709_v18, 2 }
0x1e3c   : > { %v2714_v47 = vmul.f32 %v2713_v56, %v2709_v18 }
0x1e3d   : > { %v2716_v34 = vsel %vm1467_vm9, %v2715_v20, 0.0  ;;  %v2724_v35 = vsel %vm1479_vm10, %v2723_v23, 0.0  ;;  %v2732_v3 = vsel %vm1492_vm11, %v2731_v24, 0.0  ;;  %v2740_v59 = vsel %vm1504_vm12, %v2739_v14, 0.0 }
0x1e3e   : > { %v2721_v50 = vmul.f32 %v2720_v1, %v2716_v34  ;;  %v2729_v52 = vmul.f32 %v2728_v30, %v2724_v35  ;;  %v2737_v63 = vmul.f32 %v2736_v46, %v2732_v3  ;;  %v2745_v6 = vmul.f32 %v2744_v53, %v2740_v59 }
0x1e3f   : > { %v2835_v23 = vrot.slane %v4750_v32, %v4295_v17  ;;  %v2840_v30 = vrot.slane %v4750_v32, %v4300_v19  ;;  %v2845_v35 = vrot.slane %v4750_v32, %v4305_v25  ;;  %v2851_v59 = vrot.slane %v4534_v36, %v4292_v16 }
0x1e40   : > { %v2722_v55 = vadd.f32 %v2721_v50, %v2714_v47 }
0x1e42   : > { %v2730_v61 = vadd.f32 %v2729_v52, %v2722_v55 }
0x1e44   : > { %v2738_v49 = vadd.f32 %v2737_v63, %v2730_v61 }
0x1e46   : > { %v2746_v7 = vadd.f32 %v2745_v6, %v2738_v49 }
0x1e48   : > { %v2751_v42 = vadd.f32 %v2750_v48, %v2746_v7 }
0x1e4a   : > { %v3280_v38 = vmul.f32 -1.442695, %v2751_v42 }
0x1e4c   : > { %3847 = vpow2.f32 %v3280_v38 }
0x1e59   : > { %v3848_v62 = vpop.eup %3847 }
0x1e5a   : > { %v2755_v57 = vadd.f32 1.0, %v3848_v62 }
0x1e5c   : > { %3849 = vrcp.f32 %v2755_v57 }
0x1e69   : > { %v3850_v40 = vpop.eup %3849 }
0x1e6a   : > { %v2758_v43 = vmul.f32 %v3850_v40, %v2751_v42 }
0x1e6c   : > { %v2759_v45 = vpack.c.bf16 %v2758_v43, %v2758_v43  ;;  %v2924_v43 = vrot.slane %v4750_v32, %v4351_v60  ;;  %v3775_v60 = vld [vmem:[%s4861_s9 + $0x8] sm:$0xff]  }
0x1e6d   : > { %3682 = vmatpush3.bf16.msra.mxu0 %v3775_v60 }
0x1e6e   : > { %3650 = vmatmul.mubr.msk.bf16.vlgmr.msra.gmra.mxu1 %vm496_vm2, %v2759_v45  ;;  %3683 = vmatprep.subr.bf16.mxu0 %v3948_v0 }
0x1e6f   : > { %3657 = vmatprep.mubr.msk.bf16.mxu1 %vm3949_vm0, %v3948_v0 }
0x1f2e   : > { %v2807_v31 = vpop.f32.mrf.mxu1 }
0x1f2f   : > { %v2808_v11 = vadd.f32 %v2807_v31, %v2763_v4 }
0x1f30   : > { %v3651_v37 = vpop.f32.mrf.mxu1 }
0x1f31   : > { %v2813_v39 = vadd.f32 %v2808_v11, %v4733_v2 }
0x1f32   : > { %v2810_v41 = vpop.f32.mrf.mxu1 }
0x1f33   : > { %v2814_v44 = vsel %vm496_vm2, %v2813_v39, 0.0 }
0x1f34   : > { %2815 = vadd.xlane.f32.xlu0 %v2814_v44  ;;  %v3652_v27 = vpop.f32.mrf.mxu1 }
0x1f4a   : > { %2862 = vrot.lane.b32.xlu0 %v4715_v15, %s3955_s12 }
0x1f4e   : > { %2858 = vrot.lane.b32.xlu0 %v4721_v26, %s3955_s12 }
0x1f52   : > { %2939 = vrot.lane.b32.xlu0 %v4672_v5, %s3953_s29  ;;  %v3773_v5 = vld [vmem:[%s4857_s5 + $0x6c] ss:$16 sps:$4 sm:$0xff]  }
0x1f56   : > { %2935 = vrot.lane.b32.xlu0 %v4680_v51, %s3953_s29  ;;  %v3774_v51 = vld [vmem:[%s4857_s5 + $0x4c] ss:$16 sps:$4 sm:$0xff]  }
0x1f5a   : > { %2931 = vrot.lane.b32.xlu0 %v4688_v9, %s3953_s29 }
0x1f5e   : > { %2927 = vrot.lane.b32.xlu0 %v4696_v54, %s3953_s29 }
0x1fbd   : > { %v2816_v22 = vpop.xlane.xlu0 %2815 }
0x1fbe   : > { %v2817_v2 = vmul.f32 0.03125, %v2816_v22 }
0x1fc0   : > { %v2818_v21 = vsub.f32 %v2813_v39, %v2817_v2 }
0x1fc1   : > { %v2863_v54 = vpop.permute.xlu0 %2862 }
0x1fc2   : > { %v2819_v13 = vmul.f32 %v2818_v21, %v2818_v21 }
0x1fc4   : > { %v2820_v15 = vsel %vm496_vm2, %v2819_v13, 0.0 }
0x1fc5   : > { %2821 = vadd.xlane.f32.xlu1 %v2820_v15  ;;  %v2859_v18 = vpop.permute.xlu0 %2858  ;;  %v1812_v15 = vld [vmem:[#allocation6 + $0x38] sm:$0x3] }
0x1fc9   : > { %v2940_v50 = vpop.permute.xlu0 %2939 }
0x1fcd   : > { %v2936_v19 = vpop.permute.xlu0 %2935 }
0x1fd1   : > { %v2932_v3 = vpop.permute.xlu0 %2931 }
0x1fd5   : > { %v2928_v55 = vpop.permute.xlu0 %2927 }
0x1fd6   : > { %2864 = vrot.lane.b32.xlu1 %v3773_v5, %s3955_s12  ;;  %v3006_v5 = vrot.slane %v1812_v15, %v4122_v28 }
0x1fda   : > { %2860 = vrot.lane.b32.xlu1 %v3774_v51, %s3955_s12 }
0x1fde   : > { %2937 = vrot.lane.b32.xlu1 %v4676_v8, %s3953_s29 }
0x1fe2   : > { %2933 = vrot.lane.b32.xlu1 %v4684_v29, %s3953_s29 }
0x1fe6   : > { %2929 = vrot.lane.b32.xlu1 %v4692_v10, %s3953_s29  ;;  %v2830_v10 = vrot.slane %v4750_v32, %v4292_v16  ;;  %v3776_v32 = vld [vmem:[%s4861_s9] sm:$0xff]  }
0x1fe7   : > { %3684 = vmatpush3.bf16.msra.mxu0 %v3776_v32 }
0x1fea   : > { %2925 = vrot.lane.b32.xlu1 %v4700_v12, %s3953_s29 }
0x204e   : > { %v2822_v9 = vpop.xlane.xlu1 %2821 }
0x204f   : > { %v2823_v26 = vmul.f32 0.03125, %v2822_v9 }
0x2051   : > { %v2824_v58 = vadd.f32 1e-05, %v2823_v26 }
0x2052   : > { %v2865_v56 = vpop.permute.xlu1 %2864 }
0x2053   : > { %3851 = vrsqrt.f32 %v2824_v58  ;;  %v2867_v1 = vsel %vm496_vm2, %v2863_v54, %v2865_v56  ;;  %v3011_v54 = vrot.slane %v1812_v15, %v4130_v33 }
0x2054   : > { %3654 = vmatpush3.bf16.msra.mxu1 %v2867_v1 }
0x2055   : > { %3655 = vmatprep.subr.bf16.mxu1 %v3948_v0 }
0x2056   : > { %v2861_v8 = vpop.permute.xlu1 %2860 }
0x2057   : > { %v2866_v29 = vsel %vm496_vm2, %v2859_v18, %v2861_v8 }
0x2058   : > { %3656 = vmatpush3.bf16.msra.mxu1 %v2866_v29 }
0x2059   : > { %3661 = vmatprep.subr.bf16.mxu1 %v3948_v0 }
0x205a   : > { %v2938_v17 = vpop.permute.xlu1 %2937 }
0x205e   : > { %v2934_v25 = vpop.permute.xlu1 %2933 }
0x2060   : > { %v3852_v12 = vpop.eup %3851 }
0x2061   : > { %v2826_v20 = vmul.f32 %v3852_v12, %v2818_v21 }
0x2062   : > { %v2930_v53 = vpop.permute.xlu1 %2929 }
0x2063   : > { %v2831_v24 = vmul.f32 %v2830_v10, %v2826_v20 }
0x2065   : > { %v2836_v34 = vadd.f32 %v2835_v23, %v2831_v24 }
0x2066   : > { %v2926_v52 = vpop.permute.xlu1 %2925 }
0x2067   : > { %v2841_v14 = vmul.f32 %v2840_v30, %v2836_v34 }
0x2069   : > { %v2846_v46 = vadd.f32 %v2845_v35, %v2841_v14 }
0x206b   : > { %v2847_v47 = vpack.c.bf16 %v2846_v46, %v2846_v46 }
0x206d   : > { %3658 = vmatmul.mubr.msk.bf16.vlgmr.msra.gmra.mxu1 %vm496_vm2, %v2847_v47 }
0x206e   : > { %3677 = vmatprep.mubr.msk.bf16.mxu1 %vm3949_vm0, %v3948_v0  ;;  %3662 = vmatpush3.bf16.msra.mxu1 %v2940_v50 }
0x206f   : > { %3663 = vmatprep.subr.bf16.mxu1 %v3948_v0 }
0x2072   : > { %3664 = vmatpush3.bf16.msra.mxu1 %v2938_v17 }
0x2073   : > { %3665 = vmatprep.subr.bf16.mxu1 %v3948_v0 }
0x2076   : > { %3666 = vmatpush3.bf16.msra.mxu1 %v2936_v19 }
0x2077   : > { %3667 = vmatprep.subr.bf16.mxu1 %v3948_v0 }
0x207a   : > { %3668 = vmatpush3.bf16.msra.mxu1 %v2934_v25 }
0x207b   : > { %3669 = vmatprep.subr.bf16.mxu1 %v3948_v0 }
0x207e   : > { %3670 = vmatpush3.bf16.msra.mxu1 %v2932_v3 }
0x207f   : > { %3671 = vmatprep.subr.bf16.mxu1 %v3948_v0 }
0x2082   : > { %3672 = vmatpush3.bf16.msra.mxu1 %v2930_v53 }
0x2083   : > { %3673 = vmatprep.subr.bf16.mxu1 %v3948_v0 }
0x2086   : > { %3674 = vmatpush3.bf16.msra.mxu1 %v2928_v55 }
0x2087   : > { %3675 = vmatprep.subr.bf16.mxu1 %v3948_v0  ;;  %v3286_v0 = vld [vmem:[%s4862_s10] ss:$0 sm:$0xff] }
0x208a   : > { %3676 = vmatpush3.bf16.msra.mxu1 %v2926_v52 }
0x212d   : > { %v2907_v61 = vpop.f32.mrf.mxu1 }
0x212e   : > { %v2908_v63 = vadd.f32 %v2907_v61, %v2851_v59 }
0x212f   : > { %v3659_v49 = vpop.f32.mrf.mxu1 }
0x2130   : > { %v3285_v6 = vmul.f32 -1.442695, %v2908_v63 }
0x2131   : > { %v2910_v48 = vpop.f32.mrf.mxu1 }
0x2132   : > { %3853 = vpow2.f32 %v3285_v6 }
0x2133   : > { %v3660_v7 = vpop.f32.mrf.mxu1 }
0x213f   : > { %v3854_v42 = vpop.eup %3853 }
0x2140   : > { %v2916_v38 = vadd.f32 1.0, %v3854_v42 }
0x2142   : > { %3855 = vrcp.f32 %v2916_v38 }
0x214f   : > { %v3856_v62 = vpop.eup %3855 }
0x2150   : > { %v2919_v57 = vmul.f32 %v3856_v62, %v2908_v63 }
0x2152   : > { %v2920_v40 = vpack.c.bf16 %v2919_v57, %v2919_v57 }
0x2154   : > { %3678 = vmatmul.mubr.bf16.vlgmr.msra.gmra.mxu1 %v2920_v40 }
0x2214   : > { %v2983_v45 = vpop.f32.mrf.mxu1 }
0x2215   : > { %v2984_v4 = vadd.f32 %v2983_v45, %v2924_v43 }
0x2216   : > { %v3679_v16 = vpop.f32.mrf.mxu1 }
0x2217   : > { %v2989_v36 = vadd.f32 %v2984_v4, %v2836_v34 }
0x2218   : > { %v2986_v31 = vpop.f32.mrf.mxu1 }
0x2219   : > { %v2990_v11 = vsel %vm496_vm2, %v2989_v36, 0.0 }
0x221a   : > { %2991 = vadd.xlane.f32.xlu0 %v2990_v11  ;;  %v3680_v37 = vpop.f32.mrf.mxu1 }
0x22a3   : > { %v2992_v39 = vpop.xlane.xlu0 %2991 }
0x22a4   : > { %v2993_v41 = vmul.f32 0.03125, %v2992_v39 }
0x22a6   : > { %v2994_v44 = vsub.f32 %v2989_v36, %v2993_v41 }
0x22a8   : > { %v2995_v27 = vmul.f32 %v2994_v44, %v2994_v44 }
0x22aa   : > { %v2996_v22 = vsel %vm496_vm2, %v2995_v27, 0.0 }
0x22ab   : > { %2997 = vadd.xlane.f32.xlu1 %v2996_v22 }
0x2334   : > { %v2998_v2 = vpop.xlane.xlu1 %2997 }
0x2335   : > { %v2999_v21 = vmul.f32 0.03125, %v2998_v2 }
0x2337   : > { %v3000_v13 = vadd.f32 1e-05, %v2999_v21 }
0x2339   : > { %3857 = vrsqrt.f32 %v3000_v13 }
0x2346   : > { %v3858_v51 = vpop.eup %3857 }
0x2347   : > { %v3002_v9 = vmul.f32 %v3858_v51, %v2994_v44 }
0x2349   : > { %v3007_v26 = vmul.f32 %v3006_v5, %v3002_v9 }
0x234b   : > { %v3012_v58 = vadd.f32 %v3011_v54, %v3007_v26 }
0x234d   : > { %v3013_v56 = vpack.c.bf16 %v3012_v58, %v3012_v58 }
0x234f   : > { %3686 = vmatmul.mubr.msk.bf16.vlgmr.msra.gmra.mxu0 %vm496_vm2, %v3013_v56 }
0x240f   : > { %v3074_v1 = vpop.f32.mrf.mxu0 }
0x2410   : > { %v3075_v18 = vadd.f32 %v3286_v0, %v3074_v1 }
0x2411   : > { %v3687_v8 = vpop.f32.mrf.mxu0 }
0x2412   : > { %3080 = vxpose.xlu0.b32.start.end [1/1] (short) (narrow) %v3075_v18, 16 }
0x2413   : > { %v3077_v29 = vpop.f32.mrf.mxu0 }
0x2415   : > { %v3688_v10 = vpop.f32.mrf.mxu0 }
0x248e   : > { %v3096_v28 = vpop.trf.xlu0 }
0x248f   : > { %3112 = vst.msk [vmem:[%s396_s13] sm:$0xff] %vm645_vm3, %v3096_v28 }
0x2492   : > { %v3097_v33 = vpop.trf.xlu0 }
0x2493   : > { %3113 = vst.msk [vmem:[%s396_s13 + $0x8] sm:$0xff] %vm645_vm3, %v3097_v33 }
0x2494 PF: > { %s29_s22 = sadd.s32 1, %s3939_s22  }
0x2495   : > { %p26_p7 = scmp.ge.s32.totalorder %s29_s22, 4  }
0x2497   :  { %28 = sbr.rel (!%p26_p7) target bundleno = 17 (0x11), region = 103 }
0x249c   :  { %3135 = vsyncpa [#allocation5], 1 }
0x249d   :  { %3137 = vsyncpa [#allocation5 + $0x1], 1 }
0x249e   :  { %3138 = vsyncpa [#allocation7], 1 }

</bundles_post_ra>
